<compile_context>
chip_gen: v7x
topology: tpu7x:2x2x1
jax: 0.10.0
libtpu: 0.0.40
codegen_flags: <defaults>
</compile_context>

<pallas_src>
import functools

import jax
import jax.numpy as jnp
from jax.experimental import pallas as pl
from jax.experimental.pallas import tpu as pltpu

EPS = 1e-5
LANE = 128
_VMEM_LIMIT = 48 * 1024 * 1024  # safe on v5e/v6e (128 MiB) and v7x (64 MiB)


def _round_up(x, m):
    return (x + m - 1) // m * m


def _compiler_params():
    return pltpu.CompilerParams(
        dimension_semantics=("parallel",),
        vmem_limit_bytes=_VMEM_LIMIT,
    )


# ---------------------------------------------------------------------------
# Pallas kernels
# ---------------------------------------------------------------------------
def _emit_stats(s_ref, y):
    """Per-tile per-channel [sum, sum of squares] into a (1, 2, O) block."""
    o = y.shape[-1]
    s_ref[:, 0:1, :] = jnp.sum(y, axis=0, keepdims=True).reshape(1, 1, o)
    s_ref[:, 1:2, :] = jnp.sum(y * y, axis=0, keepdims=True).reshape(1, 1, o)


def _mm_stats_kernel(p_ref, w_ref, y_ref, s_ref):
    """Tiled matmul (bf16 in, f32 acc) + BN partial statistics."""
    y = jnp.dot(p_ref[...], w_ref[...], preferred_element_type=jnp.float32)
    y_ref[...] = y
    _emit_stats(s_ref, y)


def _mm_stats_split_kernel(p_ref, w_ref, ya_ref, yb_ref, sa_ref, sb_ref, *, split):
    """Fused conv1 || downsample: one matmul against [W1 | Wd], split columns."""
    y = jnp.dot(p_ref[...], w_ref[...], preferred_element_type=jnp.float32)
    ya = y[:, :split]
    yb = y[:, split:]
    ya_ref[...] = ya
    yb_ref[...] = yb
    _emit_stats(sa_ref, ya)
    _emit_stats(sb_ref, yb)


def _bn_relu_kernel(y_ref, sc_ref, sh_ref, o_ref):
    """BN pass 2: o = relu(y*scale + shift), cast for the next matmul."""
    o_ref[...] = jnp.maximum(y_ref[...] * sc_ref[...] + sh_ref[...],
                             0.0).astype(o_ref.dtype)


def _bn_relu_mm_stats_kernel(y_ref, sc_ref, sh_ref, w_ref, o_ref, s_ref, *,
                             m_real, tile_m):
    """Fused bn2-apply + ReLU + conv3(1x1) matmul + bn3 partial stats."""
    h = jnp.maximum(y_ref[...] * sc_ref[...] + sh_ref[...], 0.0)
    # zero rows that are only M-padding so they do not pollute the bn3 stats
    row = jax.lax.broadcasted_iota(jnp.int32, h.shape, 0) + pl.program_id(0) * tile_m
    h = jnp.where(row < m_real, h, 0.0)
    y3 = jnp.dot(h.astype(jnp.bfloat16), w_ref[...],
                 preferred_element_type=jnp.float32)
    o_ref[...] = y3
    _emit_stats(s_ref, y3)


def _merge_kernel(y3_ref, rd_ref, sc3_ref, sh3_ref, scd_ref, shd_ref, o_ref):
    """bn3-apply + downsample_bn-apply (gate pre-folded) + add + ReLU."""
    a = y3_ref[...] * sc3_ref[...] + sh3_ref[...]
    b = rd_ref[...] * scd_ref[...] + shd_ref[...]
    o_ref[...] = jnp.maximum(a + b, 0.0)


# ---------------------------------------------------------------------------
# pallas_call wrappers (grid over M tiles; weights/scales resident)
# ---------------------------------------------------------------------------
def _row_spec(tm, width):
    return pl.BlockSpec((tm, width), lambda i: (i, 0))


def _full_spec(shape):
    n = len(shape)
    return pl.BlockSpec(shape, lambda i: (0,) * n)


def _stats_spec(width):
    return pl.BlockSpec((1, 2, width), lambda i: (i, 0, 0))


def matmul_stats(p, w, tm):
    mp, k = p.shape
    o = w.shape[1]
    g = mp // tm
    return pl.pallas_call(
        _mm_stats_kernel,
        grid=(g,),
        in_specs=[_row_spec(tm, k), _full_spec((k, o))],
        out_specs=[_row_spec(tm, o), _stats_spec(o)],
        out_shape=[jax.ShapeDtypeStruct((mp, o), jnp.float32),
                   jax.ShapeDtypeStruct((g, 2, o), jnp.float32)],
        compiler_params=_compiler_params(),
    )(p, w)


def matmul_stats_split(p, w, split, tm):
    mp, k = p.shape
    o = w.shape[1]
    ob = o - split
    g = mp // tm
    return pl.pallas_call(
        functools.partial(_mm_stats_split_kernel, split=split),
        grid=(g,),
        in_specs=[_row_spec(tm, k), _full_spec((k, o))],
        out_specs=[_row_spec(tm, split), _row_spec(tm, ob),
                   _stats_spec(split), _stats_spec(ob)],
        out_shape=[jax.ShapeDtypeStruct((mp, split), jnp.float32),
                   jax.ShapeDtypeStruct((mp, ob), jnp.float32),
                   jax.ShapeDtypeStruct((g, 2, split), jnp.float32),
                   jax.ShapeDtypeStruct((g, 2, ob), jnp.float32)],
        compiler_params=_compiler_params(),
    )(p, w)


def bn_relu_apply(y, scale, shift, tm, out_dtype):
    mp, o = y.shape
    g = mp // tm
    return pl.pallas_call(
        _bn_relu_kernel,
        grid=(g,),
        in_specs=[_row_spec(tm, o), _full_spec((1, o)), _full_spec((1, o))],
        out_specs=_row_spec(tm, o),
        out_shape=jax.ShapeDtypeStruct((mp, o), out_dtype),
        compiler_params=_compiler_params(),
    )(y, scale, shift)


def bn_relu_matmul_stats(y, scale, shift, w, m_real, tm):
    mp, c = y.shape
    o = w.shape[1]
    g = mp // tm
    return pl.pallas_call(
        functools.partial(_bn_relu_mm_stats_kernel, m_real=m_real, tile_m=tm),
        grid=(g,),
        in_specs=[_row_spec(tm, c), _full_spec((1, c)), _full_spec((1, c)),
                  _full_spec((c, o))],
        out_specs=[_row_spec(tm, o), _stats_spec(o)],
        out_shape=[jax.ShapeDtypeStruct((mp, o), jnp.float32),
                   jax.ShapeDtypeStruct((g, 2, o), jnp.float32)],
        compiler_params=_compiler_params(),
    )(y, scale, shift, w)


def merge_apply(y3, rd, sc3, sh3, scd, shd, tm):
    mp, o = y3.shape
    g = mp // tm
    return pl.pallas_call(
        _merge_kernel,
        grid=(g,),
        in_specs=[_row_spec(tm, o), _row_spec(tm, o)] + [_full_spec((1, o))] * 4,
        out_specs=_row_spec(tm, o),
        out_shape=jax.ShapeDtypeStruct((mp, o), jnp.float32),
        compiler_params=_compiler_params(),
    )(y3, rd, sc3, sh3, scd, shd)


# ---------------------------------------------------------------------------
# Glue: channels-last im2col, weight packing, BN affine from partial stats
# ---------------------------------------------------------------------------
def im2col_cl(x, k, pad):
    """(N, D, H, W, C) -> (N*Do*Ho*Wo, k^3*C); tap-major, channel-minor columns."""
    if pad:
        x = jnp.pad(x, ((0, 0), (pad, pad), (pad, pad), (pad, pad), (0, 0)))
    n, d, h, w, c = x.shape
    do, ho, wo = d - k + 1, h - k + 1, w - k + 1
    cols = [x[:, kd:kd + do, kh:kh + ho, kw:kw + wo, :]
            for kd in range(k) for kh in range(k) for kw in range(k)]
    p = jnp.concatenate(cols, axis=-1)       # (N, Do, Ho, Wo, k^3*C) — no transpose
    return p.reshape(n * do * ho * wo, k * k * k * c), (n, do, ho, wo)


def _wmat(w, cin_pad, cout_pad):
    """torch (O, Cin, kd, kh, kw) -> (k^3*cin_pad, cout_pad) matching im2col_cl."""
    o, cin, kd, kh, kw = w.shape
    wt = jnp.transpose(w, (2, 3, 4, 1, 0))
    wt = jnp.pad(wt, ((0, 0), (0, 0), (0, 0), (0, cin_pad - cin), (0, cout_pad - o)))
    return wt.reshape(kd * kh * kw * cin_pad, cout_pad)


def _bn_affine(partials, gamma, beta, m, width):
    """Reduce per-tile [sum, sumsq] partials into per-channel (scale, shift)."""
    s = jnp.sum(partials, axis=0)                       # (2, width)
    mean = s[0] / m
    var = jnp.maximum(s[1] / m - mean * mean, 0.0)      # biased var (training BN)
    g = jnp.pad(gamma.astype(jnp.float32), (0, width - gamma.shape[0]))
    b = jnp.pad(beta.astype(jnp.float32), (0, width - beta.shape[0]))
    scale = g * jax.lax.rsqrt(var + EPS)                # padded channels -> 0
    shift = b - mean * scale
    return scale.reshape(1, width), shift.reshape(1, width)


# ---------------------------------------------------------------------------
# ConvBlock forward
# ---------------------------------------------------------------------------
def conv_block_forward(x, params, re_zero=False, tile_m=512):
    """x: (N, Cin, D, H, W) float32 (PyTorch NCDHW). Returns NCDHW output."""
    n, cin, _, _, _ = x.shape
    chid = params["w1"].shape[0]
    cout = params["wd"].shape[0]
    cpad = _round_up(chid, LANE)
    opad = _round_up(cout, LANE)
    tm = max(8, (tile_m // 8) * 8)

    x_cl = jnp.transpose(x, (0, 2, 3, 4, 1))            # NDHWC, once

    # ---- conv1 || downsample: one im2col, one fused matmul, split outputs
    p1, (n_, d1, h1, w1) = im2col_cl(x_cl, 3, 0)
    m = p1.shape[0]
    m_pad = _round_up(m, tm)
    p1 = jnp.pad(p1, ((0, m_pad - m), (0, 0))).astype(jnp.bfloat16)
    w_a = jnp.concatenate([_wmat(params["w1"], cin, cpad),
                           _wmat(params["wd"], cin, opad)],
                          axis=1).astype(jnp.bfloat16)
    y1_raw, rd_raw, st1, st_d = matmul_stats_split(p1, w_a, cpad, tm)

    # ---- bn1 (two-pass): reduce partials, then apply + ReLU
    sc1, sh1 = _bn_affine(st1, params["g1"], params["be1"], m, cpad)
    y1n = bn_relu_apply(y1_raw, sc1, sh1, tm, jnp.bfloat16)   # (m_pad, cpad) bf16

    # ---- conv2 (k=3, pad=1) on channels-last activations (padded channels = 0)
    y1n = y1n[:m].reshape(n_, d1, h1, w1, cpad)
    p2, _ = im2col_cl(y1n, 3, 1)
    p2 = jnp.pad(p2, ((0, m_pad - m), (0, 0)))
    w2 = _wmat(params["w2"], cpad, cpad).astype(jnp.bfloat16)
    y2_raw, st2 = matmul_stats(p2, w2, tm)

    # ---- fused bn2-apply + ReLU + conv3(1x1) + bn3 partial stats
    sc2, sh2 = _bn_affine(st2, params["g2"], params["be2"], m, cpad)
    w3 = _wmat(params["w3"], cpad, opad).astype(jnp.bfloat16)
    y3_raw, st3 = bn_relu_matmul_stats(y2_raw, sc2, sh2, w3, m, tm)

    # ---- fused bn3 + downsample_bn + re_zero gate + add + ReLU
    sc3, sh3 = _bn_affine(st3, params["g3"], params["be3"], m, opad)
    scd, shd = _bn_affine(st_d, params["gd"], params["bed"], m, opad)
    gate = params["gate"][0] if re_zero else jnp.float32(1.0)
    out = merge_apply(y3_raw, rd_raw, sc3, sh3, scd * gate, shd * gate, tm)

    out = out[:m, :cout].reshape(n_, d1, h1, w1, cout)
    return jnp.transpose(out, (0, 4, 1, 2, 3))          # back to NCDHW


# ---------------------------------------------------------------------------
# Pure-JAX reference. Conv inputs/weights are cast to bf16 with f32
# accumulation to mirror the kernels' MXU precision; BN math stays f32.
# Conv biases ARE applied here (the kernels drop them; BN cancels them).
# ---------------------------------------------------------------------------
def ref_forward(x, params, re_zero=False):
    def conv(inp, wgt, b, pad):
        y = jax.lax.conv_general_dilated(
            inp.astype(jnp.bfloat16), wgt.astype(jnp.bfloat16),
            window_strides=(1, 1, 1), padding=[(pad, pad)] * 3,
            dimension_numbers=("NCDHW", "OIDHW", "NCDHW"),
            preferred_element_type=jnp.float32)
        return y + b.reshape(1, -1, 1, 1, 1)

    def bn(y, g, b):
        mean = y.mean(axis=(0, 2, 3, 4), keepdims=True)
        var = ((y - mean) ** 2).mean(axis=(0, 2, 3, 4), keepdims=True)
        return ((y - mean) * jax.lax.rsqrt(var + EPS)
                * g.reshape(1, -1, 1, 1, 1) + b.reshape(1, -1, 1, 1, 1))

    h = jax.nn.relu(bn(conv(x, params["w1"], params["b1"], 0), params["g1"], params["be1"]))
    h = jax.nn.relu(bn(conv(h, params["w2"], params["b2"], 1), params["g2"], params["be2"]))
    h = bn(conv(h, params["w3"], params["b3"], 0), params["g3"], params["be3"])
    r = bn(conv(x, params["wd"], params["bd"], 0), params["gd"], params["bed"])
    gate = params["gate"][0] if re_zero else 1.0
    return jax.nn.relu(h + gate * r)


# ---------------------------------------------------------------------------
if __name__ == "__main__":
    N, Cin, Chid, Cout, S = 2, 4, 8, 8, 8
    key = jax.random.PRNGKey(0)
    ks = jax.random.split(key, 16)

    def nrm(k, shape, scale=0.1):
        return scale * jax.random.normal(k, shape, jnp.float32)

    params = {
        # conv1: in -> hidden, k=3
        "w1": nrm(ks[0], (Chid, Cin, 3, 3, 3)), "b1": nrm(ks[1], (Chid,)),
        "g1": 1.0 + nrm(ks[2], (Chid,)), "be1": nrm(ks[3], (Chid,)),
        # conv2: hidden -> hidden, k=3, pad=1
        "w2": nrm(ks[4], (Chid, Chid, 3, 3, 3)), "b2": nrm(ks[5], (Chid,)),
        "g2": 1.0 + nrm(ks[6], (Chid,)), "be2": nrm(ks[7], (Chid,)),
        # conv3: hidden -> out, k=1
        "w3": nrm(ks[8], (Cout, Chid, 1, 1, 1)), "b3": nrm(ks[9], (Cout,)),
        "g3": 1.0 + nrm(ks[10], (Cout,)), "be3": nrm(ks[11], (Cout,)),
        # downsample: in -> out, k=3
        "wd": nrm(ks[12], (Cout, Cin, 3, 3, 3)), "bd": nrm(ks[13], (Cout,)),
        "gd": 1.0 + nrm(ks[14], (Cout,)), "bed": nrm(ks[15], (Cout,)),
        # re_zero gating parameter (used only when re_zero=True)
        "gate": jnp.full((1,), 0.1, jnp.float32),
    }
    # TODO(synk): BatchNorm running_mean/running_var (momentum) buffer updates
    # are not reproduced; only the training-mode forward output is.

    x = jax.random.normal(jax.random.PRNGKey(1), (N, Cin, S, S, S), jnp.float32)

    # tile_m=128 keeps several grid steps alive at these toy shapes so the
    # tiled / two-pass-BN pipeline is exercised (production default is 512).
    fwd = jax.jit(functools.partial(conv_block_forward, re_zero=False, tile_m=128))
    out = jax.block_until_ready(fwd(x, params))

    assert out.shape == (N, Cout, S - 2, S - 2, S - 2), out.shape

    ref = ref_forward(x, params, re_zero=False)
    max_err = float(jnp.max(jnp.abs(out - ref)))
    if not bool(jnp.allclose(out, ref, atol=2e-2, rtol=2e-2)):
        raise SystemExit(f"mismatch vs reference, max abs err = {max_err}")

    print("KERNEL_OK")
</pallas_src>

<mosaic_0001>
module attributes {stable_mosaic.version = 11 : i64} {
  func.func @_mm_stats_split_kernel(%arg0: i32, %arg1: memref<128x108xbf16, #tpu.memory_space<vmem>>, %arg2: memref<108x256xbf16, #tpu.memory_space<vmem>>, %arg3: memref<128x128xf32, #tpu.memory_space<vmem>>, %arg4: memref<128x128xf32, #tpu.memory_space<vmem>>, %arg5: memref<1x2x128xf32, #tpu.memory_space<vmem>>, %arg6: memref<1x2x128xf32, #tpu.memory_space<vmem>>) attributes {dimension_semantics = [#tpu.dimension_semantics<parallel>], iteration_bounds = array<i64: 4>, scalar_prefetch = 0 : i64, scratch_operands = 0 : i64, tpu.core_type = #tpu.core_type<tc>, window_params = [{transform_indices = @transform_0, window_bounds = array<i64: 128, 108>}, {pipeline_mode = #tpu.pipeline_mode<synchronous>, transform_indices = @transform_1, window_bounds = array<i64: 108, 256>}, {transform_indices = @transform_2, window_bounds = array<i64: 128, 128>}, {transform_indices = @transform_3, window_bounds = array<i64: 128, 128>}, {transform_indices = @transform_4, window_bounds = array<i64: 1, 2, 128>}, {transform_indices = @transform_5, window_bounds = array<i64: 1, 2, 128>}]} {
    %c0 = arith.constant 0 : index
    %c0_0 = arith.constant 0 : index
    %0 = vector.load %arg1[%c0, %c0_0] : memref<128x108xbf16, #tpu.memory_space<vmem>>, vector<128x108xbf16>
    %c0_1 = arith.constant 0 : index
    %c0_2 = arith.constant 0 : index
    %1 = vector.load %arg2[%c0_1, %c0_2] : memref<108x256xbf16, #tpu.memory_space<vmem>>, vector<108x256xbf16>
    %cst = arith.constant dense<0.000000e+00> : vector<128x256xf32>
    %2 = tpu.matmul %0, %1, %cst {dimension_numbers = #tpu.dot_dimension_numbers<[1], [0], [0], [1], [0, 0, 1, 1], [], []>} : vector<128x108xbf16>, vector<108x256xbf16>, vector<128x256xf32> -> vector<128x256xf32>
    %3 = vector.extract_strided_slice %2 {offsets = [0, 0], sizes = [128, 128], strides = [1, 1]} : vector<128x256xf32> to vector<128x128xf32>
    %4 = vector.extract_strided_slice %2 {offsets = [0, 128], sizes = [128, 128], strides = [1, 1]} : vector<128x256xf32> to vector<128x128xf32>
    %c0_3 = arith.constant 0 : index
    %c0_4 = arith.constant 0 : index
    %5 = vector.load %arg3[%c0_3, %c0_4] : memref<128x128xf32, #tpu.memory_space<vmem>>, vector<128x128xf32>
    tpu.vector_store %arg3[%c0_3, %c0_4], %3 {strides = array<i32>} : memref<128x128xf32, #tpu.memory_space<vmem>>, vector<128x128xf32>,
    %c0_5 = arith.constant 0 : index
    %c0_6 = arith.constant 0 : index
    %6 = vector.load %arg4[%c0_5, %c0_6] : memref<128x128xf32, #tpu.memory_space<vmem>>, vector<128x128xf32>
    tpu.vector_store %arg4[%c0_5, %c0_6], %4 {strides = array<i32>} : memref<128x128xf32, #tpu.memory_space<vmem>>, vector<128x128xf32>,
    %cst_7 = arith.constant dense<0.000000e+00> : vector<128xf32>
    %7 = vector.multi_reduction <add>, %3, %cst_7 [0] : vector<128x128xf32> to vector<128xf32>
    %8 = vector.shape_cast %7 : vector<128xf32> to vector<1x128xf32>
    %9 = vector.shape_cast %8 : vector<1x128xf32> to vector<1x1x128xf32>
    %c0_8 = arith.constant 0 : index
    %c0_9 = arith.constant 0 : index
    %c0_10 = arith.constant 0 : index
    %10 = vector.load %arg5[%c0_8, %c0_9, %c0_10] : memref<1x2x128xf32, #tpu.memory_space<vmem>>, vector<1x1x128xf32>
    tpu.vector_store %arg5[%c0_8, %c0_9, %c0_10], %9 {strides = array<i32>} : memref<1x2x128xf32, #tpu.memory_space<vmem>>, vector<1x1x128xf32>,
    %11 = arith.mulf %3, %3 : vector<128x128xf32>
    %cst_11 = arith.constant dense<0.000000e+00> : vector<128xf32>
    %12 = vector.multi_reduction <add>, %11, %cst_11 [0] : vector<128x128xf32> to vector<128xf32>
    %13 = vector.shape_cast %12 : vector<128xf32> to vector<1x128xf32>
    %14 = vector.shape_cast %13 : vector<1x128xf32> to vector<1x1x128xf32>
    %c0_12 = arith.constant 0 : index
    %c1 = arith.constant 1 : index
    %c0_13 = arith.constant 0 : index
    %15 = vector.load %arg5[%c0_12, %c1, %c0_13] : memref<1x2x128xf32, #tpu.memory_space<vmem>>, vector<1x1x128xf32>
    tpu.vector_store %arg5[%c0_12, %c1, %c0_13], %14 {strides = array<i32>} : memref<1x2x128xf32, #tpu.memory_space<vmem>>, vector<1x1x128xf32>,
    %cst_14 = arith.constant dense<0.000000e+00> : vector<128xf32>
    %16 = vector.multi_reduction <add>, %4, %cst_14 [0] : vector<128x128xf32> to vector<128xf32>
    %17 = vector.shape_cast %16 : vector<128xf32> to vector<1x128xf32>
    %18 = vector.shape_cast %17 : vector<1x128xf32> to vector<1x1x128xf32>
    %c0_15 = arith.constant 0 : index
    %c0_16 = arith.constant 0 : index
    %c0_17 = arith.constant 0 : index
    %19 = vector.load %arg6[%c0_15, %c0_16, %c0_17] : memref<1x2x128xf32, #tpu.memory_space<vmem>>, vector<1x1x128xf32>
    tpu.vector_store %arg6[%c0_15, %c0_16, %c0_17], %18 {strides = array<i32>} : memref<1x2x128xf32, #tpu.memory_space<vmem>>, vector<1x1x128xf32>,
    %20 = arith.mulf %4, %4 : vector<128x128xf32>
    %cst_18 = arith.constant dense<0.000000e+00> : vector<128xf32>
    %21 = vector.multi_reduction <add>, %20, %cst_18 [0] : vector<128x128xf32> to vector<128xf32>
    %22 = vector.shape_cast %21 : vector<128xf32> to vector<1x128xf32>
    %23 = vector.shape_cast %22 : vector<1x128xf32> to vector<1x1x128xf32>
    %c0_19 = arith.constant 0 : index
    %c1_20 = arith.constant 1 : index
    %c0_21 = arith.constant 0 : index
    %24 = vector.load %arg6[%c0_19, %c1_20, %c0_21] : memref<1x2x128xf32, #tpu.memory_space<vmem>>, vector<1x1x128xf32>
    tpu.vector_store %arg6[%c0_19, %c1_20, %c0_21], %23 {strides = array<i32>} : memref<1x2x128xf32, #tpu.memory_space<vmem>>, vector<1x1x128xf32>,
    return
  }
  func.func @transform_0(%arg0: i32) -> (i32, i32) {
    %c0_i32 = arith.constant 0 : i32
    %c0_i32_0 = arith.constant 0 : i32
    return %arg0, %c0_i32 : i32, i32
  }
  func.func @transform_1(%arg0: i32) -> (i32, i32) {
    %c0_i32 = arith.constant 0 : i32
    %c0_i32_0 = arith.constant 0 : i32
    %c0_i32_1 = arith.constant 0 : i32
    return %c0_i32, %c0_i32_0 : i32, i32
  }
  func.func @transform_2(%arg0: i32) -> (i32, i32) {
    %c0_i32 = arith.constant 0 : i32
    %c0_i32_0 = arith.constant 0 : i32
    return %arg0, %c0_i32 : i32, i32
  }
  func.func @transform_3(%arg0: i32) -> (i32, i32) {
    %c0_i32 = arith.constant 0 : i32
    %c0_i32_0 = arith.constant 0 : i32
    return %arg0, %c0_i32 : i32, i32
  }
  func.func @transform_4(%arg0: i32) -> (i32, i32, i32) {
    %c0_i32 = arith.constant 0 : i32
    %c0_i32_0 = arith.constant 0 : i32
    %c0_i32_1 = arith.constant 0 : i32
    return %arg0, %c0_i32, %c0_i32_0 : i32, i32, i32
  }
  func.func @transform_5(%arg0: i32) -> (i32, i32, i32) {
    %c0_i32 = arith.constant 0 : i32
    %c0_i32_0 = arith.constant 0 : i32
    %c0_i32_1 = arith.constant 0 : i32
    return %arg0, %c0_i32, %c0_i32_0 : i32, i32, i32
  }
}

module attributes {stable_mosaic.version = 11 : i64} {
  func.func @_bn_relu_kernel(%arg0: i32, %arg1: memref<128x128xf32, #tpu.memory_space<vmem>>, %arg2: memref<1x128xf32, #tpu.memory_space<vmem>>, %arg3: memref<1x128xf32, #tpu.memory_space<vmem>>, %arg4: memref<128x128xbf16, #tpu.memory_space<vmem>>) attributes {dimension_semantics = [#tpu.dimension_semantics<parallel>], iteration_bounds = array<i64: 4>, scalar_prefetch = 0 : i64, scratch_operands = 0 : i64, tpu.core_type = #tpu.core_type<tc>, window_params = [{transform_indices = @transform_0, window_bounds = array<i64: 128, 128>}, {pipeline_mode = #tpu.pipeline_mode<synchronous>, transform_indices = @transform_1, window_bounds = array<i64: 1, 128>}, {pipeline_mode = #tpu.pipeline_mode<synchronous>, transform_indices = @transform_2, window_bounds = array<i64: 1, 128>}, {transform_indices = @transform_3, window_bounds = array<i64: 128, 128>}]} {
    %c0 = arith.constant 0 : index
    %c0_0 = arith.constant 0 : index
    %0 = vector.load %arg1[%c0, %c0_0] : memref<128x128xf32, #tpu.memory_space<vmem>>, vector<128x128xf32>
    %c0_1 = arith.constant 0 : index
    %c0_2 = arith.constant 0 : index
    %1 = vector.load %arg2[%c0_1, %c0_2] : memref<1x128xf32, #tpu.memory_space<vmem>>, vector<1x128xf32>
    %2 = vector.broadcast %1 : vector<1x128xf32> to vector<128x128xf32>
    %3 = arith.mulf %0, %2 : vector<128x128xf32>
    %c0_3 = arith.constant 0 : index
    %c0_4 = arith.constant 0 : index
    %4 = vector.load %arg3[%c0_3, %c0_4] : memref<1x128xf32, #tpu.memory_space<vmem>>, vector<1x128xf32>
    %5 = vector.broadcast %4 : vector<1x128xf32> to vector<128x128xf32>
    %6 = arith.addf %3, %5 : vector<128x128xf32>
    %cst = arith.constant 0.000000e+00 : f32
    %7 = vector.broadcast %cst : f32 to vector<128x128xf32>
    %8 = arith.maximumf %6, %7 : vector<128x128xf32>
    %9 = arith.truncf %8 : vector<128x128xf32> to vector<128x128xbf16>
    %c0_5 = arith.constant 0 : index
    %c0_6 = arith.constant 0 : index
    %10 = vector.load %arg4[%c0_5, %c0_6] : memref<128x128xbf16, #tpu.memory_space<vmem>>, vector<128x128xbf16>
    tpu.vector_store %arg4[%c0_5, %c0_6], %9 {strides = array<i32>} : memref<128x128xbf16, #tpu.memory_space<vmem>>, vector<128x128xbf16>,
    return
  }
  func.func @transform_0(%arg0: i32) -> (i32, i32) {
    %c0_i32 = arith.constant 0 : i32
    %c0_i32_0 = arith.constant 0 : i32
    return %arg0, %c0_i32 : i32, i32
  }
  func.func @transform_1(%arg0: i32) -> (i32, i32) {
    %c0_i32 = arith.constant 0 : i32
    %c0_i32_0 = arith.constant 0 : i32
    %c0_i32_1 = arith.constant 0 : i32
    return %c0_i32, %c0_i32_0 : i32, i32
  }
  func.func @transform_2(%arg0: i32) -> (i32, i32) {
    %c0_i32 = arith.constant 0 : i32
    %c0_i32_0 = arith.constant 0 : i32
    %c0_i32_1 = arith.constant 0 : i32
    return %c0_i32, %c0_i32_0 : i32, i32
  }
  func.func @transform_3(%arg0: i32) -> (i32, i32) {
    %c0_i32 = arith.constant 0 : i32
    %c0_i32_0 = arith.constant 0 : i32
    return %arg0, %c0_i32 : i32, i32
  }
}

module attributes {stable_mosaic.version = 11 : i64} {
  func.func @_mm_stats_kernel(%arg0: i32, %arg1: memref<128x3456xbf16, #tpu.memory_space<vmem>>, %arg2: memref<3456x128xbf16, #tpu.memory_space<vmem>>, %arg3: memref<128x128xf32, #tpu.memory_space<vmem>>, %arg4: memref<1x2x128xf32, #tpu.memory_space<vmem>>) attributes {dimension_semantics = [#tpu.dimension_semantics<parallel>], iteration_bounds = array<i64: 4>, scalar_prefetch = 0 : i64, scratch_operands = 0 : i64, tpu.core_type = #tpu.core_type<tc>, window_params = [{transform_indices = @transform_0, window_bounds = array<i64: 128, 3456>}, {pipeline_mode = #tpu.pipeline_mode<synchronous>, transform_indices = @transform_1, window_bounds = array<i64: 3456, 128>}, {transform_indices = @transform_2, window_bounds = array<i64: 128, 128>}, {transform_indices = @transform_3, window_bounds = array<i64: 1, 2, 128>}]} {
    %c0 = arith.constant 0 : index
    %c0_0 = arith.constant 0 : index
    %0 = vector.load %arg1[%c0, %c0_0] : memref<128x3456xbf16, #tpu.memory_space<vmem>>, vector<128x3456xbf16>
    %c0_1 = arith.constant 0 : index
    %c0_2 = arith.constant 0 : index
    %1 = vector.load %arg2[%c0_1, %c0_2] : memref<3456x128xbf16, #tpu.memory_space<vmem>>, vector<3456x128xbf16>
    %cst = arith.constant dense<0.000000e+00> : vector<128x128xf32>
    %2 = tpu.matmul %0, %1, %cst {dimension_numbers = #tpu.dot_dimension_numbers<[1], [0], [0], [1], [0, 0, 1, 1], [], []>} : vector<128x3456xbf16>, vector<3456x128xbf16>, vector<128x128xf32> -> vector<128x128xf32>
    %c0_3 = arith.constant 0 : index
    %c0_4 = arith.constant 0 : index
    %3 = vector.load %arg3[%c0_3, %c0_4] : memref<128x128xf32, #tpu.memory_space<vmem>>, vector<128x128xf32>
    tpu.vector_store %arg3[%c0_3, %c0_4], %2 {strides = array<i32>} : memref<128x128xf32, #tpu.memory_space<vmem>>, vector<128x128xf32>,
    %cst_5 = arith.constant dense<0.000000e+00> : vector<128xf32>
    %4 = vector.multi_reduction <add>, %2, %cst_5 [0] : vector<128x128xf32> to vector<128xf32>
    %5 = vector.shape_cast %4 : vector<128xf32> to vector<1x128xf32>
    %6 = vector.shape_cast %5 : vector<1x128xf32> to vector<1x1x128xf32>
    %c0_6 = arith.constant 0 : index
    %c0_7 = arith.constant 0 : index
    %c0_8 = arith.constant 0 : index
    %7 = vector.load %arg4[%c0_6, %c0_7, %c0_8] : memref<1x2x128xf32, #tpu.memory_space<vmem>>, vector<1x1x128xf32>
    tpu.vector_store %arg4[%c0_6, %c0_7, %c0_8], %6 {strides = array<i32>} : memref<1x2x128xf32, #tpu.memory_space<vmem>>, vector<1x1x128xf32>,
    %8 = arith.mulf %2, %2 : vector<128x128xf32>
    %cst_9 = arith.constant dense<0.000000e+00> : vector<128xf32>
    %9 = vector.multi_reduction <add>, %8, %cst_9 [0] : vector<128x128xf32> to vector<128xf32>
    %10 = vector.shape_cast %9 : vector<128xf32> to vector<1x128xf32>
    %11 = vector.shape_cast %10 : vector<1x128xf32> to vector<1x1x128xf32>
    %c0_10 = arith.constant 0 : index
    %c1 = arith.constant 1 : index
    %c0_11 = arith.constant 0 : index
    %12 = vector.load %arg4[%c0_10, %c1, %c0_11] : memref<1x2x128xf32, #tpu.memory_space<vmem>>, vector<1x1x128xf32>
    tpu.vector_store %arg4[%c0_10, %c1, %c0_11], %11 {strides = array<i32>} : memref<1x2x128xf32, #tpu.memory_space<vmem>>, vector<1x1x128xf32>,
    return
  }
  func.func @transform_0(%arg0: i32) -> (i32, i32) {
    %c0_i32 = arith.constant 0 : i32
    %c0_i32_0 = arith.constant 0 : i32
    return %arg0, %c0_i32 : i32, i32
  }
  func.func @transform_1(%arg0: i32) -> (i32, i32) {
    %c0_i32 = arith.constant 0 : i32
    %c0_i32_0 = arith.constant 0 : i32
    %c0_i32_1 = arith.constant 0 : i32
    return %c0_i32, %c0_i32_0 : i32, i32
  }
  func.func @transform_2(%arg0: i32) -> (i32, i32) {
    %c0_i32 = arith.constant 0 : i32
    %c0_i32_0 = arith.constant 0 : i32
    return %arg0, %c0_i32 : i32, i32
  }
  func.func @transform_3(%arg0: i32) -> (i32, i32, i32) {
    %c0_i32 = arith.constant 0 : i32
    %c0_i32_0 = arith.constant 0 : i32
    %c0_i32_1 = arith.constant 0 : i32
    return %arg0, %c0_i32, %c0_i32_0 : i32, i32, i32
  }
}

module attributes {stable_mosaic.version = 11 : i64} {
  func.func @_bn_relu_mm_stats_kernel(%arg0: i32, %arg1: memref<128x128xf32, #tpu.memory_space<vmem>>, %arg2: memref<1x128xf32, #tpu.memory_space<vmem>>, %arg3: memref<1x128xf32, #tpu.memory_space<vmem>>, %arg4: memref<128x128xbf16, #tpu.memory_space<vmem>>, %arg5: memref<128x128xf32, #tpu.memory_space<vmem>>, %arg6: memref<1x2x128xf32, #tpu.memory_space<vmem>>) attributes {dimension_semantics = [#tpu.dimension_semantics<parallel>], iteration_bounds = array<i64: 4>, scalar_prefetch = 0 : i64, scratch_operands = 0 : i64, tpu.core_type = #tpu.core_type<tc>, window_params = [{transform_indices = @transform_0, window_bounds = array<i64: 128, 128>}, {pipeline_mode = #tpu.pipeline_mode<synchronous>, transform_indices = @transform_1, window_bounds = array<i64: 1, 128>}, {pipeline_mode = #tpu.pipeline_mode<synchronous>, transform_indices = @transform_2, window_bounds = array<i64: 1, 128>}, {pipeline_mode = #tpu.pipeline_mode<synchronous>, transform_indices = @transform_3, window_bounds = array<i64: 128, 128>}, {transform_indices = @transform_4, window_bounds = array<i64: 128, 128>}, {transform_indices = @transform_5, window_bounds = array<i64: 1, 2, 128>}]} {
    %c0 = arith.constant 0 : index
    %c0_0 = arith.constant 0 : index
    %0 = vector.load %arg1[%c0, %c0_0] : memref<128x128xf32, #tpu.memory_space<vmem>>, vector<128x128xf32>
    %c0_1 = arith.constant 0 : index
    %c0_2 = arith.constant 0 : index
    %1 = vector.load %arg2[%c0_1, %c0_2] : memref<1x128xf32, #tpu.memory_space<vmem>>, vector<1x128xf32>
    %2 = vector.broadcast %1 : vector<1x128xf32> to vector<128x128xf32>
    %3 = arith.mulf %0, %2 : vector<128x128xf32>
    %c0_3 = arith.constant 0 : index
    %c0_4 = arith.constant 0 : index
    %4 = vector.load %arg3[%c0_3, %c0_4] : memref<1x128xf32, #tpu.memory_space<vmem>>, vector<1x128xf32>
    %5 = vector.broadcast %4 : vector<1x128xf32> to vector<128x128xf32>
    %6 = arith.addf %3, %5 : vector<128x128xf32>
    %cst = arith.constant 0.000000e+00 : f32
    %7 = vector.broadcast %cst : f32 to vector<128x128xf32>
    %8 = arith.maximumf %6, %7 : vector<128x128xf32>
    %9 = tpu.iota {dimensions = array<i32: 0>} : vector<128x128xi32>
    %c128_i32 = arith.constant 128 : i32
    %10 = arith.muli %arg0, %c128_i32 : i32
    %11 = vector.broadcast %10 : i32 to vector<128x128xi32>
    %12 = arith.addi %9, %11 : vector<128x128xi32>
    %c432_i32 = arith.constant 432 : i32
    %13 = vector.broadcast %c432_i32 : i32 to vector<128x128xi32>
    %14 = arith.cmpi slt, %12, %13 : vector<128x128xi32>
    %cst_5 = arith.constant 0.000000e+00 : f32
    %15 = vector.broadcast %cst_5 : f32 to vector<128x128xf32>
    %16 = arith.select %14, %8, %15 : vector<128x128xi1>, vector<128x128xf32>
    %17 = arith.truncf %16 : vector<128x128xf32> to vector<128x128xbf16>
    %c0_6 = arith.constant 0 : index
    %c0_7 = arith.constant 0 : index
    %18 = vector.load %arg4[%c0_6, %c0_7] : memref<128x128xbf16, #tpu.memory_space<vmem>>, vector<128x128xbf16>
    %cst_8 = arith.constant dense<0.000000e+00> : vector<128x128xf32>
    %19 = tpu.matmul %17, %18, %cst_8 {dimension_numbers = #tpu.dot_dimension_numbers<[1], [0], [0], [1], [0, 0, 1, 1], [], []>} : vector<128x128xbf16>, vector<128x128xbf16>, vector<128x128xf32> -> vector<128x128xf32>
    %c0_9 = arith.constant 0 : index
    %c0_10 = arith.constant 0 : index
    %20 = vector.load %arg5[%c0_9, %c0_10] : memref<128x128xf32, #tpu.memory_space<vmem>>, vector<128x128xf32>
    tpu.vector_store %arg5[%c0_9, %c0_10], %19 {strides = array<i32>} : memref<128x128xf32, #tpu.memory_space<vmem>>, vector<128x128xf32>,
    %cst_11 = arith.constant dense<0.000000e+00> : vector<128xf32>
    %21 = vector.multi_reduction <add>, %19, %cst_11 [0] : vector<128x128xf32> to vector<128xf32>
    %22 = vector.shape_cast %21 : vector<128xf32> to vector<1x128xf32>
    %23 = vector.shape_cast %22 : vector<1x128xf32> to vector<1x1x128xf32>
    %c0_12 = arith.constant 0 : index
    %c0_13 = arith.constant 0 : index
    %c0_14 = arith.constant 0 : index
    %24 = vector.load %arg6[%c0_12, %c0_13, %c0_14] : memref<1x2x128xf32, #tpu.memory_space<vmem>>, vector<1x1x128xf32>
    tpu.vector_store %arg6[%c0_12, %c0_13, %c0_14], %23 {strides = array<i32>} : memref<1x2x128xf32, #tpu.memory_space<vmem>>, vector<1x1x128xf32>,
    %25 = arith.mulf %19, %19 : vector<128x128xf32>
    %cst_15 = arith.constant dense<0.000000e+00> : vector<128xf32>
    %26 = vector.multi_reduction <add>, %25, %cst_15 [0] : vector<128x128xf32> to vector<128xf32>
    %27 = vector.shape_cast %26 : vector<128xf32> to vector<1x128xf32>
    %28 = vector.shape_cast %27 : vector<1x128xf32> to vector<1x1x128xf32>
    %c0_16 = arith.constant 0 : index
    %c1 = arith.constant 1 : index
    %c0_17 = arith.constant 0 : index
    %29 = vector.load %arg6[%c0_16, %c1, %c0_17] : memref<1x2x128xf32, #tpu.memory_space<vmem>>, vector<1x1x128xf32>
    tpu.vector_store %arg6[%c0_16, %c1, %c0_17], %28 {strides = array<i32>} : memref<1x2x128xf32, #tpu.memory_space<vmem>>, vector<1x1x128xf32>,
    return
  }
  func.func @transform_0(%arg0: i32) -> (i32, i32) {
    %c0_i32 = arith.constant 0 : i32
    %c0_i32_0 = arith.constant 0 : i32
    return %arg0, %c0_i32 : i32, i32
  }
  func.func @transform_1(%arg0: i32) -> (i32, i32) {
    %c0_i32 = arith.constant 0 : i32
    %c0_i32_0 = arith.constant 0 : i32
    %c0_i32_1 = arith.constant 0 : i32
    return %c0_i32, %c0_i32_0 : i32, i32
  }
  func.func @transform_2(%arg0: i32) -> (i32, i32) {
    %c0_i32 = arith.constant 0 : i32
    %c0_i32_0 = arith.constant 0 : i32
    %c0_i32_1 = arith.constant 0 : i32
    return %c0_i32, %c0_i32_0 : i32, i32
  }
  func.func @transform_3(%arg0: i32) -> (i32, i32) {
    %c0_i32 = arith.constant 0 : i32
    %c0_i32_0 = arith.constant 0 : i32
    %c0_i32_1 = arith.constant 0 : i32
    return %c0_i32, %c0_i32_0 : i32, i32
  }
  func.func @transform_4(%arg0: i32) -> (i32, i32) {
    %c0_i32 = arith.constant 0 : i32
    %c0_i32_0 = arith.constant 0 : i32
    return %arg0, %c0_i32 : i32, i32
  }
  func.func @transform_5(%arg0: i32) -> (i32, i32, i32) {
    %c0_i32 = arith.constant 0 : i32
    %c0_i32_0 = arith.constant 0 : i32
    %c0_i32_1 = arith.constant 0 : i32
    return %arg0, %c0_i32, %c0_i32_0 : i32, i32, i32
  }
}

module attributes {stable_mosaic.version = 11 : i64} {
  func.func @_merge_kernel(%arg0: i32, %arg1: memref<128x128xf32, #tpu.memory_space<vmem>>, %arg2: memref<128x128xf32, #tpu.memory_space<vmem>>, %arg3: memref<1x128xf32, #tpu.memory_space<vmem>>, %arg4: memref<1x128xf32, #tpu.memory_space<vmem>>, %arg5: memref<1x128xf32, #tpu.memory_space<vmem>>, %arg6: memref<1x128xf32, #tpu.memory_space<vmem>>, %arg7: memref<128x128xf32, #tpu.memory_space<vmem>>) attributes {dimension_semantics = [#tpu.dimension_semantics<parallel>], iteration_bounds = array<i64: 4>, scalar_prefetch = 0 : i64, scratch_operands = 0 : i64, tpu.core_type = #tpu.core_type<tc>, window_params = [{transform_indices = @transform_0, window_bounds = array<i64: 128, 128>}, {transform_indices = @transform_1, window_bounds = array<i64: 128, 128>}, {pipeline_mode = #tpu.pipeline_mode<synchronous>, transform_indices = @transform_2, window_bounds = array<i64: 1, 128>}, {pipeline_mode = #tpu.pipeline_mode<synchronous>, transform_indices = @transform_3, window_bounds = array<i64: 1, 128>}, {pipeline_mode = #tpu.pipeline_mode<synchronous>, transform_indices = @transform_4, window_bounds = array<i64: 1, 128>}, {pipeline_mode = #tpu.pipeline_mode<synchronous>, transform_indices = @transform_5, window_bounds = array<i64: 1, 128>}, {transform_indices = @transform_6, window_bounds = array<i64: 128, 128>}]} {
    %c0 = arith.constant 0 : index
    %c0_0 = arith.constant 0 : index
    %0 = vector.load %arg1[%c0, %c0_0] : memref<128x128xf32, #tpu.memory_space<vmem>>, vector<128x128xf32>
    %c0_1 = arith.constant 0 : index
    %c0_2 = arith.constant 0 : index
    %1 = vector.load %arg3[%c0_1, %c0_2] : memref<1x128xf32, #tpu.memory_space<vmem>>, vector<1x128xf32>
    %2 = vector.broadcast %1 : vector<1x128xf32> to vector<128x128xf32>
    %3 = arith.mulf %0, %2 : vector<128x128xf32>
    %c0_3 = arith.constant 0 : index
    %c0_4 = arith.constant 0 : index
    %4 = vector.load %arg4[%c0_3, %c0_4] : memref<1x128xf32, #tpu.memory_space<vmem>>, vector<1x128xf32>
    %5 = vector.broadcast %4 : vector<1x128xf32> to vector<128x128xf32>
    %6 = arith.addf %3, %5 : vector<128x128xf32>
    %c0_5 = arith.constant 0 : index
    %c0_6 = arith.constant 0 : index
    %7 = vector.load %arg2[%c0_5, %c0_6] : memref<128x128xf32, #tpu.memory_space<vmem>>, vector<128x128xf32>
    %c0_7 = arith.constant 0 : index
    %c0_8 = arith.constant 0 : index
    %8 = vector.load %arg5[%c0_7, %c0_8] : memref<1x128xf32, #tpu.memory_space<vmem>>, vector<1x128xf32>
    %9 = vector.broadcast %8 : vector<1x128xf32> to vector<128x128xf32>
    %10 = arith.mulf %7, %9 : vector<128x128xf32>
    %c0_9 = arith.constant 0 : index
    %c0_10 = arith.constant 0 : index
    %11 = vector.load %arg6[%c0_9, %c0_10] : memref<1x128xf32, #tpu.memory_space<vmem>>, vector<1x128xf32>
    %12 = vector.broadcast %11 : vector<1x128xf32> to vector<128x128xf32>
    %13 = arith.addf %10, %12 : vector<128x128xf32>
    %14 = arith.addf %6, %13 : vector<128x128xf32>
    %cst = arith.constant 0.000000e+00 : f32
    %15 = vector.broadcast %cst : f32 to vector<128x128xf32>
    %16 = arith.maximumf %14, %15 : vector<128x128xf32>
    %c0_11 = arith.constant 0 : index
    %c0_12 = arith.constant 0 : index
    %17 = vector.load %arg7[%c0_11, %c0_12] : memref<128x128xf32, #tpu.memory_space<vmem>>, vector<128x128xf32>
    tpu.vector_store %arg7[%c0_11, %c0_12], %16 {strides = array<i32>} : memref<128x128xf32, #tpu.memory_space<vmem>>, vector<128x128xf32>,
    return
  }
  func.func @transform_0(%arg0: i32) -> (i32, i32) {
    %c0_i32 = arith.constant 0 : i32
    %c0_i32_0 = arith.constant 0 : i32
    return %arg0, %c0_i32 : i32, i32
  }
  func.func @transform_1(%arg0: i32) -> (i32, i32) {
    %c0_i32 = arith.constant 0 : i32
    %c0_i32_0 = arith.constant 0 : i32
    return %arg0, %c0_i32 : i32, i32
  }
  func.func @transform_2(%arg0: i32) -> (i32, i32) {
    %c0_i32 = arith.constant 0 : i32
    %c0_i32_0 = arith.constant 0 : i32
    %c0_i32_1 = arith.constant 0 : i32
    return %c0_i32, %c0_i32_0 : i32, i32
  }
  func.func @transform_3(%arg0: i32) -> (i32, i32) {
    %c0_i32 = arith.constant 0 : i32
    %c0_i32_0 = arith.constant 0 : i32
    %c0_i32_1 = arith.constant 0 : i32
    return %c0_i32, %c0_i32_0 : i32, i32
  }
  func.func @transform_4(%arg0: i32) -> (i32, i32) {
    %c0_i32 = arith.constant 0 : i32
    %c0_i32_0 = arith.constant 0 : i32
    %c0_i32_1 = arith.constant 0 : i32
    return %c0_i32, %c0_i32_0 : i32, i32
  }
  func.func @transform_5(%arg0: i32) -> (i32, i32) {
    %c0_i32 = arith.constant 0 : i32
    %c0_i32_0 = arith.constant 0 : i32
    %c0_i32_1 = arith.constant 0 : i32
    return %c0_i32, %c0_i32_0 : i32, i32
  }
  func.func @transform_6(%arg0: i32) -> (i32, i32) {
    %c0_i32 = arith.constant 0 : i32
    %c0_i32_0 = arith.constant 0 : i32
    return %arg0, %c0_i32 : i32, i32
  }
}

</mosaic_0001>

<bundles_post_ra>
// kernel: conv_block_forward.5
= control target key start
LH: loop header
LB: loop body
LE: loop exit
PB: predicated region body
PF: predicated region fallthrough
CT: control target
= control target key end

     0   :  { %s987_s18 = smov 0   ;;  %s1204_s0 = inlined_call_operand.vmem [shape: bf16[512,108], index: 0, kind: input, shape index: {}]   ;;  %s1205_s1 = inlined_call_operand.vmem [shape: bf16[108,256], index: 1, kind: input, shape index: {}]   ;;  %s1206_s2 = inlined_call_operand.vmem [shape: f32[512,128], index: 2, kind: output, shape index: {0}]   ;;  %s1207_s3 = inlined_call_operand.vmem [shape: f32[512,128], index: 3, kind: output, shape index: {1}]   ;;  %s1208_s4 = inlined_call_operand.vmem [shape: f32[4,2,128], index: 4, kind: output, shape index: {2}]   ;;  %s1209_s5 = inlined_call_operand.vmem [shape: f32[4,2,128], index: 5, kind: output, shape index: {3}]  }
   0x1 LB: > { %s993_s19 = sadd.s32 4294967295, %s954_s18   ;;  %p854_p0 = scmp.ge.s32.totalorder %s954_s18, 1  ;;  %s954_s18 = sphi %s987_s18, %s16_s18  }
   0x2   : > { %p195_p1 = scmp.lt.s32.totalorder %s954_s18, 5 }
   0x4   : > { %p196_p2 = pnand %p854_p0, %p195_p1 }
   0x5   : > { %v919_v0 = vld [vmem:[%s1205_s1 + $0x4] ss:$8 sps:$4 sm:$0xff] (!%p196_p2)   ;;  %v921_v1 = vld [vmem:[%s1205_s1] ss:$8 sps:$4 sm:$0xff] (!%p196_p2)   ;;  %v956_v2 = vmov (!%p196_p2), 0   ;;  %s855_s24 = sshll.u32 (!%p196_p2), %s993_s19, 4 }
   0x6   : > { %199 = sbr.rel (%p196_p2) target bundleno = 307 (0x133), region = 28  ;;  %465 = vmatprep.mubr.bf16.mxu0 (!%p196_p2), %v956_v2  ;;  %505 = vmatprep.mubr.bf16.mxu1 (!%p196_p2), %v956_v2  ;;  %v922_v3 = vld [vmem:[%s1205_s1 + $0x14] ss:$8 sps:$4 sm:$0xff] (!%p196_p2)   ;;  %p237_p3 = scmp.lt.s32.totalorder (!%p196_p2), %s855_s24, 63  ;;  %v924_v4 = vld [vmem:[%s1205_s1 + $0x10] ss:$8 sps:$4 sm:$0xff] (!%p196_p2)  }
   0x7   : > { %433 = vmatprep.subr.bf16.mxu0 (!%p196_p2), %v919_v0  ;;  %896 = vmatprep.subr.bf16.mxu1 (!%p196_p2), %v919_v0  ;;  %v925_v5 = vld [vmem:[%s1205_s1 + $0x24] ss:$8 sps:$4 sm:$0xff] (!%p196_p2)   ;;  %v927_v6 = vld [vmem:[%s1205_s1 + $0x20] ss:$8 sps:$4 sm:$0xff] (!%p196_p2)   ;;  %v928_v7 = vld [vmem:[%s1205_s1 + $0x34] ss:$8 sps:$4 sm:$0xff] (!%p196_p2)  }
   0x8   : > { %434 = vmatpush1.bf16.msra.mxu0 (!%p196_p2), %v921_v1  ;;  %903 = vmatpush1.bf16.msra.mxu1 (!%p196_p2), %v921_v1  ;;  %v930_v8 = vld [vmem:[%s1205_s1 + $0x30] ss:$8 sps:$4 sm:$0xff] (!%p196_p2)   ;;  %v931_v9 = vld [vmem:[%s1205_s1 + $0x44] ss:$8 sps:$4 sm:$0xff] (!%p196_p2)   ;;  %v933_v10 = vld [vmem:[%s1205_s1 + $0x40] ss:$8 sps:$4 sm:$0xff] (!%p196_p2)  }
   0x9   : > { %435 = vmatprep.subr.bf16.mxu0 (!%p196_p2), %v922_v3  ;;  %897 = vmatprep.subr.bf16.mxu1 (!%p196_p2), %v922_v3  ;;  %v934_v11 = vld [vmem:[%s1205_s1 + $0x54] ss:$8 sps:$4 sm:$0xff] (!%p196_p2)   ;;  %v936_v12 = vld [vmem:[%s1205_s1 + $0x50] ss:$8 sps:$4 sm:$0xff] (!%p196_p2)   ;;  %vm426_vm0 = vcmask (!%p196_p2), 1045504   ;;  %vm401_vm1 = vcmask (!%p196_p2), 883712  }
   0xa   : > { %v937_v13 = vld [vmem:[%s1205_s1 + $0x64] ss:$8 sps:$4 sm:$0x3f] (!%p196_p2)   ;;  %v939_v14 = vld [vmem:[%s1205_s1 + $0x60] ss:$8 sps:$4 sm:$0x3f] (!%p196_p2)  }
   0xb   : > { %v428_v15 = vsel (!%p196_p2), %vm426_vm0, %v939_v14, 0  ;;  %p254_p4 = scmp.lt.s32.totalorder (!%p196_p2), %s993_s19, 3 }
   0xc   : > { %436 = vmatpush1.bf16.msra.mxu0 (!%p196_p2), %v924_v4  ;;  %904 = vmatpush1.bf16.msra.mxu1 (!%p196_p2), %v924_v4 }
   0xd   : > { %s1211_s24 = smov (!%p237_p3, %s855_s24), 63  ;;  %437 = vmatprep.subr.bf16.mxu0 %v925_v5  ;;  %898 = vmatprep.subr.bf16.mxu1 %v925_v5  ;;  %s1213_s19 = smov (!%p254_p4, %s993_s19), 3 }
   0xe   : > { %s856_s6 = sshll.u32 %s1211_s24, 2 }
   0xf   : > { %s1027_s13 = scalar_lea.vmem %s1204_s0, %s856_s6  ;;  %s858_s6 = sshll.u32 %s1211_s24, 3 }
  0x10   : > { %438 = vmatpush1.bf16.msra.mxu0 %v927_v6  ;;  %905 = vmatpush1.bf16.msra.mxu1 %v927_v6  ;;  %v940_v16 = vld [vmem:[%s1027_s13] sm:$0xff]   ;;  %v941_v18 = vld [vmem:[%s1027_s13 + $0x8] sm:$0xff]   ;;  %v943_v20 = vld [vmem:[%s1027_s13 + $0x10] sm:$0xff]   ;;  %s1076_s9 = scalar_lea.vmem %s1206_s2, %s858_s6  ;;  %s1081_s12 = scalar_lea.vmem %s1207_s3, %s858_s6 }
  0x11   : > { %439 = vmatprep.subr.bf16.mxu0 %v928_v7  ;;  %899 = vmatprep.subr.bf16.mxu1 %v928_v7  ;;  %v942_v17 = vld [vmem:[%s1027_s13 + $0x20] sm:$0xff]   ;;  %v944_v19 = vld [vmem:[%s1027_s13 + $0x28] sm:$0xff]   ;;  %v946_v21 = vld [vmem:[%s1027_s13 + $0x30] sm:$0xff]   ;;  %s861_s24 = sshll.u32 %s1213_s19, 1 }
  0x12   : > { %v945_v22 = vld [vmem:[%s1027_s13 + $0x18] sm:$0xff]   ;;  %s257_s15 = scalar_lea.vmem %s1208_s4, %s861_s24  ;;  %s261_s20 = scalar_lea.vmem %s1209_s5, %s861_s24 }
  0x13   : > { %v947_v23 = vld [vmem:[%s1027_s13 + $0x38] sm:$0xff]  }
  0x14   : > { %440 = vmatpush1.bf16.msra.mxu0 %v930_v8  ;;  %906 = vmatpush1.bf16.msra.mxu1 %v930_v8 }
  0x15   : > { %441 = vmatprep.subr.bf16.mxu0 %v931_v9  ;;  %900 = vmatprep.subr.bf16.mxu1 %v931_v9 }
  0x18   : > { %442 = vmatpush1.bf16.msra.mxu0 %v933_v10  ;;  %907 = vmatpush1.bf16.msra.mxu1 %v933_v10 }
  0x19   : > { %443 = vmatprep.subr.bf16.mxu0 %v934_v11  ;;  %901 = vmatprep.subr.bf16.mxu1 %v934_v11 }
  0x1c   : > { %444 = vmatpush1.bf16.msra.mxu0 %v936_v12  ;;  %908 = vmatpush1.bf16.msra.mxu1 %v936_v12 }
  0x1d   : > { %885 = vmatprep.subr.msk.bf16.mxu0 %vm426_vm0, %v937_v13  ;;  %902 = vmatprep.subr.msk.bf16.mxu1 %vm426_vm0, %v937_v13 }
  0x20   : > { %446 = vmatpush1.bf16.msra.mxu0 %v428_v15  ;;  %909 = vmatpush1.bf16.msra.mxu1 %v428_v15 }
  0x23   : > { %886 = vmatmul.mubr.msk.bf16.vlgmr.msra.gmra.mrb[0].mxu0 %vm401_vm1, %v940_v16  ;;  %890 = vmatmul.mubr.msk.bf16.vlgmr.msra.gmra.mrb[0].mxu1 %vm401_vm1, %v942_v17 }
  0x24   : > { %475 = vmatprep.mubr.bf16.mxu0 %v956_v2  ;;  %515 = vmatprep.mubr.bf16.mxu1 %v956_v2 }
  0x2b   : > { %887 = vmatmul.mubr.msk.bf16.gmra.mrb[4].mxu0 %vm401_vm1, %v941_v18  ;;  %891 = vmatmul.mubr.msk.bf16.gmra.mrb[4].mxu1 %vm401_vm1, %v944_v19 }
  0x2c   : > { %485 = vmatprep.mubr.bf16.mxu0 %v956_v2  ;;  %525 = vmatprep.mubr.bf16.mxu1 %v956_v2 }
  0x33   : > { %888 = vmatmul.mubr.msk.bf16.gmra.mrb[8].mxu0 %vm401_vm1, %v943_v20  ;;  %892 = vmatmul.mubr.msk.bf16.gmra.mrb[8].mxu1 %vm401_vm1, %v946_v21 }
  0x34   : > { %495 = vmatprep.mubr.bf16.mxu0 %v956_v2  ;;  %535 = vmatprep.mubr.bf16.mxu1 %v956_v2 }
  0x3b   : > { %889 = vmatmul.mubr.msk.bf16.gmra.mrb[12].mxu0 %vm401_vm1, %v945_v22  ;;  %893 = vmatmul.mubr.msk.bf16.gmra.mrb[12].mxu1 %vm401_vm1, %v947_v23 }
  0xf6   : > { %v467_v24 = vpop.f32.mrb[0].mxu0  ;;  %v1083_v25 = vpop.f32.mrb[0].mxu1 }
  0xf7   : > { %546 = vst [vmem:[%s1076_s9] sm:$0xff] %v467_v24  ;;  %v469_v26 = vpop.f32.mrb[1].mxu0  ;;  %554 = vst [vmem:[%s1076_s9 + $0x40] sm:$0xff] %v1083_v25  ;;  %v1088_v27 = vpop.f32.mrb[1].mxu1  ;;  %v600_v30 = vmul.f32 %v467_v24, %v467_v24 }
  0xf8   : > { %562 = vst [vmem:[%s1081_s12] sm:$0xff] %v469_v26  ;;  %v471_v28 = vpop.f32.mrb[2].mxu0  ;;  %570 = vst [vmem:[%s1081_s12 + $0x40] sm:$0xff] %v1088_v27  ;;  %v1093_v29 = vpop.f32.mrb[2].mxu1  ;;  %v660_v35 = vmul.f32 %v469_v26, %v469_v26 }
  0xf9   : > { %547 = vst [vmem:[%s1076_s9 + $0x8] sm:$0xff] %v471_v28  ;;  %v578_v31 = vadd.f32 %v471_v28, %v467_v24  ;;  %v601_v32 = vmul.f32 %v471_v28, %v471_v28  ;;  %v473_v33 = vpop.f32.mrb[3].mxu0  ;;  %555 = vst [vmem:[%s1076_s9 + $0x48] sm:$0xff] %v1093_v29  ;;  %v1098_v34 = vpop.f32.mrb[3].mxu1 }
  0xfa   : > { %563 = vst [vmem:[%s1081_s12 + $0x8] sm:$0xff] %v473_v33  ;;  %v638_v36 = vadd.f32 %v473_v33, %v469_v26  ;;  %v661_v37 = vmul.f32 %v473_v33, %v473_v33  ;;  %571 = vst [vmem:[%s1081_s12 + $0x48] sm:$0xff] %v1098_v34 }
  0xfb   : > { %v616_v38 = vadd.f32 %v601_v32, %v600_v30 }
  0xfc   : > { %v676_v39 = vadd.f32 %v661_v37, %v660_v35 }
  0xfe   : > { %v477_v40 = vpop.f32.mrb[4].mxu0  ;;  %v1103_v41 = vpop.f32.mrb[4].mxu1 }
  0xff   : > { %548 = vst [vmem:[%s1076_s9 + $0x10] sm:$0xff] %v477_v40  ;;  %v579_v42 = vadd.f32 %v578_v31, %v477_v40  ;;  %v602_v43 = vmul.f32 %v477_v40, %v477_v40  ;;  %v479_v44 = vpop.f32.mrb[5].mxu0  ;;  %556 = vst [vmem:[%s1076_s9 + $0x50] sm:$0xff] %v1103_v41  ;;  %v1108_v45 = vpop.f32.mrb[5].mxu1 }
 0x100   : > { %564 = vst [vmem:[%s1081_s12 + $0x10] sm:$0xff] %v479_v44  ;;  %v639_v46 = vadd.f32 %v638_v36, %v479_v44  ;;  %v662_v47 = vmul.f32 %v479_v44, %v479_v44  ;;  %v481_v48 = vpop.f32.mrb[6].mxu0  ;;  %572 = vst [vmem:[%s1081_s12 + $0x50] sm:$0xff] %v1108_v45  ;;  %v1113_v49 = vpop.f32.mrb[6].mxu1 }
 0x101   : > { %v617_v50 = vadd.f32 %v616_v38, %v602_v43  ;;  %549 = vst [vmem:[%s1076_s9 + $0x18] sm:$0xff] %v481_v48  ;;  %v580_v51 = vadd.f32 %v579_v42, %v481_v48  ;;  %v603_v52 = vmul.f32 %v481_v48, %v481_v48  ;;  %v483_v53 = vpop.f32.mrb[7].mxu0  ;;  %557 = vst [vmem:[%s1076_s9 + $0x58] sm:$0xff] %v1113_v49  ;;  %v1118_v54 = vpop.f32.mrb[7].mxu1 }
 0x102   : > { %v677_v55 = vadd.f32 %v676_v39, %v662_v47  ;;  %565 = vst [vmem:[%s1081_s12 + $0x18] sm:$0xff] %v483_v53  ;;  %v640_v56 = vadd.f32 %v639_v46, %v483_v53  ;;  %v663_v57 = vmul.f32 %v483_v53, %v483_v53  ;;  %573 = vst [vmem:[%s1081_s12 + $0x58] sm:$0xff] %v1118_v54 }
 0x103   : > { %v618_v58 = vadd.f32 %v617_v50, %v603_v52  ;;  %v608_v38 = vmul.f32 %v1083_v25, %v1083_v25  ;;  %v668_v42 = vmul.f32 %v1088_v27, %v1088_v27  ;;  %v609_v46 = vmul.f32 %v1093_v29, %v1093_v29 }
 0x104   : > { %v678_v59 = vadd.f32 %v677_v55, %v663_v57  ;;  %v669_v50 = vmul.f32 %v1098_v34, %v1098_v34 }
 0x106   : > { %v487_v60 = vpop.f32.mrb[8].mxu0  ;;  %v1123_v61 = vpop.f32.mrb[8].mxu1 }
 0x107   : > { %550 = vst [vmem:[%s1076_s9 + $0x20] sm:$0xff] %v487_v60  ;;  %v581_v62 = vadd.f32 %v580_v51, %v487_v60  ;;  %v604_v63 = vmul.f32 %v487_v60, %v487_v60  ;;  %v489_v0 = vpop.f32.mrb[9].mxu0  ;;  %558 = vst [vmem:[%s1076_s9 + $0x60] sm:$0xff] %v1123_v61  ;;  %v1128_v1 = vpop.f32.mrb[9].mxu1 }
 0x108   : > { %566 = vst [vmem:[%s1081_s12 + $0x20] sm:$0xff] %v489_v0  ;;  %v641_v2 = vadd.f32 %v640_v56, %v489_v0  ;;  %v664_v3 = vmul.f32 %v489_v0, %v489_v0  ;;  %v491_v4 = vpop.f32.mrb[10].mxu0  ;;  %574 = vst [vmem:[%s1081_s12 + $0x60] sm:$0xff] %v1128_v1  ;;  %v1133_v5 = vpop.f32.mrb[10].mxu1 }
 0x109   : > { %v619_v6 = vadd.f32 %v618_v58, %v604_v63  ;;  %551 = vst [vmem:[%s1076_s9 + $0x28] sm:$0xff] %v491_v4  ;;  %v582_v7 = vadd.f32 %v581_v62, %v491_v4  ;;  %v605_v8 = vmul.f32 %v491_v4, %v491_v4  ;;  %v493_v9 = vpop.f32.mrb[11].mxu0  ;;  %559 = vst [vmem:[%s1076_s9 + $0x68] sm:$0xff] %v1133_v5  ;;  %v1138_v10 = vpop.f32.mrb[11].mxu1 }
 0x10a   : > { %v679_v11 = vadd.f32 %v678_v59, %v664_v3  ;;  %567 = vst [vmem:[%s1081_s12 + $0x28] sm:$0xff] %v493_v9  ;;  %v642_v12 = vadd.f32 %v641_v2, %v493_v9  ;;  %v665_v13 = vmul.f32 %v493_v9, %v493_v9  ;;  %575 = vst [vmem:[%s1081_s12 + $0x68] sm:$0xff] %v1138_v10 }
 0x10b   : > { %v620_v14 = vadd.f32 %v619_v6, %v605_v8  ;;  %v612_v63 = vmul.f32 %v1123_v61, %v1123_v61  ;;  %v672_v2 = vmul.f32 %v1128_v1, %v1128_v1  ;;  %v673_v8 = vmul.f32 %v1138_v10, %v1138_v10 }
 0x10c   : > { %v680_v15 = vadd.f32 %v679_v11, %v665_v13 }
 0x10e   : > { %v497_v16 = vpop.f32.mrb[12].mxu0  ;;  %v1143_v17 = vpop.f32.mrb[12].mxu1 }
 0x10f   : > { %552 = vst [vmem:[%s1076_s9 + $0x30] sm:$0xff] %v497_v16  ;;  %v583_v18 = vadd.f32 %v582_v7, %v497_v16  ;;  %v606_v19 = vmul.f32 %v497_v16, %v497_v16  ;;  %v499_v20 = vpop.f32.mrb[13].mxu0  ;;  %560 = vst [vmem:[%s1076_s9 + $0x70] sm:$0xff] %v1143_v17  ;;  %v539_v21 = vpop.f32.mrb[13].mxu1  ;;  %v614_v6 = vmul.f32 %v1143_v17, %v1143_v17 }
 0x110   : > { %568 = vst [vmem:[%s1081_s12 + $0x30] sm:$0xff] %v499_v20  ;;  %v643_v22 = vadd.f32 %v642_v12, %v499_v20  ;;  %v666_v23 = vmul.f32 %v499_v20, %v499_v20  ;;  %v501_v24 = vpop.f32.mrb[14].mxu0  ;;  %576 = vst [vmem:[%s1081_s12 + $0x70] sm:$0xff] %v539_v21  ;;  %v541_v26 = vpop.f32.mrb[14].mxu1  ;;  %v674_v9 = vmul.f32 %v539_v21, %v539_v21 }
 0x111   : > { %v621_v28 = vadd.f32 %v620_v14, %v606_v19  ;;  %553 = vst [vmem:[%s1076_s9 + $0x38] sm:$0xff] %v501_v24  ;;  %v584_v30 = vadd.f32 %v583_v18, %v501_v24  ;;  %v607_v31 = vmul.f32 %v501_v24, %v501_v24  ;;  %v503_v32 = vpop.f32.mrb[15].mxu0  ;;  %561 = vst [vmem:[%s1076_s9 + $0x78] sm:$0xff] %v541_v26  ;;  %v543_v33 = vpop.f32.mrb[15].mxu1 }
 0x112   : > { %v681_v35 = vadd.f32 %v680_v15, %v666_v23  ;;  %569 = vst [vmem:[%s1081_s12 + $0x38] sm:$0xff] %v503_v32  ;;  %v644_v36 = vadd.f32 %v643_v22, %v503_v32  ;;  %v667_v37 = vmul.f32 %v503_v32, %v503_v32  ;;  %577 = vst [vmem:[%s1081_s12 + $0x78] sm:$0xff] %v543_v33 }
 0x113   : > { %v585_v39 = vadd.f32 %v584_v30, %v1083_v25  ;;  %v622_v40 = vadd.f32 %v621_v28, %v607_v31  ;;  %v610_v25 = vmul.f32 %v1103_v41, %v1103_v41  ;;  %v675_v19 = vmul.f32 %v543_v33, %v543_v33 }
 0x114   : > { %v645_v43 = vadd.f32 %v644_v36, %v1088_v27  ;;  %v682_v44 = vadd.f32 %v681_v35, %v667_v37  ;;  %v670_v27 = vmul.f32 %v1108_v45, %v1108_v45 }
 0x115   : > { %v586_v47 = vadd.f32 %v585_v39, %v1093_v29  ;;  %v623_v48 = vadd.f32 %v622_v40, %v608_v38  ;;  %v611_v29 = vmul.f32 %v1113_v49, %v1113_v49 }
 0x116   : > { %v646_v51 = vadd.f32 %v645_v43, %v1098_v34  ;;  %v683_v52 = vadd.f32 %v682_v44, %v668_v42  ;;  %v671_v34 = vmul.f32 %v1118_v54, %v1118_v54 }
 0x117   : > { %v624_v53 = vadd.f32 %v623_v48, %v609_v46  ;;  %v587_v55 = vadd.f32 %v586_v47, %v1103_v41 }
 0x118   : > { %v684_v56 = vadd.f32 %v683_v52, %v669_v50  ;;  %v647_v57 = vadd.f32 %v646_v51, %v1108_v45 }
 0x119   : > { %v588_v58 = vadd.f32 %v587_v55, %v1113_v49  ;;  %v625_v59 = vadd.f32 %v624_v53, %v610_v25 }
 0x11a   : > { %v648_v60 = vadd.f32 %v647_v57, %v1118_v54  ;;  %v685_v62 = vadd.f32 %v684_v56, %v670_v27  ;;  %v613_v54 = vmul.f32 %v1133_v5, %v1133_v5 }
 0x11b   : > { %v589_v41 = vadd.f32 %v588_v58, %v1123_v61  ;;  %v626_v0 = vadd.f32 %v625_v59, %v611_v29 }
 0x11c   : > { %v649_v45 = vadd.f32 %v648_v60, %v1128_v1  ;;  %v686_v49 = vadd.f32 %v685_v62, %v671_v34 }
 0x11d   : > { %v627_v3 = vadd.f32 %v626_v0, %v612_v63  ;;  %v590_v4 = vadd.f32 %v589_v41, %v1133_v5  ;;  %v615_v5 = vmul.f32 %v541_v26, %v541_v26 }
 0x11e   : > { %v687_v7 = vadd.f32 %v686_v49, %v672_v2  ;;  %v650_v61 = vadd.f32 %v649_v45, %v1138_v10 }
 0x11f   : > { %v628_v11 = vadd.f32 %v627_v3, %v613_v54  ;;  %v591_v1 = vadd.f32 %v590_v4, %v1143_v17 }
 0x120   : > { %v688_v12 = vadd.f32 %v687_v7, %v673_v8  ;;  %v651_v13 = vadd.f32 %v650_v61, %v539_v21 }
 0x121   : > { %v629_v14 = vadd.f32 %v628_v11, %v614_v6  ;;  %v592_v15 = vadd.f32 %v591_v1, %v541_v26 }
 0x122   : > { %v689_v16 = vadd.f32 %v688_v12, %v674_v9  ;;  %v652_v18 = vadd.f32 %v651_v13, %v543_v33 }
 0x123   : > { %v593_v20 = vrot.slane %v592_v15, 4  ;;  %v630_v22 = vadd.f32 %v629_v14, %v615_v5 }
 0x124   : > { %v653_v23 = vrot.slane %v652_v18, 4  ;;  %v690_v24 = vadd.f32 %v689_v16, %v675_v19 }
 0x125   : > { %v594_v10 = vadd.f32 %v593_v20, %v592_v15  ;;  %v631_v28 = vrot.slane %v630_v22, 4 }
 0x126   : > { %v654_v30 = vadd.f32 %v653_v23, %v652_v18  ;;  %v691_v31 = vrot.slane %v690_v24, 4 }
 0x127   : > { %v595_v32 = vrot.slane %v594_v10, 2  ;;  %v632_v17 = vadd.f32 %v631_v28, %v630_v22 }
 0x128   : > { %v655_v35 = vrot.slane %v654_v30, 2  ;;  %v692_v21 = vadd.f32 %v691_v31, %v690_v24 }
 0x129   : > { %v596_v36 = vadd.f32 %v595_v32, %v594_v10  ;;  %v633_v37 = vrot.slane %v632_v17, 2 }
 0x12a   : > { %v656_v26 = vadd.f32 %v655_v35, %v654_v30  ;;  %v693_v38 = vrot.slane %v692_v21, 2 }
 0x12b   : > { %v597_v39 = vrot.slane %v596_v36, 1  ;;  %v634_v33 = vadd.f32 %v633_v37, %v632_v17 }
 0x12c   : > { %v657_v40 = vrot.slane %v656_v26, 1  ;;  %v694_v42 = vadd.f32 %v693_v38, %v692_v21 }
 0x12d   : > { %v598_v43 = vadd.f32 %v597_v39, %v596_v36  ;;  %v635_v44 = vrot.slane %v634_v33, 1 }
 0x12e   : > { %v658_v46 = vadd.f32 %v657_v40, %v656_v26  ;;  %v695_v47 = vrot.slane %v694_v42, 1 }
 0x12f   : > { %599 = vst [vmem:[%s257_s15] sm:$0x1] %v598_v43  ;;  %v636_v48 = vadd.f32 %v635_v44, %v634_v33 }
 0x130   : > { %659 = vst [vmem:[%s261_s20] sm:$0x1] %v658_v46  ;;  %v696_v50 = vadd.f32 %v695_v47, %v694_v42 }
 0x131   : > { %637 = vst [vmem:[%s257_s15 + $0x1] sm:$0x1] %v636_v48 }
 0x132   : > { %697 = vst [vmem:[%s261_s20 + $0x1] sm:$0x1] %v696_v50 }
 0x133 PF: > { %s16_s18 = sadd.s32 1, %s954_s18  }
 0x134   : > { %p13_p5 = scmp.ge.s32.totalorder %s16_s18, 6  }
 0x136   :  { %15 = sbr.rel (!%p13_p5) target bundleno = 1 (0x1), region = 94 }

// kernel: conv_block_forward.6
= control target key start
LH: loop header
LB: loop body
LE: loop exit
PB: predicated region body
PF: predicated region fallthrough
CT: control target
= control target key end

     0   :  { %s516_s12 = smov 0   ;;  %s607_s0 = inlined_call_operand.vmem [shape: f32[512,128], index: 0, kind: input, shape index: {}]   ;;  %s608_s1 = inlined_call_operand.vmem [shape: f32[1,128], index: 1, kind: input, shape index: {}]   ;;  %s609_s2 = inlined_call_operand.vmem [shape: f32[1,128], index: 2, kind: input, shape index: {}]   ;;  %s610_s3 = inlined_call_operand.vmem [shape: bf16[512,128], index: 3, kind: output, shape index: {}]  }
   0x1 LB: > { %s388_s13 = sadd.s32 4294967295, %s494_s12   ;;  %p392_p0 = scmp.ge.s32.totalorder %s494_s12, 1  ;;  %s494_s12 = sphi %s516_s12, %s13_s12  }
   0x2   : > { %p138_p1 = scmp.lt.s32.totalorder %s494_s12, 5 }
   0x4   : > { %p139_p2 = pnand %p392_p0, %p138_p1 }
   0x5   : > { %s393_s14 = sshll.u32 (!%p139_p2), %s388_s13, 4  ;;  %v530_v0 = vld [vmem:[%s608_s1] ss:$0 sm:$0xff] (!%p139_p2) }
   0x6   : > { %142 = sbr.rel (%p139_p2) target bundleno = 37 (0x25), region = 32  ;;  %p163_p3 = scmp.lt.s32.totalorder (!%p139_p2), %s393_s14, 63  ;;  %v540_v1 = vld [vmem:[%s609_s2] ss:$0 sm:$0xff] (!%p139_p2) }
   0xd   : > { %s612_s14 = smov (!%p163_p3, %s393_s14), 63 }
   0xe   : > { %s394_s15 = sshll.u32 %s612_s14, 3  ;;  %s396_s23 = sshll.u32 %s612_s14, 2 }
   0xf   : > { %s535_s20 = scalar_lea.vmem %s607_s0, %s394_s15  ;;  %s572_s26 = scalar_lea.vmem %s610_s3, %s396_s23 }
  0x10   : > { %v174_v2 = vld [vmem:[%s535_s20] sm:$0xff]  ;;  %v175_v3 = vld [vmem:[%s535_s20 + $0x8] sm:$0xff]  ;;  %v176_v4 = vld [vmem:[%s535_s20 + $0x10] sm:$0xff] }
  0x11   : > { %v197_v5 = vmul.f32 %v530_v0, %v174_v2  ;;  %v198_v6 = vmul.f32 %v530_v0, %v175_v3  ;;  %v177_v7 = vld [vmem:[%s535_s20 + $0x18] sm:$0xff]  ;;  %v199_v8 = vmul.f32 %v530_v0, %v176_v4  ;;  %v178_v9 = vld [vmem:[%s535_s20 + $0x20] sm:$0xff]  ;;  %v179_v10 = vld [vmem:[%s535_s20 + $0x28] sm:$0xff] }
  0x12   : > { %v200_v11 = vmul.f32 %v530_v0, %v177_v7  ;;  %v201_v12 = vmul.f32 %v530_v0, %v178_v9  ;;  %v202_v13 = vmul.f32 %v530_v0, %v179_v10  ;;  %v180_v14 = vld [vmem:[%s535_s20 + $0x30] sm:$0xff]  ;;  %v181_v15 = vld [vmem:[%s535_s20 + $0x38] sm:$0xff]  ;;  %v182_v24 = vld [vmem:[%s535_s20 + $0x40] sm:$0xff] }
  0x13   : > { %v220_v16 = vadd.f32 %v540_v1, %v197_v5  ;;  %v221_v17 = vadd.f32 %v540_v1, %v198_v6  ;;  %v222_v18 = vadd.f32 %v540_v1, %v199_v8  ;;  %v203_v19 = vmul.f32 %v530_v0, %v180_v14  ;;  %v183_v25 = vld [vmem:[%s535_s20 + $0x48] sm:$0xff]  ;;  %v184_v30 = vld [vmem:[%s535_s20 + $0x50] sm:$0xff]  ;;  %v185_v35 = vld [vmem:[%s535_s20 + $0x58] sm:$0xff] }
  0x14   : > { %v223_v20 = vadd.f32 %v540_v1, %v200_v11  ;;  %v224_v21 = vadd.f32 %v540_v1, %v201_v12  ;;  %v225_v22 = vadd.f32 %v540_v1, %v202_v13  ;;  %v204_v23 = vmul.f32 %v530_v0, %v181_v15  ;;  %v186_v36 = vld [vmem:[%s535_s20 + $0x60] sm:$0xff]  ;;  %v187_v41 = vld [vmem:[%s535_s20 + $0x68] sm:$0xff]  ;;  %v188_v42 = vld [vmem:[%s535_s20 + $0x70] sm:$0xff] }
  0x15   : > { %v236_v26 = vmax.f32 %v220_v16, 0.0  ;;  %v237_v27 = vmax.f32 %v221_v17, 0.0  ;;  %v238_v28 = vmax.f32 %v222_v18, 0.0  ;;  %v226_v29 = vadd.f32 %v540_v1, %v203_v19  ;;  %v189_v51 = vld [vmem:[%s535_s20 + $0x78] sm:$0xff] }
  0x16   : > { %v239_v31 = vmax.f32 %v223_v20, 0.0  ;;  %v240_v32 = vmax.f32 %v224_v21, 0.0  ;;  %v241_v33 = vmax.f32 %v225_v22, 0.0  ;;  %v227_v34 = vadd.f32 %v540_v1, %v204_v23 }
  0x17   : > { %v436_v37 = vpack.c.bf16 %v237_v27, %v236_v26  ;;  %v242_v38 = vmax.f32 %v226_v29, 0.0  ;;  %v205_v39 = vmul.f32 %v530_v0, %v182_v24  ;;  %v206_v40 = vmul.f32 %v530_v0, %v183_v25 }
  0x18   : > { %v441_v43 = vpack.c.bf16 %v239_v31, %v238_v28  ;;  %v446_v44 = vpack.c.bf16 %v241_v33, %v240_v32  ;;  %v243_v45 = vmax.f32 %v227_v34, 0.0  ;;  %v207_v46 = vmul.f32 %v530_v0, %v184_v30 }
  0x19   : > { %437 = vst [vmem:[%s572_s26] sm:$0xff] %v436_v37   ;;  %v228_v47 = vadd.f32 %v540_v1, %v205_v39  ;;  %v229_v48 = vadd.f32 %v540_v1, %v206_v40  ;;  %v208_v49 = vmul.f32 %v530_v0, %v185_v35  ;;  %v209_v50 = vmul.f32 %v530_v0, %v186_v36 }
  0x1a   : > { %473 = vst [vmem:[%s572_s26 + $0x8] sm:$0xff] %v441_v43   ;;  %474 = vst [vmem:[%s572_s26 + $0x10] sm:$0xff] %v446_v44   ;;  %v451_v52 = vpack.c.bf16 %v243_v45, %v242_v38  ;;  %v230_v53 = vadd.f32 %v540_v1, %v207_v46  ;;  %v210_v54 = vmul.f32 %v530_v0, %v187_v41 }
  0x1b   : > { %v211_v55 = vmul.f32 %v530_v0, %v188_v42  ;;  %v244_v56 = vmax.f32 %v228_v47, 0.0  ;;  %v245_v57 = vmax.f32 %v229_v48, 0.0  ;;  %v231_v58 = vadd.f32 %v540_v1, %v208_v49 }
  0x1c   : > { %v232_v59 = vadd.f32 %v540_v1, %v209_v50  ;;  %475 = vst [vmem:[%s572_s26 + $0x18] sm:$0xff] %v451_v52   ;;  %v246_v60 = vmax.f32 %v230_v53, 0.0  ;;  %v233_v61 = vadd.f32 %v540_v1, %v210_v54  ;;  %v212_v62 = vmul.f32 %v530_v0, %v189_v51 }
  0x1d   : > { %v234_v63 = vadd.f32 %v540_v1, %v211_v55  ;;  %v456_v2 = vpack.c.bf16 %v245_v57, %v244_v56  ;;  %v247_v3 = vmax.f32 %v231_v58, 0.0 }
  0x1e   : > { %v248_v4 = vmax.f32 %v232_v59, 0.0  ;;  %v249_v5 = vmax.f32 %v233_v61, 0.0  ;;  %v235_v6 = vadd.f32 %v540_v1, %v212_v62 }
  0x1f   : > { %v250_v7 = vmax.f32 %v234_v63, 0.0  ;;  %476 = vst [vmem:[%s572_s26 + $0x20] sm:$0xff] %v456_v2   ;;  %v461_v8 = vpack.c.bf16 %v247_v3, %v246_v60 }
  0x20   : > { %v466_v9 = vpack.c.bf16 %v249_v5, %v248_v4  ;;  %v251_v10 = vmax.f32 %v235_v6, 0.0 }
  0x21   : > { %477 = vst [vmem:[%s572_s26 + $0x28] sm:$0xff] %v461_v8  }
  0x22   : > { %478 = vst [vmem:[%s572_s26 + $0x30] sm:$0xff] %v466_v9   ;;  %v471_v11 = vpack.c.bf16 %v251_v10, %v250_v7 }
  0x24   : > { %479 = vst [vmem:[%s572_s26 + $0x38] sm:$0xff] %v471_v11  }
  0x25 PF: > { %s13_s12 = sadd.s32 1, %s494_s12  }
  0x26   : > { %p10_p4 = scmp.ge.s32.totalorder %s13_s12, 6  }
  0x28   :  { %12 = sbr.rel (!%p10_p4) target bundleno = 1 (0x1), region = 62 }

// kernel: conv_block_forward.8
= control target key start
LH: loop header
LB: loop body
LE: loop exit
PB: predicated region body
PF: predicated region fallthrough
CT: control target
= control target key end

     0   :  { %s882_s18 = smov 0   ;;  %s1125_s0 = inlined_call_operand.vmem [shape: f32[512,128], index: 0, kind: input, shape index: {}]   ;;  %s1126_s1 = inlined_call_operand.vmem [shape: f32[1,128], index: 1, kind: input, shape index: {}]   ;;  %s1127_s2 = inlined_call_operand.vmem [shape: f32[1,128], index: 2, kind: input, shape index: {}]   ;;  %s1128_s3 = inlined_call_operand.vmem [shape: bf16[128,128], index: 3, kind: input, shape index: {}]   ;;  %s1129_s4 = inlined_call_operand.vmem [shape: f32[512,128], index: 4, kind: output, shape index: {0}]   ;;  %s1130_s5 = inlined_call_operand.vmem [shape: f32[4,2,128], index: 5, kind: output, shape index: {1}]  }
   0x1 LB: > { %s888_s19 = sadd.s32 4294967295, %s850_s18   ;;  %p721_p0 = scmp.ge.s32.totalorder %s850_s18, 1  ;;  %s850_s18 = sphi %s882_s18, %s16_s18  }
   0x2   : > { %p191_p1 = scmp.lt.s32.totalorder %s850_s18, 5 }
   0x4   : > { %p192_p2 = pnand %p721_p0, %p191_p1 }
   0x5   : > { %v836_v0 = vld [vmem:[%s1128_s3] sm:$0xff] (!%p192_p2)   ;;  %s722_s22 = sshll.u32 (!%p192_p2), %s888_s19, 4  ;;  %v318_v1 = vlaneseq (!%p192_p2)  ;;  %v837_v2 = vld [vmem:[%s1128_s3 + $0x8] sm:$0xff] (!%p192_p2)   ;;  %v838_v4 = vld [vmem:[%s1128_s3 + $0x10] sm:$0xff] (!%p192_p2)   ;;  %s729_s6 = sshll.u32 (!%p192_p2), %s888_s19, 7 }
   0x6   : > { %195 = sbr.rel (%p192_p2) target bundleno = 298 (0x12a), region = 36  ;;  %p224_p3 = scmp.lt.s32.totalorder (!%p192_p2), %s722_s22, 63  ;;  %780 = vmatprep.subr.bf16.mxu0 (!%p192_p2), %v836_v0  ;;  %812 = vmatprep.subr.bf16.mxu1 (!%p192_p2), %v836_v0  ;;  %v839_v6 = vld [vmem:[%s1128_s3 + $0x18] sm:$0xff] (!%p192_p2)   ;;  %v919_v7 = vstv (!%p192_p2), %s729_s6  ;;  %v926_v10 = vld [vmem:[%s1126_s1] ss:$0 sm:$0xff] (!%p192_p2)  ;;  %v841_v47 = vld [vmem:[%s1128_s3 + $0x28] sm:$0xff] (!%p192_p2)  }
   0x7   : > { %v899_v3 = vshrl.u32 (!%p192_p2), %v318_v1, 7  ;;  %781 = vmatpush3.bf16.msra.mxu0 (!%p192_p2), %v836_v0  ;;  %820 = vmatpush3.bf16.msra.mxu1 (!%p192_p2), %v836_v0  ;;  %v936_v15 = vld [vmem:[%s1127_s2] ss:$0 sm:$0xff] (!%p192_p2)  ;;  %v842_v62 = vld [vmem:[%s1128_s3 + $0x30] sm:$0xff] (!%p192_p2)   ;;  %p235_p4 = scmp.lt.s32.totalorder (!%p192_p2), %s888_s19, 3 }
   0x8   : > { %782 = vmatprep.subr.bf16.mxu0 (!%p192_p2), %v837_v2  ;;  %813 = vmatprep.subr.bf16.mxu1 (!%p192_p2), %v837_v2  ;;  %v840_v27 = vld [vmem:[%s1128_s3 + $0x20] sm:$0xff] (!%p192_p2)  }
   0x9   : > { %v320_v5 = vadd.s32 (!%p192_p2), 8, %v899_v3  ;;  %v337_v11 = vadd.s32 (!%p192_p2), %v919_v7, %v899_v3  ;;  %v321_v18 = vadd.s32 (!%p192_p2), 16, %v899_v3  ;;  %v322_v21 = vadd.s32 (!%p192_p2), 24, %v899_v3 }
   0xa   : > { %v323_v24 = vadd.s32 (!%p192_p2), 32, %v899_v3  ;;  %v324_v31 = vadd.s32 (!%p192_p2), 40, %v899_v3  ;;  %v325_v50 = vadd.s32 (!%p192_p2), 48, %v899_v3  ;;  %v991_v52 = vadd.s32 (!%p192_p2), 56, %v899_v3 }
   0xb   : > { %783 = vmatpush3.bf16.msra.mxu0 (!%p192_p2), %v837_v2  ;;  %821 = vmatpush3.bf16.msra.mxu1 (!%p192_p2), %v837_v2  ;;  %v338_v12 = vadd.s32 (!%p192_p2), %v919_v7, %v320_v5  ;;  %vm353_vm0 = vcmp.lt.s32.totalorder (!%p192_p2), %v337_v11, 432  ;;  %v957_v34 = vadd.s32 (!%p192_p2), %v919_v7, %v321_v18  ;;  %v965_v39 = vadd.s32 (!%p192_p2), %v919_v7, %v322_v21 }
   0xc   : > { %784 = vmatprep.subr.bf16.mxu0 (!%p192_p2), %v838_v4  ;;  %814 = vmatprep.subr.bf16.mxu1 (!%p192_p2), %v838_v4  ;;  %v975_v44 = vadd.s32 (!%p192_p2), %v919_v7, %v323_v24  ;;  %v983_v48 = vadd.s32 (!%p192_p2), %v919_v7, %v324_v31  ;;  %v327_v60 = vadd.s32 (!%p192_p2), 64, %v899_v3  ;;  %v1011_v63 = vadd.s32 (!%p192_p2), %v919_v7, %v325_v50 }
   0xd   : > { %s1140_s22 = smov (!%p224_p3, %s722_s22), 63  ;;  %vm354_vm1 = vcmp.lt.s32.totalorder %v338_v12, 432  ;;  %vm355_vm3 = vcmp.lt.s32.totalorder %v957_v34, 432  ;;  %vm356_vm4 = vcmp.lt.s32.totalorder %v965_v39, 432  ;;  %v329_v12 = vadd.s32 80, %v899_v3  ;;  %s1142_s19 = smov (!%p235_p4, %s888_s19), 3 }
   0xe   : > { %s723_s27 = sshll.u32 %s1140_s22, 3  ;;  %vm960_vm2 = vmpackc.low %vm354_vm1, %vm353_vm0  ;;  %vm357_vm5 = vcmp.lt.s32.totalorder %v975_v44, 432  ;;  %vm358_vm6 = vcmp.lt.s32.totalorder %v983_v48, 432  ;;  %v345_v5 = vadd.s32 %v919_v7, %v327_v60  ;;  %v332_v36 = vadd.s32 104, %v899_v3  ;;  %s726_s22 = sshll.u32 %s1142_s19, 1 }
   0xf   : > { %s913_s30 = scalar_lea.vmem %s1125_s0, %s723_s27  ;;  %785 = vmatpush3.bf16.msra.mxu0 %v838_v4  ;;  %822 = vmatpush3.bf16.msra.mxu1 %v838_v4  ;;  %v328_v4 = vadd.s32 72, %v899_v3  ;;  %vm1057_vm12 = vmpackc.low %vm356_vm4, %vm355_vm3  ;;  %v333_v39 = vadd.s32 112, %v899_v3  ;;  %v344_v44 = vadd.s32 %v919_v7, %v991_v52  ;;  %s1099_s26 = scalar_lea.vmem %s1129_s4, %s723_s27 }
  0x10   : > { %v240_v8 = vld [vmem:[%s913_s30] sm:$0xff]  ;;  %v241_v9 = vld [vmem:[%s913_s30 + $0x8] sm:$0xff]  ;;  %v242_v16 = vld [vmem:[%s913_s30 + $0x10] sm:$0xff]  ;;  %786 = vmatprep.subr.bf16.mxu0 %v839_v6  ;;  %815 = vmatprep.subr.bf16.mxu1 %v839_v6  ;;  %vm361_vm7 = vcmp.lt.s32.totalorder %v345_v5, 432  ;;  %s238_s29 = scalar_lea.vmem %s1130_s5, %s726_s22 }
  0x11   : > { %v263_v13 = vmul.f32 %v926_v10, %v240_v8  ;;  %v264_v14 = vmul.f32 %v926_v10, %v241_v9  ;;  %v243_v17 = vld [vmem:[%s913_s30 + $0x18] sm:$0xff]  ;;  %v265_v19 = vmul.f32 %v926_v10, %v242_v16  ;;  %v244_v22 = vld [vmem:[%s913_s30 + $0x20] sm:$0xff]  ;;  %v245_v23 = vld [vmem:[%s913_s30 + $0x28] sm:$0xff]  ;;  %vm360_vm3 = vcmp.lt.s32.totalorder %v344_v44, 432 }
  0x12   : > { %v266_v20 = vmul.f32 %v926_v10, %v243_v17  ;;  %v267_v30 = vmul.f32 %v926_v10, %v244_v22  ;;  %v268_v35 = vmul.f32 %v926_v10, %v245_v23  ;;  %v246_v41 = vld [vmem:[%s913_s30 + $0x30] sm:$0xff]  ;;  %v248_v45 = vld [vmem:[%s913_s30 + $0x40] sm:$0xff]  ;;  %v249_v46 = vld [vmem:[%s913_s30 + $0x48] sm:$0xff]  ;;  %v346_v17 = vadd.s32 %v919_v7, %v328_v4 }
  0x13   : > { %v286_v25 = vadd.f32 %v936_v15, %v263_v13  ;;  %v287_v26 = vadd.f32 %v936_v15, %v264_v14  ;;  %v288_v28 = vadd.f32 %v936_v15, %v265_v19  ;;  %787 = vmatpush3.bf16.msra.mxu0 %v839_v6  ;;  %823 = vmatpush3.bf16.msra.mxu1 %v839_v6  ;;  %v247_v49 = vld [vmem:[%s913_s30 + $0x38] sm:$0xff]  ;;  %v250_v57 = vld [vmem:[%s913_s30 + $0x50] sm:$0xff]  ;;  %v252_v13 = vld [vmem:[%s913_s30 + $0x60] sm:$0xff]  ;;  %v330_v22 = vadd.s32 88, %v899_v3 }
  0x14   : > { %v289_v29 = vadd.f32 %v936_v15, %v266_v20  ;;  %v968_v40 = vadd.f32 %v936_v15, %v267_v30  ;;  %v972_v43 = vadd.f32 %v936_v15, %v268_v35  ;;  %788 = vmatprep.subr.bf16.mxu0 %v840_v27  ;;  %816 = vmatprep.subr.bf16.mxu1 %v840_v27  ;;  %v251_v61 = vld [vmem:[%s913_s30 + $0x58] sm:$0xff]  ;;  %v253_v14 = vld [vmem:[%s913_s30 + $0x68] sm:$0xff]  ;;  %v254_v24 = vld [vmem:[%s913_s30 + $0x70] sm:$0xff]  ;;  %vm362_vm8 = vcmp.lt.s32.totalorder %v346_v17, 432 }
  0x15   : > { %v302_v32 = vmax.f32 %v286_v25, 0.0  ;;  %v303_v33 = vmax.f32 %v287_v26, 0.0  ;;  %v304_v37 = vmax.f32 %v288_v28, 0.0  ;;  %v269_v51 = vmul.f32 %v926_v10, %v246_v41  ;;  %v843_v19 = vld [vmem:[%s1128_s3 + $0x38] sm:$0xff]   ;;  %vm1041_vm9 = vmpackc.low %vm362_vm8, %vm361_vm7 }
  0x16   : > { %v305_v38 = vmax.f32 %v289_v29, 0.0  ;;  %v306_v54 = vmax.f32 %v968_v40, 0.0  ;;  %v271_v55 = vmul.f32 %v926_v10, %v248_v45  ;;  %v272_v56 = vmul.f32 %v926_v10, %v249_v46  ;;  %v255_v28 = vld [vmem:[%s913_s30 + $0x78] sm:$0xff]  ;;  %vm1069_vm13 = vmpackc.low %vm358_vm6, %vm357_vm5 }
  0x17   : > { %v739_v42 = vpack.c.bf16 %v303_v33, %v302_v32  ;;  %789 = vmatpush3.bf16.msra.mxu0 %v840_v27  ;;  %824 = vmatpush3.bf16.msra.mxu1 %v840_v27  ;;  %v307_v58 = vmax.f32 %v972_v43, 0.0  ;;  %v270_v59 = vmul.f32 %v926_v10, %v247_v49  ;;  %v1016_v2 = vadd.f32 %v936_v15, %v269_v51 }
  0x18   : > { %v995_v53 = vpack.c.bf16 %v305_v38, %v304_v37  ;;  %790 = vmatprep.subr.bf16.mxu0 %v841_v47  ;;  %817 = vmatprep.subr.bf16.mxu1 %v841_v47  ;;  %v294_v0 = vadd.f32 %v936_v15, %v271_v55  ;;  %v295_v1 = vadd.f32 %v936_v15, %v272_v56  ;;  %v331_v32 = vadd.s32 96, %v899_v3 }
  0x19   : > { %796 = vmatprep.mubr.msk.bf16.mxu0 %vm960_vm2, %v739_v42  ;;  %v273_v6 = vmul.f32 %v926_v10, %v250_v57  ;;  %v274_v11 = vmul.f32 %v926_v10, %v251_v61  ;;  %v1026_v16 = vadd.f32 %v936_v15, %v270_v59  ;;  %v347_v23 = vadd.s32 %v919_v7, %v329_v12 }
  0x1a   : > { %v310_v8 = vmax.f32 %v294_v0, 0.0  ;;  %v311_v9 = vmax.f32 %v295_v1, 0.0  ;;  %v275_v26 = vmul.f32 %v926_v10, %v252_v13  ;;  %v276_v27 = vmul.f32 %v926_v10, %v253_v14 }
  0x1b   : > { %791 = vmatpush3.bf16.msra.mxu0 %v841_v47  ;;  %825 = vmatpush3.bf16.msra.mxu1 %v841_v47  ;;  %v296_v18 = vadd.f32 %v936_v15, %v273_v6  ;;  %v297_v21 = vadd.f32 %v936_v15, %v274_v11  ;;  %v348_v31 = vadd.s32 %v919_v7, %v330_v22  ;;  %vm363_vm10 = vcmp.lt.s32.totalorder %v347_v23, 432 }
  0x1c   : > { %792 = vmatprep.subr.bf16.mxu0 %v842_v62  ;;  %818 = vmatprep.subr.bf16.mxu1 %v842_v62  ;;  %v751_v20 = vpack.c.bf16 %v311_v9, %v310_v8  ;;  %v298_v33 = vadd.f32 %v936_v15, %v275_v26  ;;  %v299_v35 = vadd.f32 %v936_v15, %v276_v27  ;;  %v334_v51 = vadd.s32 120, %v899_v3 }
  0x1d   : > { %v312_v25 = vmax.f32 %v296_v18, 0.0  ;;  %v313_v30 = vmax.f32 %v297_v21, 0.0  ;;  %v277_v37 = vmul.f32 %v926_v10, %v254_v24  ;;  %vm364_vm11 = vcmp.lt.s32.totalorder %v348_v31, 432 }
  0x1e   : > { %v349_v41 = vadd.s32 %v919_v7, %v331_v32  ;;  %v278_v42 = vmul.f32 %v926_v10, %v255_v28  ;;  %804 = vmatprep.mubr.msk.bf16.mxu1 %vm1041_vm9, %v751_v20  ;;  %v314_v46 = vmax.f32 %v298_v33, 0.0  ;;  %v315_v47 = vmax.f32 %v299_v35, 0.0  ;;  %vm753_vm15 = vmpackc.low %vm364_vm11, %vm363_vm10 }
  0x1f   : > { %793 = vmatpush3.bf16.msra.mxu0 %v842_v62  ;;  %826 = vmatpush3.bf16.msra.mxu1 %v842_v62  ;;  %v754_v38 = vpack.c.bf16 %v313_v30, %v312_v25  ;;  %v350_v49 = vadd.s32 %v919_v7, %v332_v36  ;;  %v300_v50 = vadd.f32 %v936_v15, %v277_v37  ;;  %v308_v40 = vmax.f32 %v1016_v2, 0.0 }
  0x20   : > { %794 = vmatprep.subr.bf16.mxu0 %v843_v19  ;;  %819 = vmatprep.subr.bf16.mxu1 %v843_v19  ;;  %vm365_vm14 = vcmp.lt.s32.totalorder %v349_v41, 432  ;;  %v301_v34 = vadd.f32 %v936_v15, %v278_v42  ;;  %v745_v55 = vpack.c.bf16 %v307_v58, %v306_v54  ;;  %v757_v48 = vpack.c.bf16 %v315_v47, %v314_v46 }
  0x21   : > { %vm366_vm0 = vcmp.lt.s32.totalorder %v350_v49, 432  ;;  %v351_v15 = vadd.s32 %v919_v7, %v333_v39  ;;  %v352_v3 = vadd.s32 %v919_v7, %v334_v51  ;;  %v309_v43 = vmax.f32 %v1026_v16, 0.0 }
  0x22   : > { %vm756_vm1 = vmpackc.low %vm366_vm0, %vm365_vm14  ;;  %v316_v52 = vmax.f32 %v300_v50, 0.0  ;;  %v317_v54 = vmax.f32 %v301_v34, 0.0  ;;  %vm359_vm2 = vcmp.lt.s32.totalorder %v1011_v63, 432 }
  0x23   : > { %795 = vmatpush3.bf16.msra.mxu0 %v843_v19  ;;  %827 = vmatpush3.bf16.msra.mxu1 %v843_v19  ;;  %vm367_vm4 = vcmp.lt.s32.totalorder %v351_v15, 432  ;;  %vm368_vm5 = vcmp.lt.s32.totalorder %v352_v3, 432  ;;  %vm747_vm6 = vmpackc.low %vm360_vm3, %vm359_vm2  ;;  %v748_v7 = vpack.c.bf16 %v309_v43, %v308_v40 }
  0x24   : > { %vm759_vm7 = vmpackc.low %vm368_vm5, %vm367_vm4 }
  0x26   : > { %797 = vmatmul.mubr.msk.bf16.vlgmr.msra.gmra.mrb[0].mxu0 %vm1057_vm12, %v995_v53  ;;  %805 = vmatmul.mubr.msk.bf16.vlgmr.msra.gmra.mrb[0].mxu1 %vm753_vm15, %v754_v38  ;;  %v760_v53 = vpack.c.bf16 %v317_v54, %v316_v52 }
  0x27   : > { %800 = vmatprep.mubr.msk.bf16.mxu0 %vm1069_vm13, %v745_v55  ;;  %808 = vmatprep.mubr.msk.bf16.mxu1 %vm756_vm1, %v757_v48 }
  0x2e   : > { %801 = vmatmul.mubr.msk.bf16.gmra.mrb[4].mxu0 %vm747_vm6, %v748_v7  ;;  %809 = vmatmul.mubr.msk.bf16.gmra.mrb[4].mxu1 %vm759_vm7, %v760_v53 }
  0xf9   : > { %v798_v56 = vpop.f32.mrb[0].mxu0  ;;  %v806_v57 = vpop.f32.mrb[0].mxu1 }
  0xfa   : > { %556 = vst [vmem:[%s1099_s26 + $0x10] sm:$0xff] %v798_v56  ;;  %v491_v58 = vpop.f32.mrb[1].mxu0  ;;  %564 = vst [vmem:[%s1099_s26 + $0x50] sm:$0xff] %v806_v57  ;;  %v523_v59 = vpop.f32.mrb[1].mxu1  ;;  %v594_v4 = vmul.f32 %v798_v56, %v798_v56  ;;  %v602_v42 = vmul.f32 %v806_v57, %v806_v57 }
  0xfb   : > { %554 = vst [vmem:[%s1099_s26] sm:$0xff] %v491_v58  ;;  %v799_v60 = vpop.f32.mrb[2].mxu0  ;;  %562 = vst [vmem:[%s1099_s26 + $0x40] sm:$0xff] %v523_v59  ;;  %v807_v61 = vpop.f32.mrb[2].mxu1  ;;  %v592_v0 = vmul.f32 %v491_v58, %v491_v58  ;;  %v600_v33 = vmul.f32 %v523_v59, %v523_v59 }
  0xfc   : > { %557 = vst [vmem:[%s1099_s26 + $0x18] sm:$0xff] %v799_v60  ;;  %v494_v62 = vpop.f32.mrb[3].mxu0  ;;  %565 = vst [vmem:[%s1099_s26 + $0x58] sm:$0xff] %v807_v61  ;;  %v526_v63 = vpop.f32.mrb[3].mxu1  ;;  %v595_v8 = vmul.f32 %v799_v60, %v799_v60  ;;  %v603_v47 = vmul.f32 %v807_v61, %v807_v61 }
  0xfd   : > { %555 = vst [vmem:[%s1099_s26 + $0x8] sm:$0xff] %v494_v62  ;;  %v570_v1 = vadd.f32 %v494_v62, %v491_v58  ;;  %v593_v2 = vmul.f32 %v494_v62, %v494_v62  ;;  %563 = vst [vmem:[%s1099_s26 + $0x48] sm:$0xff] %v526_v63  ;;  %v601_v41 = vmul.f32 %v526_v63, %v526_v63 }
  0xff   : > { %v571_v5 = vadd.f32 %v798_v56, %v570_v1  ;;  %v608_v6 = vadd.f32 %v593_v2, %v592_v0 }
 0x101   : > { %v609_v9 = vadd.f32 %v608_v6, %v594_v4  ;;  %v802_v11 = vpop.f32.mrb[4].mxu0  ;;  %v572_v12 = vadd.f32 %v799_v60, %v571_v5  ;;  %v810_v13 = vpop.f32.mrb[4].mxu1 }
 0x102   : > { %560 = vst [vmem:[%s1099_s26 + $0x30] sm:$0xff] %v802_v11  ;;  %v507_v14 = vpop.f32.mrb[5].mxu0  ;;  %568 = vst [vmem:[%s1099_s26 + $0x70] sm:$0xff] %v810_v13  ;;  %v539_v16 = vpop.f32.mrb[5].mxu1  ;;  %v598_v27 = vmul.f32 %v802_v11, %v802_v11  ;;  %v606_v48 = vmul.f32 %v810_v13, %v810_v13 }
 0x103   : > { %558 = vst [vmem:[%s1099_s26 + $0x20] sm:$0xff] %v507_v14  ;;  %v573_v17 = vadd.f32 %v572_v12, %v507_v14  ;;  %v596_v18 = vmul.f32 %v507_v14, %v507_v14  ;;  %v610_v19 = vadd.f32 %v609_v9, %v595_v8  ;;  %v803_v20 = vpop.f32.mrb[6].mxu0  ;;  %566 = vst [vmem:[%s1099_s26 + $0x60] sm:$0xff] %v539_v16  ;;  %v811_v21 = vpop.f32.mrb[6].mxu1 }
 0x104   : > { %561 = vst [vmem:[%s1099_s26 + $0x38] sm:$0xff] %v803_v20  ;;  %v510_v22 = vpop.f32.mrb[7].mxu0  ;;  %569 = vst [vmem:[%s1099_s26 + $0x78] sm:$0xff] %v811_v21  ;;  %v542_v23 = vpop.f32.mrb[7].mxu1  ;;  %v599_v30 = vmul.f32 %v803_v20, %v803_v20  ;;  %v604_v10 = vmul.f32 %v539_v16, %v539_v16  ;;  %v607_v40 = vmul.f32 %v811_v21, %v811_v21 }
 0x105   : > { %v611_v24 = vadd.f32 %v610_v19, %v596_v18  ;;  %559 = vst [vmem:[%s1099_s26 + $0x28] sm:$0xff] %v510_v22  ;;  %v574_v25 = vadd.f32 %v573_v17, %v510_v22  ;;  %v597_v26 = vmul.f32 %v510_v22, %v510_v22  ;;  %567 = vst [vmem:[%s1099_s26 + $0x68] sm:$0xff] %v542_v23 }
 0x106   : > { %v605_v44 = vmul.f32 %v542_v23, %v542_v23 }
 0x107   : > { %v575_v28 = vadd.f32 %v802_v11, %v574_v25  ;;  %v612_v29 = vadd.f32 %v611_v24, %v597_v26 }
 0x109   : > { %v613_v31 = vadd.f32 %v612_v29, %v598_v27  ;;  %v576_v32 = vadd.f32 %v803_v20, %v575_v28 }
 0x10b   : > { %v577_v35 = vadd.f32 %v576_v32, %v523_v59  ;;  %v614_v36 = vadd.f32 %v613_v31, %v599_v30 }
 0x10d   : > { %v615_v37 = vadd.f32 %v614_v36, %v600_v33  ;;  %v578_v38 = vadd.f32 %v577_v35, %v526_v63 }
 0x10f   : > { %v579_v45 = vadd.f32 %v806_v57, %v578_v38  ;;  %v616_v46 = vadd.f32 %v615_v37, %v601_v41 }
 0x111   : > { %v617_v49 = vadd.f32 %v616_v46, %v602_v42  ;;  %v580_v50 = vadd.f32 %v807_v61, %v579_v45 }
 0x113   : > { %v581_v34 = vadd.f32 %v580_v50, %v539_v16  ;;  %v618_v39 = vadd.f32 %v617_v49, %v603_v47 }
 0x115   : > { %v619_v51 = vadd.f32 %v618_v39, %v604_v10  ;;  %v582_v55 = vadd.f32 %v581_v34, %v542_v23 }
 0x117   : > { %v583_v15 = vadd.f32 %v810_v13, %v582_v55  ;;  %v620_v3 = vadd.f32 %v619_v51, %v605_v44 }
 0x119   : > { %v584_v43 = vadd.f32 %v811_v21, %v583_v15  ;;  %v621_v52 = vadd.f32 %v620_v3, %v606_v48 }
 0x11b   : > { %v585_v54 = vrot.slane %v584_v43, 4  ;;  %v622_v7 = vadd.f32 %v621_v52, %v607_v40 }
 0x11d   : > { %v586_v53 = vadd.f32 %v585_v54, %v584_v43  ;;  %v623_v56 = vrot.slane %v622_v7, 4 }
 0x11f   : > { %v587_v57 = vrot.slane %v586_v53, 2  ;;  %v624_v58 = vadd.f32 %v623_v56, %v622_v7 }
 0x121   : > { %v588_v59 = vadd.f32 %v587_v57, %v586_v53  ;;  %v625_v60 = vrot.slane %v624_v58, 2 }
 0x123   : > { %v589_v61 = vrot.slane %v588_v59, 1  ;;  %v626_v62 = vadd.f32 %v625_v60, %v624_v58 }
 0x125   : > { %v590_v63 = vadd.f32 %v589_v61, %v588_v59  ;;  %v627_v0 = vrot.slane %v626_v62, 1 }
 0x127   : > { %591 = vst [vmem:[%s238_s29] sm:$0x1] %v590_v63  ;;  %v628_v1 = vadd.f32 %v627_v0, %v626_v62 }
 0x129   : > { %629 = vst [vmem:[%s238_s29 + $0x1] sm:$0x1] %v628_v1 }
 0x12a PF: > { %s16_s18 = sadd.s32 1, %s850_s18  }
 0x12b   : > { %p13_p5 = scmp.ge.s32.totalorder %s16_s18, 6  }
 0x12d   :  { %15 = sbr.rel (!%p13_p5) target bundleno = 1 (0x1), region = 78 }

// kernel: conv_block_forward.9
= control target key start
LH: loop header
LB: loop body
LE: loop exit
PB: predicated region body
PF: predicated region fallthrough
CT: control target
= control target key end

     0   :  { %s585_s21 = smov 0   ;;  %s748_s0 = inlined_call_operand.vmem [shape: f32[512,128], index: 0, kind: input, shape index: {}]   ;;  %s749_s1 = inlined_call_operand.vmem [shape: f32[512,128], index: 1, kind: input, shape index: {}]   ;;  %s750_s2 = inlined_call_operand.vmem [shape: f32[1,128], index: 2, kind: input, shape index: {}]   ;;  %s751_s3 = inlined_call_operand.vmem [shape: f32[1,128], index: 3, kind: input, shape index: {}]   ;;  %s752_s4 = inlined_call_operand.vmem [shape: f32[1,128], index: 4, kind: input, shape index: {}]   ;;  %s753_s5 = inlined_call_operand.vmem [shape: f32[1,128], index: 5, kind: input, shape index: {}]   ;;  %s754_s6 = inlined_call_operand.vmem [shape: f32[512,128], index: 6, kind: output, shape index: {}]  }
   0x1 LB: > { %s517_s22 = sadd.s32 4294967295, %s548_s21   ;;  %p521_p0 = scmp.ge.s32.totalorder %s548_s21, 1  ;;  %s548_s21 = sphi %s585_s21, %s16_s21  }
   0x2   : > { %p224_p1 = scmp.lt.s32.totalorder %s548_s21, 5 }
   0x4   : > { %p225_p2 = pnand %p521_p0, %p224_p1 }
   0x5   : > { %s522_s23 = sshll.u32 (!%p225_p2), %s517_s22, 4  ;;  %v598_v0 = vld [vmem:[%s750_s2] ss:$0 sm:$0xff] (!%p225_p2) }
   0x6   : > { %228 = sbr.rel (%p225_p2) target bundleno = 47 (0x2f), region = 44  ;;  %p260_p3 = scmp.lt.s32.totalorder (!%p225_p2), %s522_s23, 63  ;;  %v603_v1 = vld [vmem:[%s752_s4] ss:$0 sm:$0xff] (!%p225_p2) }
   0x7   : > { %v620_v2 = vld [vmem:[%s751_s3] ss:$0 sm:$0xff] (!%p225_p2) }
   0x8   : > { %v625_v3 = vld [vmem:[%s753_s5] ss:$0 sm:$0xff] (!%p225_p2) }
   0xd   : > { %s756_s23 = smov (!%p260_p3, %s522_s23), 63 }
   0xe   : > { %s593_s24 = sshll.u32 %s756_s23, 3 }
   0xf   : > { %s609_s7 = scalar_lea.vmem %s748_s0, %s593_s24  ;;  %s615_s10 = scalar_lea.vmem %s749_s1, %s593_s24 }
  0x10   : > { %v277_v4 = vld [vmem:[%s609_s7] sm:$0xff]  ;;  %v278_v6 = vld [vmem:[%s609_s7 + $0x8] sm:$0xff]  ;;  %v279_v11 = vld [vmem:[%s609_s7 + $0x10] sm:$0xff]  ;;  %s660_s17 = scalar_lea.vmem %s754_s6, %s593_s24 }
  0x11   : > { %v339_v5 = vld [vmem:[%s615_s10] sm:$0xff]  ;;  %v300_v7 = vmul.f32 %v598_v0, %v277_v4  ;;  %v301_v9 = vmul.f32 %v598_v0, %v278_v6  ;;  %v340_v10 = vld [vmem:[%s615_s10 + $0x8] sm:$0xff]  ;;  %v341_v12 = vld [vmem:[%s615_s10 + $0x10] sm:$0xff]  ;;  %v302_v14 = vmul.f32 %v598_v0, %v279_v11 }
  0x12   : > { %v362_v8 = vmul.f32 %v603_v1, %v339_v5  ;;  %v363_v13 = vmul.f32 %v603_v1, %v340_v10  ;;  %v364_v15 = vmul.f32 %v603_v1, %v341_v12  ;;  %v280_v16 = vld [vmem:[%s609_s7 + $0x18] sm:$0xff]  ;;  %v281_v18 = vld [vmem:[%s609_s7 + $0x20] sm:$0xff]  ;;  %v282_v24 = vld [vmem:[%s609_s7 + $0x28] sm:$0xff] }
  0x13   : > { %v342_v17 = vld [vmem:[%s615_s10 + $0x18] sm:$0xff]  ;;  %v323_v19 = vadd.f32 %v620_v2, %v300_v7  ;;  %v324_v21 = vadd.f32 %v620_v2, %v301_v9  ;;  %v303_v22 = vmul.f32 %v598_v0, %v280_v16  ;;  %v343_v23 = vld [vmem:[%s615_s10 + $0x20] sm:$0xff]  ;;  %v325_v26 = vadd.f32 %v620_v2, %v302_v14  ;;  %v344_v29 = vld [vmem:[%s615_s10 + $0x28] sm:$0xff] }
  0x14   : > { %v385_v20 = vadd.f32 %v625_v3, %v362_v8  ;;  %v386_v25 = vadd.f32 %v625_v3, %v363_v13  ;;  %v387_v27 = vadd.f32 %v625_v3, %v364_v15  ;;  %v365_v28 = vmul.f32 %v603_v1, %v342_v17  ;;  %v283_v38 = vld [vmem:[%s609_s7 + $0x30] sm:$0xff]  ;;  %v284_v44 = vld [vmem:[%s609_s7 + $0x38] sm:$0xff]  ;;  %v285_v46 = vld [vmem:[%s609_s7 + $0x40] sm:$0xff] }
  0x15   : > { %v326_v31 = vadd.f32 %v620_v2, %v303_v22  ;;  %v304_v32 = vmul.f32 %v598_v0, %v281_v18  ;;  %v366_v33 = vmul.f32 %v603_v1, %v343_v23  ;;  %v305_v37 = vmul.f32 %v598_v0, %v282_v24  ;;  %v345_v39 = vld [vmem:[%s615_s10 + $0x30] sm:$0xff]  ;;  %v346_v45 = vld [vmem:[%s615_s10 + $0x38] sm:$0xff]  ;;  %v347_v55 = vld [vmem:[%s615_s10 + $0x40] sm:$0xff] }
  0x16   : > { %v401_v30 = vadd.f32 %v385_v20, %v323_v19  ;;  %v402_v34 = vadd.f32 %v386_v25, %v324_v21  ;;  %v403_v35 = vadd.f32 %v387_v27, %v325_v26  ;;  %v388_v36 = vadd.f32 %v625_v3, %v365_v28  ;;  %v286_v60 = vld [vmem:[%s609_s7 + $0x48] sm:$0xff]  ;;  %v287_v6 = vld [vmem:[%s609_s7 + $0x50] sm:$0xff]  ;;  %v288_v12 = vld [vmem:[%s609_s7 + $0x58] sm:$0xff] }
  0x17   : > { %v327_v41 = vadd.f32 %v620_v2, %v304_v32  ;;  %v389_v42 = vadd.f32 %v625_v3, %v366_v33  ;;  %v367_v43 = vmul.f32 %v603_v1, %v344_v29  ;;  %v328_v50 = vadd.f32 %v620_v2, %v305_v37  ;;  %v348_v61 = vld [vmem:[%s615_s10 + $0x48] sm:$0xff]  ;;  %v349_v7 = vld [vmem:[%s615_s10 + $0x50] sm:$0xff]  ;;  %v350_v21 = vld [vmem:[%s615_s10 + $0x58] sm:$0xff] }
  0x18   : > { %v417_v40 = vmax.f32 %v401_v30, 0.0  ;;  %v418_v47 = vmax.f32 %v402_v34, 0.0  ;;  %v419_v48 = vmax.f32 %v403_v35, 0.0  ;;  %v404_v49 = vadd.f32 %v388_v36, %v326_v31  ;;  %v289_v22 = vld [vmem:[%s609_s7 + $0x60] sm:$0xff]  ;;  %v290_v28 = vld [vmem:[%s609_s7 + $0x68] sm:$0xff] }
  0x19   : > { %v405_v51 = vadd.f32 %v389_v42, %v327_v41  ;;  %v390_v52 = vadd.f32 %v625_v3, %v367_v43  ;;  %v306_v53 = vmul.f32 %v598_v0, %v283_v38  ;;  %v368_v54 = vmul.f32 %v603_v1, %v345_v39  ;;  %v351_v27 = vld [vmem:[%s615_s10 + $0x60] sm:$0xff]  ;;  %v352_v33 = vld [vmem:[%s615_s10 + $0x68] sm:$0xff]  ;;  %v291_v38 = vld [vmem:[%s609_s7 + $0x70] sm:$0xff] }
  0x1a   : > { %433 = vst [vmem:[%s660_s17] sm:$0xff] %v417_v40  ;;  %434 = vst [vmem:[%s660_s17 + $0x8] sm:$0xff] %v418_v47  ;;  %v420_v56 = vmax.f32 %v404_v49, 0.0  ;;  %v307_v57 = vmul.f32 %v598_v0, %v284_v44  ;;  %v369_v58 = vmul.f32 %v603_v1, %v346_v45  ;;  %v308_v59 = vmul.f32 %v598_v0, %v285_v46  ;;  %v353_v43 = vld [vmem:[%s615_s10 + $0x70] sm:$0xff]  ;;  %v292_v44 = vld [vmem:[%s609_s7 + $0x78] sm:$0xff] }
  0x1b   : > { %435 = vst [vmem:[%s660_s17 + $0x10] sm:$0xff] %v419_v48  ;;  %v421_v62 = vmax.f32 %v405_v51, 0.0  ;;  %v406_v63 = vadd.f32 %v390_v52, %v328_v50  ;;  %v329_v4 = vadd.f32 %v620_v2, %v306_v53  ;;  %v391_v5 = vadd.f32 %v625_v3, %v368_v54  ;;  %v354_v49 = vld [vmem:[%s615_s10 + $0x78] sm:$0xff] }
  0x1c   : > { %436 = vst [vmem:[%s660_s17 + $0x18] sm:$0xff] %v420_v56  ;;  %v330_v8 = vadd.f32 %v620_v2, %v307_v57  ;;  %v392_v9 = vadd.f32 %v625_v3, %v369_v58  ;;  %v331_v10 = vadd.f32 %v620_v2, %v308_v59  ;;  %v370_v11 = vmul.f32 %v603_v1, %v347_v55 }
  0x1d   : > { %437 = vst [vmem:[%s660_s17 + $0x20] sm:$0xff] %v421_v62  ;;  %v422_v13 = vmax.f32 %v406_v63, 0.0  ;;  %v407_v14 = vadd.f32 %v391_v5, %v329_v4  ;;  %v309_v15 = vmul.f32 %v598_v0, %v286_v60  ;;  %v371_v16 = vmul.f32 %v603_v1, %v348_v61 }
  0x1e   : > { %v408_v17 = vadd.f32 %v392_v9, %v330_v8  ;;  %v393_v18 = vadd.f32 %v625_v3, %v370_v11  ;;  %v310_v19 = vmul.f32 %v598_v0, %v287_v6  ;;  %v372_v20 = vmul.f32 %v603_v1, %v349_v7 }
  0x1f   : > { %438 = vst [vmem:[%s660_s17 + $0x28] sm:$0xff] %v422_v13  ;;  %v423_v23 = vmax.f32 %v407_v14, 0.0  ;;  %v332_v24 = vadd.f32 %v620_v2, %v309_v15  ;;  %v394_v25 = vadd.f32 %v625_v3, %v371_v16  ;;  %v311_v26 = vmul.f32 %v598_v0, %v288_v12 }
  0x20   : > { %v424_v29 = vmax.f32 %v408_v17, 0.0  ;;  %v409_v30 = vadd.f32 %v393_v18, %v331_v10  ;;  %v333_v31 = vadd.f32 %v620_v2, %v310_v19  ;;  %v395_v32 = vadd.f32 %v625_v3, %v372_v20 }
  0x21   : > { %439 = vst [vmem:[%s660_s17 + $0x30] sm:$0xff] %v423_v23  ;;  %v410_v34 = vadd.f32 %v394_v25, %v332_v24  ;;  %v334_v35 = vadd.f32 %v620_v2, %v311_v26  ;;  %v373_v36 = vmul.f32 %v603_v1, %v350_v21  ;;  %v312_v37 = vmul.f32 %v598_v0, %v289_v22 }
  0x22   : > { %440 = vst [vmem:[%s660_s17 + $0x38] sm:$0xff] %v424_v29  ;;  %v425_v39 = vmax.f32 %v409_v30, 0.0  ;;  %v411_v40 = vadd.f32 %v395_v32, %v333_v31  ;;  %v374_v41 = vmul.f32 %v603_v1, %v351_v27  ;;  %v313_v42 = vmul.f32 %v598_v0, %v290_v28 }
  0x23   : > { %v426_v45 = vmax.f32 %v410_v34, 0.0  ;;  %v396_v46 = vadd.f32 %v625_v3, %v373_v36  ;;  %v335_v47 = vadd.f32 %v620_v2, %v312_v37  ;;  %v375_v48 = vmul.f32 %v603_v1, %v352_v33 }
  0x24   : > { %441 = vst [vmem:[%s660_s17 + $0x40] sm:$0xff] %v425_v39  ;;  %v427_v50 = vmax.f32 %v411_v40, 0.0  ;;  %v397_v51 = vadd.f32 %v625_v3, %v374_v41  ;;  %v336_v52 = vadd.f32 %v620_v2, %v313_v42  ;;  %v314_v53 = vmul.f32 %v598_v0, %v291_v38 }
  0x25   : > { %442 = vst [vmem:[%s660_s17 + $0x48] sm:$0xff] %v426_v45  ;;  %v412_v54 = vadd.f32 %v396_v46, %v334_v35  ;;  %v398_v55 = vadd.f32 %v625_v3, %v375_v48  ;;  %v376_v56 = vmul.f32 %v603_v1, %v353_v43  ;;  %v315_v57 = vmul.f32 %v598_v0, %v292_v44 }
  0x26   : > { %443 = vst [vmem:[%s660_s17 + $0x50] sm:$0xff] %v427_v50  ;;  %v413_v58 = vadd.f32 %v397_v51, %v335_v47  ;;  %v337_v59 = vadd.f32 %v620_v2, %v314_v53  ;;  %v377_v60 = vmul.f32 %v603_v1, %v354_v49 }
  0x27   : > { %v428_v61 = vmax.f32 %v412_v54, 0.0  ;;  %v414_v62 = vadd.f32 %v398_v55, %v336_v52  ;;  %v399_v63 = vadd.f32 %v625_v3, %v376_v56  ;;  %v338_v4 = vadd.f32 %v620_v2, %v315_v57 }
  0x28   : > { %v429_v5 = vmax.f32 %v413_v58, 0.0  ;;  %v400_v6 = vadd.f32 %v625_v3, %v377_v60 }
  0x29   : > { %444 = vst [vmem:[%s660_s17 + $0x58] sm:$0xff] %v428_v61  ;;  %v430_v0 = vmax.f32 %v414_v62, 0.0  ;;  %v415_v7 = vadd.f32 %v399_v63, %v337_v59 }
  0x2a   : > { %445 = vst [vmem:[%s660_s17 + $0x60] sm:$0xff] %v429_v5  ;;  %v416_v8 = vadd.f32 %v400_v6, %v338_v4 }
  0x2b   : > { %446 = vst [vmem:[%s660_s17 + $0x68] sm:$0xff] %v430_v0  ;;  %v431_v9 = vmax.f32 %v415_v7, 0.0 }
  0x2c   : > { %v432_v10 = vmax.f32 %v416_v8, 0.0 }
  0x2d   : > { %447 = vst [vmem:[%s660_s17 + $0x70] sm:$0xff] %v431_v9 }
  0x2e   : > { %448 = vst [vmem:[%s660_s17 + $0x78] sm:$0xff] %v432_v10 }
  0x2f PF: > { %s16_s21 = sadd.s32 1, %s548_s21  }
  0x30   : > { %p13_p4 = scmp.ge.s32.totalorder %s16_s21, 6  }
  0x32   :  { %15 = sbr.rel (!%p13_p4) target bundleno = 1 (0x1), region = 77 }

// kernel: conv_block_forward.7
= control target key start
LH: loop header
LB: loop body
LE: loop exit
PB: predicated region body
PF: predicated region fallthrough
CT: control target
= control target key end

     0   :  { %s6647_s12 = smov 0   ;;  %s7864_s0 = inlined_call_operand.vmem [shape: bf16[512,3456], index: 0, kind: input, shape index: {}]   ;;  %s7865_s1 = inlined_call_operand.vmem [shape: bf16[3456,128], index: 1, kind: input, shape index: {}]   ;;  %s7866_s2 = inlined_call_operand.vmem [shape: f32[512,128], index: 2, kind: output, shape index: {0}]   ;;  %s7867_s3 = inlined_call_operand.vmem [shape: f32[4,2,128], index: 3, kind: output, shape index: {1}]  }
   0x1 LB: > { %s6653_s13 = sadd.s32 4294967295, %s6625_s12   ;;  %p4754_p0 = scmp.ge.s32.totalorder %s6625_s12, 1  ;;  %s6625_s12 = sphi %s6647_s12, %s14_s12  }
   0x2   : > { %p142_p1 = scmp.lt.s32.totalorder %s6625_s12, 5 }
   0x4   : > { %p143_p2 = pnand %p4754_p0, %p142_p1 }
   0x5   : > { %v6083_v0 = vld [vmem:[%s7865_s1 + $0x40] sm:$0xff] (!%p143_p2)   ;;  %v6087_v4 = vld [vmem:[%s7865_s1 + $0x48] sm:$0xff] (!%p143_p2)   ;;  %v6091_v8 = vld [vmem:[%s7865_s1 + $0x50] sm:$0xff] (!%p143_p2)   ;;  %s4755_s19 = sshll.u32 (!%p143_p2), %s6653_s13, 4  ;;  %p184_p4 = scmp.lt.s32.totalorder (!%p143_p2), %s6653_s13, 3 }
   0x6   : > { %146 = sbr.rel (%p143_p2) target bundleno = 717 (0x2cd), region = 28  ;;  %v6084_v1 = vld [vmem:[%s7865_s1 + $0xc0] sm:$0xff] (!%p143_p2)   ;;  %5194 = vmatprep.subr.bf16.mxu0 (!%p143_p2), %v6083_v0  ;;  %v6088_v5 = vld [vmem:[%s7865_s1 + $0xc8] sm:$0xff] (!%p143_p2)   ;;  %v6092_v9 = vld [vmem:[%s7865_s1 + $0xd0] sm:$0xff] (!%p143_p2)   ;;  %p172_p3 = scmp.lt.s32.totalorder (!%p143_p2), %s4755_s19, 63 }
   0x7   : > { %v6085_v2 = vld [vmem:[%s7865_s1] sm:$0xff] (!%p143_p2)   ;;  %5258 = vmatprep.subr.bf16.mxu1 (!%p143_p2), %v6084_v1  ;;  %v6089_v6 = vld [vmem:[%s7865_s1 + $0x8] sm:$0xff] (!%p143_p2)   ;;  %v6093_v10 = vld [vmem:[%s7865_s1 + $0x10] sm:$0xff] (!%p143_p2)  }
   0x8   : > { %v6086_v3 = vld [vmem:[%s7865_s1 + $0x80] sm:$0xff] (!%p143_p2)   ;;  %5195 = vmatpush3.bf16.msra.mxu0 (!%p143_p2), %v6085_v2  ;;  %v6090_v7 = vld [vmem:[%s7865_s1 + $0x88] sm:$0xff] (!%p143_p2)   ;;  %v6094_v11 = vld [vmem:[%s7865_s1 + $0x90] sm:$0xff] (!%p143_p2)  }
   0x9   : > { %5259 = vmatpush3.bf16.msra.mxu1 (!%p143_p2), %v6086_v3  ;;  %5196 = vmatprep.subr.bf16.mxu0 (!%p143_p2), %v6087_v4  ;;  %v6095_v12 = vld [vmem:[%s7865_s1 + $0x58] sm:$0xff] (!%p143_p2)   ;;  %v6099_v16 = vld [vmem:[%s7865_s1 + $0x60] sm:$0xff] (!%p143_p2)   ;;  %v6103_v20 = vld [vmem:[%s7865_s1 + $0x68] sm:$0xff] (!%p143_p2)  }
   0xa   : > { %5260 = vmatprep.subr.bf16.mxu1 (!%p143_p2), %v6088_v5  ;;  %v6096_v13 = vld [vmem:[%s7865_s1 + $0xd8] sm:$0xff] (!%p143_p2)   ;;  %v6100_v17 = vld [vmem:[%s7865_s1 + $0xe0] sm:$0xff] (!%p143_p2)   ;;  %v6104_v21 = vld [vmem:[%s7865_s1 + $0xe8] sm:$0xff] (!%p143_p2)  }
   0xb   : > { %v6097_v14 = vld [vmem:[%s7865_s1 + $0x18] sm:$0xff] (!%p143_p2)   ;;  %v6101_v18 = vld [vmem:[%s7865_s1 + $0x20] sm:$0xff] (!%p143_p2)   ;;  %v6105_v22 = vld [vmem:[%s7865_s1 + $0x28] sm:$0xff] (!%p143_p2)  }
   0xc   : > { %5197 = vmatpush3.bf16.msra.mxu0 (!%p143_p2), %v6089_v6  ;;  %v6098_v15 = vld [vmem:[%s7865_s1 + $0x98] sm:$0xff] (!%p143_p2)   ;;  %v6102_v19 = vld [vmem:[%s7865_s1 + $0xa0] sm:$0xff] (!%p143_p2)   ;;  %v6106_v23 = vld [vmem:[%s7865_s1 + $0xa8] sm:$0xff] (!%p143_p2)  }
   0xd   : > { %5261 = vmatpush3.bf16.msra.mxu1 %v6090_v7  ;;  %5198 = vmatprep.subr.bf16.mxu0 %v6091_v8  ;;  %s7869_s19 = smov (!%p172_p3, %s4755_s19), 63  ;;  %v6107_v24 = vld [vmem:[%s7865_s1 + $0x70] sm:$0xff]   ;;  %v6111_v28 = vld [vmem:[%s7865_s1 + $0x78] sm:$0xff]   ;;  %v6121_v36 = vld [vmem:[%s7865_s1 + $0x140] sm:$0xff]   ;;  %s7871_s13 = smov (!%p184_p4, %s6653_s13), 3 }
   0xe   : > { %5262 = vmatprep.subr.bf16.mxu1 %v6092_v9  ;;  %v6108_v25 = vld [vmem:[%s7865_s1 + $0xf0] sm:$0xff]   ;;  %s6074_s17 = smul.u32 108, %s7869_s19  ;;  %v6112_v29 = vld [vmem:[%s7865_s1 + $0xf8] sm:$0xff]   ;;  %v6122_v37 = vld [vmem:[%s7865_s1 + $0x100] sm:$0xff]  }
   0xf   : > { %v6109_v26 = vld [vmem:[%s7865_s1 + $0x30] sm:$0xff]   ;;  %v6113_v30 = vld [vmem:[%s7865_s1 + $0x38] sm:$0xff]   ;;  %v6129_v42 = vld [vmem:[%s7865_s1 + $0x148] sm:$0xff]  }
  0x10   : > { %5199 = vmatpush3.bf16.msra.mxu0 %v6093_v10  ;;  %v6110_v27 = vld [vmem:[%s7865_s1 + $0xb0] sm:$0xff]   ;;  %s6754_s29 = scalar_lea.vmem %s7864_s0, %s6074_s17  ;;  %v6114_v31 = vld [vmem:[%s7865_s1 + $0xb8] sm:$0xff]   ;;  %v6130_v43 = vld [vmem:[%s7865_s1 + $0x108] sm:$0xff]  }
  0x11   : > { %5263 = vmatpush3.bf16.msra.mxu1 %v6094_v11  ;;  %5200 = vmatprep.subr.bf16.mxu0 %v6095_v12  ;;  %v6115_v32 = vld [vmem:[%s6754_s29] ss:$108 sps:$4 sm:$0xff]   ;;  %v6117_v33 = vld [vmem:[%s6754_s29 + $0x4] ss:$108 sps:$4 sm:$0xff]   ;;  %v6118_v34 = vld [vmem:[%s6754_s29 + $0x8] ss:$108 sps:$4 sm:$0xff]  }
  0x12   : > { %5264 = vmatprep.subr.bf16.mxu1 %v6096_v13  ;;  %v6120_v35 = vld [vmem:[%s6754_s29 + $0xc] ss:$108 sps:$4 sm:$0xff]   ;;  %3261 = vmatprep.mubr.bf16.mxu0 %v6117_v33  ;;  %v6123_v38 = vld [vmem:[%s6754_s29 + $0xdc] ss:$108 sps:$4 sm:$0xff]   ;;  %v6125_v39 = vld [vmem:[%s6754_s29 + $0xe4] ss:$108 sps:$4 sm:$0xff]  }
  0x13   : > { %3358 = vmatprep.mubr.bf16.mxu1 %v6120_v35  ;;  %v6127_v40 = vld [vmem:[%s6754_s29 + $0xd8] ss:$108 sps:$4 sm:$0xff]   ;;  %v6128_v41 = vld [vmem:[%s6754_s29 + $0xe0] ss:$108 sps:$4 sm:$0xff]   ;;  %v6133_v45 = vld [vmem:[%s6754_s29 + $0x1bc] ss:$108 sps:$4 sm:$0xff]  }
  0x14   : > { %5201 = vmatpush3.bf16.msra.mxu0 %v6097_v14  ;;  %v6131_v44 = vld [vmem:[%s6754_s29 + $0x1b4] ss:$108 sps:$4 sm:$0xff]   ;;  %v6135_v48 = vld [vmem:[%s6754_s29 + $0x1b0] ss:$108 sps:$4 sm:$0xff]   ;;  %v6136_v49 = vld [vmem:[%s6754_s29 + $0x1b8] ss:$108 sps:$4 sm:$0xff]  }
  0x15   : > { %5265 = vmatpush3.bf16.msra.mxu1 %v6098_v15  ;;  %5202 = vmatprep.subr.bf16.mxu0 %v6099_v16  ;;  %v6137_v46 = vld [vmem:[%s7865_s1 + $0x150] sm:$0xff]   ;;  %v6139_v50 = vld [vmem:[%s6754_s29 + $0x28c] ss:$108 sps:$4 sm:$0xff]   ;;  %v6153_v55 = vld [vmem:[%s7865_s1 + $0x160] sm:$0xff]  }
  0x16   : > { %5266 = vmatprep.subr.bf16.mxu1 %v6100_v17  ;;  %v6138_v47 = vld [vmem:[%s7865_s1 + $0x110] sm:$0xff]   ;;  %v6145_v52 = vld [vmem:[%s7865_s1 + $0x158] sm:$0xff]   ;;  %v6154_v58 = vld [vmem:[%s7865_s1 + $0x1c0] sm:$0xff]  }
  0x17   : > { %v6141_v51 = vld [vmem:[%s6754_s29 + $0x294] ss:$108 sps:$4 sm:$0xff]   ;;  %v6146_v53 = vld [vmem:[%s7865_s1 + $0x118] sm:$0xff]   ;;  %v6147_v57 = vld [vmem:[%s6754_s29 + $0x364] ss:$108 sps:$4 sm:$0xff]  }
  0x18   : > { %5203 = vmatpush3.bf16.msra.mxu0 %v6101_v18  ;;  %v6143_v54 = vld [vmem:[%s6754_s29 + $0x288] ss:$108 sps:$4 sm:$0xff]   ;;  %v6144_v56 = vld [vmem:[%s6754_s29 + $0x290] ss:$108 sps:$4 sm:$0xff]   ;;  %v6149_v59 = vld [vmem:[%s6754_s29 + $0x36c] ss:$108 sps:$4 sm:$0xff]  }
  0x19   : > { %5267 = vmatpush3.bf16.msra.mxu1 %v6102_v19  ;;  %5204 = vmatprep.subr.bf16.mxu0 %v6103_v20  ;;  %v6155_v60 = vld [vmem:[%s7865_s1 + $0x120] sm:$0xff]   ;;  %v6157_v62 = vld [vmem:[%s7865_s1 + $0x1c8] sm:$0xff]   ;;  %v6167_v6 = vld [vmem:[%s7865_s1 + $0x1d0] sm:$0xff]  }
  0x1a   : > { %5268 = vmatprep.subr.bf16.mxu1 %v6104_v21  ;;  %v6156_v61 = vld [vmem:[%s7865_s1 + $0x180] sm:$0xff]   ;;  %v6162_v63 = vld [vmem:[%s7865_s1 + $0x188] sm:$0xff]   ;;  %v6168_v7 = vld [vmem:[%s7865_s1 + $0x190] sm:$0xff]  }
  0x1b   : > { %v6151_v0 = vld [vmem:[%s6754_s29 + $0x360] ss:$108 sps:$4 sm:$0xff]   ;;  %v6152_v2 = vld [vmem:[%s6754_s29 + $0x368] ss:$108 sps:$4 sm:$0xff]   ;;  %v6160_v5 = vld [vmem:[%s6754_s29 + $0x444] ss:$108 sps:$4 sm:$0xff]  }
  0x1c   : > { %5205 = vmatpush3.bf16.msra.mxu0 %v6105_v22  ;;  %v6165_v1 = vld [vmem:[%s7865_s1 + $0x168] sm:$0xff]   ;;  %v6169_v8 = vld [vmem:[%s7865_s1 + $0x1d8] sm:$0xff]   ;;  %v6170_v12 = vld [vmem:[%s6754_s29 + $0x514] ss:$108 sps:$4 sm:$0xff]  }
  0x1d   : > { %5269 = vmatpush3.bf16.msra.mxu1 %v6106_v23  ;;  %5206 = vmatprep.subr.bf16.mxu0 %v6107_v24  ;;  %v6158_v3 = vld [vmem:[%s6754_s29 + $0x43c] ss:$108 sps:$4 sm:$0xff]   ;;  %v6163_v10 = vld [vmem:[%s6754_s29 + $0x438] ss:$108 sps:$4 sm:$0xff]   ;;  %v6164_v11 = vld [vmem:[%s6754_s29 + $0x440] ss:$108 sps:$4 sm:$0xff]  }
  0x1e   : > { %5270 = vmatprep.subr.bf16.mxu1 %v6108_v25  ;;  %v6166_v4 = vld [vmem:[%s7865_s1 + $0x128] sm:$0xff]   ;;  %v6174_v9 = vld [vmem:[%s7865_s1 + $0x198] sm:$0xff]   ;;  %v6177_v13 = vld [vmem:[%s7865_s1 + $0x170] sm:$0xff]  }
  0x1f   : > { %v6172_v14 = vld [vmem:[%s6754_s29 + $0x51c] ss:$108 sps:$4 sm:$0xff]   ;;  %v6178_v15 = vld [vmem:[%s7865_s1 + $0x130] sm:$0xff]   ;;  %v6179_v16 = vld [vmem:[%s7865_s1 + $0x1e0] sm:$0xff]  }
  0x20   : > { %5207 = vmatpush3.bf16.msra.mxu0 %v6109_v26  ;;  %v6180_v17 = vld [vmem:[%s7865_s1 + $0x1a0] sm:$0xff]   ;;  %v6181_v18 = vld [vmem:[%s7865_s1 + $0x1e8] sm:$0xff]   ;;  %v6175_v19 = vld [vmem:[%s6754_s29 + $0x510] ss:$108 sps:$4 sm:$0xff]  }
  0x21   : > { %5271 = vmatpush3.bf16.msra.mxu1 %v6110_v27  ;;  %5208 = vmatprep.subr.bf16.mxu0 %v6111_v28  ;;  %v6186_v20 = vld [vmem:[%s7865_s1 + $0x1a8] sm:$0xff]   ;;  %v6176_v21 = vld [vmem:[%s6754_s29 + $0x518] ss:$108 sps:$4 sm:$0xff]   ;;  %v6184_v23 = vld [vmem:[%s6754_s29 + $0x5f4] ss:$108 sps:$4 sm:$0xff]  }
  0x22   : > { %5272 = vmatprep.subr.bf16.mxu1 %v6112_v29  ;;  %v6182_v22 = vld [vmem:[%s6754_s29 + $0x5ec] ss:$108 sps:$4 sm:$0xff]   ;;  %v6191_v26 = vld [vmem:[%s7865_s1 + $0x1f0] sm:$0xff]  }
  0x23   : > { %v6189_v24 = vld [vmem:[%s7865_s1 + $0x178] sm:$0xff]   ;;  %v6192_v27 = vld [vmem:[%s7865_s1 + $0x1b0] sm:$0xff]  }
  0x24   : > { %5209 = vmatpush3.bf16.msra.mxu0 %v6113_v30  ;;  %v6190_v25 = vld [vmem:[%s7865_s1 + $0x138] sm:$0xff]   ;;  %v6198_v30 = vld [vmem:[%s7865_s1 + $0x240] sm:$0xff]  }
  0x25   : > { %5273 = vmatpush3.bf16.msra.mxu1 %v6114_v31  ;;  %5322 = vmatprep.subr.bf16.mxu0 %v6121_v36  ;;  %v6193_v28 = vld [vmem:[%s7865_s1 + $0x1f8] sm:$0xff]   ;;  %v6187_v31 = vld [vmem:[%s6754_s29 + $0x5e8] ss:$108 sps:$4 sm:$0xff]  }
  0x26   : > { %5386 = vmatprep.subr.bf16.mxu1 %v6154_v58  ;;  %v6197_v29 = vld [vmem:[%s7865_s1 + $0x1b8] sm:$0xff]   ;;  %v6196_v33 = vld [vmem:[%s6754_s29 + $0x14] ss:$108 sps:$4 sm:$0xff]   ;;  %v6240_v58 = vld [vmem:[%s7865_s1 + $0x288] sm:$0xff]  }
  0x27   : > { %3262 = vmatmul.mubr.bf16.vlgmr.msra.gmra.mrb[0].mxu0 %v6115_v32  ;;  %v6188_v32 = vld [vmem:[%s6754_s29 + $0x5f0] ss:$108 sps:$4 sm:$0xff]   ;;  %v6199_v36 = vld [vmem:[%s6754_s29 + $0x18] ss:$108 sps:$4 sm:$0xff]  }
  0x28   : > { %3359 = vmatmul.mubr.bf16.vlgmr.msra.gmra.mrb[0].mxu1 %v6118_v34  ;;  %5323 = vmatpush3.bf16.msra.mxu0 %v6122_v37  ;;  %v6201_v34 = vld [vmem:[%s6754_s29 + $0x1c] ss:$108 sps:$4 sm:$0xff]   ;;  %v6202_v37 = vld [vmem:[%s7865_s1 + $0x200] sm:$0xff]  }
  0x29   : > { %3269 = vmatprep.mubr.bf16.mxu0 %v6123_v38  ;;  %3366 = vmatprep.mubr.bf16.mxu1 %v6125_v39  ;;  %v6194_v35 = vld [vmem:[%s6754_s29 + $0x10] ss:$108 sps:$4 sm:$0xff]   ;;  %v6203_v38 = vld [vmem:[%s6754_s29 + $0xec] ss:$108 sps:$4 sm:$0xff]  }
  0x2a   : > { %5324 = vmatprep.subr.bf16.mxu0 %v6129_v42  ;;  %5387 = vmatpush3.bf16.msra.mxu1 %v6156_v61  ;;  %v6206_v39 = vld [vmem:[%s7865_s1 + $0x248] sm:$0xff]  }
  0x2b   : > { %5388 = vmatprep.subr.bf16.mxu1 %v6157_v62  ;;  %v6205_v42 = vld [vmem:[%s6754_s29 + $0xe8] ss:$108 sps:$4 sm:$0xff]   ;;  %v6221_v62 = vld [vmem:[%s6754_s29 + $0x298] ss:$108 sps:$4 sm:$0xff]  }
  0x2c   : > { %5325 = vmatpush3.bf16.msra.mxu0 %v6130_v43  ;;  %v6214_v43 = vld [vmem:[%s7865_s1 + $0x250] sm:$0xff]   ;;  %v6245_v61 = vld [vmem:[%s7865_s1 + $0x228] sm:$0xff]  }
  0x2d   : > { %5326 = vmatprep.subr.bf16.mxu0 %v6137_v46  ;;  %v6215_v46 = vld [vmem:[%s6754_s29 + $0x1cc] ss:$108 sps:$4 sm:$0xff]  }
  0x2e   : > { %5389 = vmatpush3.bf16.msra.mxu1 %v6162_v63  ;;  %v6247_v63 = vld [vmem:[%s7865_s1 + $0x2d0] sm:$0xff]  }
  0x2f   : > { %3270 = vmatmul.mubr.bf16.gmra.mrb[4].mxu0 %v6127_v40  ;;  %5390 = vmatprep.subr.bf16.mxu1 %v6167_v6  ;;  %v6207_v40 = vld [vmem:[%s6754_s29 + $0xf4] ss:$108 sps:$4 sm:$0xff]  }
  0x30   : > { %3367 = vmatmul.mubr.bf16.gmra.mrb[4].mxu1 %v6128_v41  ;;  %3277 = vmatprep.mubr.bf16.mxu0 %v6131_v44  ;;  %v6209_v41 = vld [vmem:[%s7865_s1 + $0x208] sm:$0xff]   ;;  %v6210_v44 = vld [vmem:[%s6754_s29 + $0xf0] ss:$108 sps:$4 sm:$0xff]  }
  0x31   : > { %3374 = vmatprep.mubr.bf16.mxu1 %v6133_v45  ;;  %5327 = vmatpush3.bf16.msra.mxu0 %v6138_v47  ;;  %v6211_v45 = vld [vmem:[%s6754_s29 + $0x1c4] ss:$108 sps:$4 sm:$0xff]  }
  0x32   : > { %5328 = vmatprep.subr.bf16.mxu0 %v6145_v52  ;;  %5391 = vmatpush3.bf16.msra.mxu1 %v6168_v7  ;;  %v6217_v47 = vld [vmem:[%s7865_s1 + $0x210] sm:$0xff]   ;;  %v6230_v52 = vld [vmem:[%s7865_s1 + $0x260] sm:$0xff]  }
  0x33   : > { %5392 = vmatprep.subr.bf16.mxu1 %v6169_v8  ;;  %v6254_v6 = vld [vmem:[%s7865_s1 + $0x270] sm:$0xff]  }
  0x34   : > { %v6257_v7 = vld [vmem:[%s7865_s1 + $0x230] sm:$0xff]  }
  0x35   : > { %5329 = vmatpush3.bf16.msra.mxu0 %v6146_v53  ;;  %v6235_v53 = vld [vmem:[%s7865_s1 + $0x280] sm:$0xff]   ;;  %v6229_v8 = vld [vmem:[%s6754_s29 + $0x370] ss:$108 sps:$4 sm:$0xff]  }
  0x36   : > { %5330 = vmatprep.subr.bf16.mxu0 %v6153_v55  ;;  %5393 = vmatpush3.bf16.msra.mxu1 %v6174_v9  ;;  %v6237_v55 = vld [vmem:[%s7865_s1 + $0x2c8] sm:$0xff]   ;;  %v6259_v9 = vld [vmem:[%s7865_s1 + $0x2e0] sm:$0xff]  }
  0x37   : > { %3278 = vmatmul.mubr.bf16.gmra.mrb[8].mxu0 %v6135_v48  ;;  %5394 = vmatprep.subr.bf16.mxu1 %v6179_v16  ;;  %v6222_v48 = vld [vmem:[%s7865_s1 + $0x258] sm:$0xff]  }
  0x38   : > { %3375 = vmatmul.mubr.bf16.gmra.mrb[8].mxu1 %v6136_v49  ;;  %3285 = vmatprep.mubr.bf16.mxu0 %v6139_v50  ;;  %v6231_v49 = vld [vmem:[%s7865_s1 + $0x2c0] sm:$0xff]   ;;  %v6225_v50 = vld [vmem:[%s7865_s1 + $0x218] sm:$0xff]  }
  0x39   : > { %3382 = vmatprep.mubr.bf16.mxu1 %v6141_v51  ;;  %5331 = vmatpush3.bf16.msra.mxu0 %v6155_v60  ;;  %v6213_v51 = vld [vmem:[%s6754_s29 + $0x1c0] ss:$108 sps:$4 sm:$0xff]   ;;  %v6266_v16 = vld [vmem:[%s7865_s1 + $0x278] sm:$0xff]  }
  0x3a   : > { %5332 = vmatprep.subr.bf16.mxu0 %v6165_v1  ;;  %5395 = vmatpush3.bf16.msra.mxu1 %v6180_v17  ;;  %v6242_v60 = vld [vmem:[%s7865_s1 + $0x268] sm:$0xff]   ;;  %v6248_v1 = vld [vmem:[%s7865_s1 + $0x290] sm:$0xff]  }
  0x3b   : > { %5396 = vmatprep.subr.bf16.mxu1 %v6181_v18  ;;  %v6241_v17 = vld [vmem:[%s6754_s29 + $0x448] ss:$108 sps:$4 sm:$0xff]   ;;  %v6269_v18 = vld [vmem:[%s7865_s1 + $0x238] sm:$0xff]  }
  0x3d   : > { %5333 = vmatpush3.bf16.msra.mxu0 %v6166_v4  ;;  %v6232_v4 = vld [vmem:[%s6754_s29 + $0x37c] ss:$108 sps:$4 sm:$0xff]  }
  0x3e   : > { %5334 = vmatprep.subr.bf16.mxu0 %v6177_v13  ;;  %5397 = vmatpush3.bf16.msra.mxu1 %v6186_v20  ;;  %v6261_v13 = vld [vmem:[%s7865_s1 + $0x2e8] sm:$0xff]   ;;  %v6250_v20 = vld [vmem:[%s6754_s29 + $0x524] ss:$108 sps:$4 sm:$0xff]  }
  0x3f   : > { %3286 = vmatmul.mubr.bf16.gmra.mrb[12].mxu0 %v6143_v54  ;;  %5398 = vmatprep.subr.bf16.mxu1 %v6191_v26  ;;  %v6218_v54 = vld [vmem:[%s6754_s29 + $0x1c8] ss:$108 sps:$4 sm:$0xff]   ;;  %v6278_v26 = vld [vmem:[%s7865_s1 + $0x340] sm:$0xff]  }
  0x40   : > { %3383 = vmatmul.mubr.bf16.gmra.mrb[12].mxu1 %v6144_v56  ;;  %3293 = vmatprep.mubr.bf16.mxu0 %v6147_v57  ;;  %v6219_v56 = vld [vmem:[%s6754_s29 + $0x29c] ss:$108 sps:$4 sm:$0xff]   ;;  %v6223_v57 = vld [vmem:[%s6754_s29 + $0x2a4] ss:$108 sps:$4 sm:$0xff]  }
  0x41   : > { %3390 = vmatprep.mubr.bf16.mxu1 %v6149_v59  ;;  %5335 = vmatpush3.bf16.msra.mxu0 %v6178_v15  ;;  %v6234_v59 = vld [vmem:[%s7865_s1 + $0x220] sm:$0xff]   ;;  %v6264_v15 = vld [vmem:[%s7865_s1 + $0x2a8] sm:$0xff]  }
  0x42   : > { %5336 = vmatprep.subr.bf16.mxu0 %v6189_v24  ;;  %5399 = vmatpush3.bf16.msra.mxu1 %v6192_v27  ;;  %v6255_v24 = vld [vmem:[%s6754_s29 + $0x52c] ss:$108 sps:$4 sm:$0xff]  }
  0x43   : > { %5400 = vmatprep.subr.bf16.mxu1 %v6193_v28  ;;  %v6253_v27 = vld [vmem:[%s6754_s29 + $0x520] ss:$108 sps:$4 sm:$0xff]   ;;  %v6258_v28 = vld [vmem:[%s6754_s29 + $0x528] ss:$108 sps:$4 sm:$0xff]  }
  0x45   : > { %5337 = vmatpush3.bf16.msra.mxu0 %v6190_v25  ;;  %v6277_v25 = vld [vmem:[%s7865_s1 + $0x2b8] sm:$0xff]  }
  0x46   : > { %5450 = vmatprep.subr.bf16.mxu0 %v6198_v30  ;;  %5401 = vmatpush3.bf16.msra.mxu1 %v6197_v29  ;;  %v6262_v29 = vld [vmem:[%s6754_s29 + $0x5fc] ss:$108 sps:$4 sm:$0xff]   ;;  %v6267_v30 = vld [vmem:[%s6754_s29 + $0x604] ss:$108 sps:$4 sm:$0xff]  }
  0x47   : > { %3294 = vmatmul.mubr.bf16.gmra.mrb[16].mxu0 %v6151_v0  ;;  %5514 = vmatprep.subr.bf16.mxu1 %v6231_v49  ;;  %v6226_v0 = vld [vmem:[%s6754_s29 + $0x2a0] ss:$108 sps:$4 sm:$0xff]  }
  0x48   : > { %3391 = vmatmul.mubr.bf16.gmra.mrb[16].mxu1 %v6152_v2  ;;  %3301 = vmatprep.mubr.bf16.mxu0 %v6158_v3  ;;  %v6249_v2 = vld [vmem:[%s7865_s1 + $0x2d8] sm:$0xff]   ;;  %v6227_v3 = vld [vmem:[%s6754_s29 + $0x374] ss:$108 sps:$4 sm:$0xff]  }
  0x49   : > { %3398 = vmatprep.mubr.bf16.mxu1 %v6160_v5  ;;  %v6252_v5 = vld [vmem:[%s7865_s1 + $0x298] sm:$0xff]   ;;  %v6291_v49 = vld [vmem:[%s6754_s29 + $0x1d4] ss:$108 sps:$4 sm:$0xff]  }
  0x4f   : > { %3302 = vmatmul.mubr.bf16.gmra.mrb[20].mxu0 %v6163_v10  ;;  %v6236_v10 = vld [vmem:[%s6754_s29 + $0x378] ss:$108 sps:$4 sm:$0xff]  }
  0x50   : > { %3399 = vmatmul.mubr.bf16.gmra.mrb[20].mxu1 %v6164_v11  ;;  %3309 = vmatprep.mubr.bf16.mxu0 %v6170_v12  ;;  %v6238_v11 = vld [vmem:[%s6754_s29 + $0x44c] ss:$108 sps:$4 sm:$0xff]   ;;  %v6260_v12 = vld [vmem:[%s7865_s1 + $0x2a0] sm:$0xff]  }
  0x51   : > { %3406 = vmatprep.mubr.bf16.mxu1 %v6172_v14  ;;  %v6243_v14 = vld [vmem:[%s6754_s29 + $0x454] ss:$108 sps:$4 sm:$0xff]  }
  0x57   : > { %3310 = vmatmul.mubr.bf16.gmra.mrb[24].mxu0 %v6175_v19  ;;  %v6246_v19 = vld [vmem:[%s6754_s29 + $0x450] ss:$108 sps:$4 sm:$0xff]  }
  0x58   : > { %3407 = vmatmul.mubr.bf16.gmra.mrb[24].mxu1 %v6176_v21  ;;  %3317 = vmatprep.mubr.bf16.mxu0 %v6182_v22  ;;  %v6271_v21 = vld [vmem:[%s7865_s1 + $0x2f0] sm:$0xff]  }
  0x59   : > { %3414 = vmatprep.mubr.bf16.mxu1 %v6184_v23  ;;  %v6272_v22 = vld [vmem:[%s7865_s1 + $0x2b0] sm:$0xff]   ;;  %v6273_v23 = vld [vmem:[%s7865_s1 + $0x2f8] sm:$0xff]  }
  0x5f   : > { %3318 = vmatmul.mubr.bf16.gmra.mrb[28].mxu0 %v6187_v31  ;;  %v6265_v31 = vld [vmem:[%s6754_s29 + $0x5f8] ss:$108 sps:$4 sm:$0xff]  }
  0x60   : > { %3415 = vmatmul.mubr.bf16.gmra.mrb[28].mxu1 %v6188_v32  ;;  %3455 = vmatprep.mubr.bf16.mxu0 %v6196_v33  ;;  %v6270_v32 = vld [vmem:[%s6754_s29 + $0x600] ss:$108 sps:$4 sm:$0xff]   ;;  %v6276_v33 = vld [vmem:[%s6754_s29 + $0x24] ss:$108 sps:$4 sm:$0xff]  }
  0x61   : > { %3552 = vmatprep.mubr.bf16.mxu1 %v6201_v34  ;;  %v6281_v34 = vld [vmem:[%s6754_s29 + $0x2c] ss:$108 sps:$4 sm:$0xff]  }
  0x67   : > { %3456 = vmatmul.mubr.bf16.vlgmr.msra.gmra.mrb[32].mxu0 %v6194_v35  ;;  %v6274_v35 = vld [vmem:[%s6754_s29 + $0x20] ss:$108 sps:$4 sm:$0xff]  }
  0x68   : > { %5451 = vmatpush3.bf16.msra.mxu0 %v6202_v37  ;;  %3553 = vmatmul.mubr.bf16.vlgmr.msra.gmra.mrb[32].mxu1 %v6199_v36  ;;  %v6279_v36 = vld [vmem:[%s6754_s29 + $0x28] ss:$108 sps:$4 sm:$0xff]   ;;  %v6282_v37 = vld [vmem:[%s7865_s1 + $0x300] sm:$0xff]  }
  0x69   : > { %3463 = vmatprep.mubr.bf16.mxu0 %v6203_v38  ;;  %5452 = vmatprep.subr.bf16.mxu0 %v6206_v39  ;;  %v6311_v38 = vld [vmem:[%s7865_s1 + $0x3c0] sm:$0xff]   ;;  %v6283_v39 = vld [vmem:[%s6754_s29 + $0xfc] ss:$108 sps:$4 sm:$0xff]  }
  0x6a   : > { %3560 = vmatprep.mubr.bf16.mxu1 %v6207_v40  ;;  %5515 = vmatpush3.bf16.msra.mxu1 %v6235_v53  ;;  %v6286_v40 = vld [vmem:[%s7865_s1 + $0x348] sm:$0xff]   ;;  %v6327_v53 = vld [vmem:[%s7865_s1 + $0x3d0] sm:$0xff]  }
  0x6b   : > { %5516 = vmatprep.subr.bf16.mxu1 %v6237_v55  ;;  %v6329_v55 = vld [vmem:[%s7865_s1 + $0x3d8] sm:$0xff]  }
  0x6c   : > { %5453 = vmatpush3.bf16.msra.mxu0 %v6209_v41  ;;  %v6287_v41 = vld [vmem:[%s6754_s29 + $0x104] ss:$108 sps:$4 sm:$0xff]  }
  0x6d   : > { %5454 = vmatprep.subr.bf16.mxu0 %v6214_v43  ;;  %v6317_v43 = vld [vmem:[%s7865_s1 + $0x3c8] sm:$0xff]  }
  0x6e   : > { %5517 = vmatpush3.bf16.msra.mxu1 %v6240_v58  ;;  %v6298_v58 = vld [vmem:[%s6754_s29 + $0x1d8] ss:$108 sps:$4 sm:$0xff]  }
  0x6f   : > { %3464 = vmatmul.mubr.bf16.gmra.mrb[36].mxu0 %v6205_v42  ;;  %5518 = vmatprep.subr.bf16.mxu1 %v6247_v63  ;;  %v6315_v42 = vld [vmem:[%s7865_s1 + $0x380] sm:$0xff]  }
  0x70   : > { %3561 = vmatmul.mubr.bf16.gmra.mrb[36].mxu1 %v6210_v44  ;;  %3471 = vmatprep.mubr.bf16.mxu0 %v6211_v45  ;;  %v6289_v44 = vld [vmem:[%s7865_s1 + $0x308] sm:$0xff]   ;;  %v6285_v45 = vld [vmem:[%s6754_s29 + $0xf8] ss:$108 sps:$4 sm:$0xff]  }
  0x71   : > { %3568 = vmatprep.mubr.bf16.mxu1 %v6215_v46  ;;  %5455 = vmatpush3.bf16.msra.mxu0 %v6217_v47  ;;  %v6294_v46 = vld [vmem:[%s7865_s1 + $0x350] sm:$0xff]   ;;  %v6290_v47 = vld [vmem:[%s6754_s29 + $0x100] ss:$108 sps:$4 sm:$0xff]  }
  0x72   : > { %5456 = vmatprep.subr.bf16.mxu0 %v6222_v48  ;;  %5519 = vmatpush3.bf16.msra.mxu1 %v6248_v1  ;;  %v6320_v48 = vld [vmem:[%s7865_s1 + $0x388] sm:$0xff]   ;;  %v6314_v63 = vld [vmem:[%s7865_s1 + $0x320] sm:$0xff]  }
  0x73   : > { %5520 = vmatprep.subr.bf16.mxu1 %v6249_v2  ;;  %v6325_v1 = vld [vmem:[%s7865_s1 + $0x328] sm:$0xff]   ;;  %v6339_v2 = vld [vmem:[%s7865_s1 + $0x3e0] sm:$0xff]  }
  0x75   : > { %5457 = vmatpush3.bf16.msra.mxu0 %v6225_v50  ;;  %v6295_v50 = vld [vmem:[%s6754_s29 + $0x1dc] ss:$108 sps:$4 sm:$0xff]  }
  0x76   : > { %5458 = vmatprep.subr.bf16.mxu0 %v6230_v52  ;;  %5521 = vmatpush3.bf16.msra.mxu1 %v6252_v5  ;;  %v6302_v52 = vld [vmem:[%s7865_s1 + $0x358] sm:$0xff]   ;;  %v6341_v5 = vld [vmem:[%s7865_s1 + $0x3e8] sm:$0xff]  }
  0x77   : > { %3472 = vmatmul.mubr.bf16.gmra.mrb[40].mxu0 %v6213_v51  ;;  %5522 = vmatprep.subr.bf16.mxu1 %v6259_v9  ;;  %v6297_v51 = vld [vmem:[%s7865_s1 + $0x310] sm:$0xff]   ;;  %v6344_v9 = vld [vmem:[%s7865_s1 + $0x3a8] sm:$0xff]  }
  0x78   : > { %3569 = vmatmul.mubr.bf16.gmra.mrb[40].mxu1 %v6218_v54  ;;  %3479 = vmatprep.mubr.bf16.mxu0 %v6219_v56  ;;  %v6328_v54 = vld [vmem:[%s7865_s1 + $0x390] sm:$0xff]  }
  0x79   : > { %3576 = vmatprep.mubr.bf16.mxu1 %v6223_v57  ;;  %5459 = vmatpush3.bf16.msra.mxu0 %v6234_v59  ;;  %v6293_v56 = vld [vmem:[%s6754_s29 + $0x1d0] ss:$108 sps:$4 sm:$0xff]   ;;  %v6299_v59 = vld [vmem:[%s6754_s29 + $0x2ac] ss:$108 sps:$4 sm:$0xff]  }
  0x7a   : > { %5460 = vmatprep.subr.bf16.mxu0 %v6242_v60  ;;  %5523 = vmatpush3.bf16.msra.mxu1 %v6260_v12  ;;  %v6305_v57 = vld [vmem:[%s7865_s1 + $0x318] sm:$0xff]   ;;  %v6310_v60 = vld [vmem:[%s7865_s1 + $0x360] sm:$0xff]  }
  0x7b   : > { %5524 = vmatprep.subr.bf16.mxu1 %v6261_v13  ;;  %v6346_v12 = vld [vmem:[%s7865_s1 + $0x378] sm:$0xff]  }
  0x7c   : > { %v6349_v13 = vld [vmem:[%s7865_s1 + $0x338] sm:$0xff]  }
  0x7d   : > { %5461 = vmatpush3.bf16.msra.mxu0 %v6245_v61  ;;  %v6332_v61 = vld [vmem:[%s7865_s1 + $0x398] sm:$0xff]  }
  0x7e   : > { %5462 = vmatprep.subr.bf16.mxu0 %v6254_v6  ;;  %5525 = vmatpush3.bf16.msra.mxu1 %v6264_v15  ;;  %v6306_v6 = vld [vmem:[%s6754_s29 + $0x2b0] ss:$108 sps:$4 sm:$0xff]  }
  0x7f   : > { %3480 = vmatmul.mubr.bf16.gmra.mrb[44].mxu0 %v6221_v62  ;;  %5526 = vmatprep.subr.bf16.mxu1 %v6271_v21  ;;  %v6303_v62 = vld [vmem:[%s6754_s29 + $0x2b4] ss:$108 sps:$4 sm:$0xff]   ;;  %v6357_v21 = vld [vmem:[%s7865_s1 + $0x3b8] sm:$0xff]  }
  0x80   : > { %3577 = vmatmul.mubr.bf16.gmra.mrb[44].mxu1 %v6226_v0  ;;  %3487 = vmatprep.mubr.bf16.mxu0 %v6227_v3  ;;  %v6322_v0 = vld [vmem:[%s7865_s1 + $0x368] sm:$0xff]   ;;  %v6340_v3 = vld [vmem:[%s7865_s1 + $0x3a0] sm:$0xff]   ;;  %v6352_v15 = vld [vmem:[%s7865_s1 + $0x3b0] sm:$0xff]  }
  0x81   : > { %3584 = vmatprep.mubr.bf16.mxu1 %v6232_v4  ;;  %5463 = vmatpush3.bf16.msra.mxu0 %v6257_v7  ;;  %v6301_v4 = vld [vmem:[%s6754_s29 + $0x2a8] ss:$108 sps:$4 sm:$0xff]  }
  0x82   : > { %5464 = vmatprep.subr.bf16.mxu0 %v6266_v16  ;;  %5527 = vmatpush3.bf16.msra.mxu1 %v6272_v22  ;;  %v6334_v7 = vld [vmem:[%s7865_s1 + $0x370] sm:$0xff]   ;;  %v6309_v16 = vld [vmem:[%s6754_s29 + $0x380] ss:$108 sps:$4 sm:$0xff]  }
  0x83   : > { %5528 = vmatprep.subr.bf16.mxu1 %v6273_v23  ;;  %v6358_v22 = vld [vmem:[%s7865_s1 + $0x440] sm:$0xff]  }
  0x84   : > { %v6321_v23 = vld [vmem:[%s6754_s29 + $0x458] ss:$108 sps:$4 sm:$0xff]  }
  0x85   : > { %5465 = vmatpush3.bf16.msra.mxu0 %v6269_v18  ;;  %v6316_v18 = vld [vmem:[%s6754_s29 + $0x388] ss:$108 sps:$4 sm:$0xff]  }
  0x86   : > { %5529 = vmatpush3.bf16.msra.mxu1 %v6277_v25  ;;  %5578 = vmatprep.subr.bf16.mxu0 %v6278_v26  ;;  %v6330_v25 = vld [vmem:[%s6754_s29 + $0x534] ss:$108 sps:$4 sm:$0xff]   ;;  %v6335_v26 = vld [vmem:[%s6754_s29 + $0x53c] ss:$108 sps:$4 sm:$0xff]  }
  0x87   : > { %3488 = vmatmul.mubr.bf16.gmra.mrb[48].mxu0 %v6229_v8  ;;  %5642 = vmatprep.subr.bf16.mxu1 %v6311_v38  ;;  %v6307_v8 = vld [vmem:[%s6754_s29 + $0x384] ss:$108 sps:$4 sm:$0xff]  }
  0x88   : > { %3585 = vmatmul.mubr.bf16.gmra.mrb[48].mxu1 %v6236_v10  ;;  %3495 = vmatprep.mubr.bf16.mxu0 %v6238_v11  ;;  %v6312_v10 = vld [vmem:[%s6754_s29 + $0x38c] ss:$108 sps:$4 sm:$0xff]   ;;  %v6337_v11 = vld [vmem:[%s7865_s1 + $0x330] sm:$0xff]   ;;  %v6362_v38 = vld [vmem:[%s7865_s1 + $0x400] sm:$0xff]  }
  0x89   : > { %3592 = vmatprep.mubr.bf16.mxu1 %v6243_v14  ;;  %v6351_v14 = vld [vmem:[%s7865_s1 + $0x3f0] sm:$0xff]  }
  0x8f   : > { %3496 = vmatmul.mubr.bf16.gmra.mrb[52].mxu0 %v6241_v17  ;;  %v6353_v17 = vld [vmem:[%s7865_s1 + $0x3f8] sm:$0xff]  }
  0x90   : > { %3593 = vmatmul.mubr.bf16.gmra.mrb[52].mxu1 %v6246_v19  ;;  %3503 = vmatprep.mubr.bf16.mxu0 %v6250_v20  ;;  %v6318_v19 = vld [vmem:[%s6754_s29 + $0x45c] ss:$108 sps:$4 sm:$0xff]   ;;  %v6323_v20 = vld [vmem:[%s6754_s29 + $0x464] ss:$108 sps:$4 sm:$0xff]  }
  0x91   : > { %3600 = vmatprep.mubr.bf16.mxu1 %v6255_v24  ;;  %v6326_v24 = vld [vmem:[%s6754_s29 + $0x460] ss:$108 sps:$4 sm:$0xff]  }
  0x97   : > { %3504 = vmatmul.mubr.bf16.gmra.mrb[56].mxu0 %v6253_v27  ;;  %v6333_v27 = vld [vmem:[%s6754_s29 + $0x530] ss:$108 sps:$4 sm:$0xff]  }
  0x98   : > { %3601 = vmatmul.mubr.bf16.gmra.mrb[56].mxu1 %v6258_v28  ;;  %3511 = vmatprep.mubr.bf16.mxu0 %v6262_v29  ;;  %v6338_v28 = vld [vmem:[%s6754_s29 + $0x538] ss:$108 sps:$4 sm:$0xff]  }
  0x99   : > { %3608 = vmatprep.mubr.bf16.mxu1 %v6267_v30  ;;  %v6342_v29 = vld [vmem:[%s6754_s29 + $0x60c] ss:$108 sps:$4 sm:$0xff]   ;;  %v6347_v30 = vld [vmem:[%s6754_s29 + $0x614] ss:$108 sps:$4 sm:$0xff]  }
  0x9f   : > { %3512 = vmatmul.mubr.bf16.gmra.mrb[60].mxu0 %v6265_v31  ;;  %v6391_v31 = vld [vmem:[%s7865_s1 + $0x4c0] sm:$0xff]  }
  0xa0   : > { %3609 = vmatmul.mubr.bf16.gmra.mrb[60].mxu1 %v6270_v32  ;;  %3649 = vmatprep.mubr.bf16.mxu0 %v6276_v33  ;;  %v6345_v32 = vld [vmem:[%s6754_s29 + $0x608] ss:$108 sps:$4 sm:$0xff]   ;;  %v6350_v33 = vld [vmem:[%s6754_s29 + $0x610] ss:$108 sps:$4 sm:$0xff]  }
  0xa1   : > { %3746 = vmatprep.mubr.bf16.mxu1 %v6281_v34  ;;  %v6356_v34 = vld [vmem:[%s6754_s29 + $0x34] ss:$108 sps:$4 sm:$0xff]  }
  0xa7   : > { %3650 = vmatmul.mubr.bf16.vlgmr.msra.gmra.mrb[64].mxu0 %v6274_v35  ;;  %v6361_v35 = vld [vmem:[%s6754_s29 + $0x3c] ss:$108 sps:$4 sm:$0xff]  }
  0xa8   : > { %5579 = vmatpush3.bf16.msra.mxu0 %v6282_v37  ;;  %3747 = vmatmul.mubr.bf16.vlgmr.msra.gmra.mrb[64].mxu1 %v6279_v36  ;;  %v6354_v36 = vld [vmem:[%s6754_s29 + $0x30] ss:$108 sps:$4 sm:$0xff]   ;;  %v6359_v37 = vld [vmem:[%s6754_s29 + $0x38] ss:$108 sps:$4 sm:$0xff]  }
  0xa9   : > { %3657 = vmatprep.mubr.bf16.mxu0 %v6283_v39  ;;  %5580 = vmatprep.subr.bf16.mxu0 %v6286_v40  ;;  %v6363_v39 = vld [vmem:[%s6754_s29 + $0x10c] ss:$108 sps:$4 sm:$0xff]  }
  0xaa   : > { %3754 = vmatprep.mubr.bf16.mxu1 %v6287_v41  ;;  %5643 = vmatpush3.bf16.msra.mxu1 %v6315_v42  ;;  %v6366_v40 = vld [vmem:[%s7865_s1 + $0x448] sm:$0xff]   ;;  %v6367_v41 = vld [vmem:[%s6754_s29 + $0x114] ss:$108 sps:$4 sm:$0xff]  }
  0xab   : > { %5644 = vmatprep.subr.bf16.mxu1 %v6317_v43  ;;  %v6395_v42 = vld [vmem:[%s7865_s1 + $0x480] sm:$0xff]   ;;  %v6397_v43 = vld [vmem:[%s7865_s1 + $0x4c8] sm:$0xff]  }
  0xac   : > { %5581 = vmatpush3.bf16.msra.mxu0 %v6289_v44  ;;  %v6369_v44 = vld [vmem:[%s7865_s1 + $0x408] sm:$0xff]  }
  0xad   : > { %5582 = vmatprep.subr.bf16.mxu0 %v6294_v46  ;;  %v6374_v46 = vld [vmem:[%s7865_s1 + $0x450] sm:$0xff]  }
  0xae   : > { %5645 = vmatpush3.bf16.msra.mxu1 %v6320_v48  ;;  %v6371_v48 = vld [vmem:[%s6754_s29 + $0x1e4] ss:$108 sps:$4 sm:$0xff]  }
  0xaf   : > { %3658 = vmatmul.mubr.bf16.gmra.mrb[68].mxu0 %v6285_v45  ;;  %5646 = vmatprep.subr.bf16.mxu1 %v6327_v53  ;;  %v6365_v45 = vld [vmem:[%s6754_s29 + $0x108] ss:$108 sps:$4 sm:$0xff]   ;;  %v6382_v53 = vld [vmem:[%s7865_s1 + $0x458] sm:$0xff]  }
  0xb0   : > { %3755 = vmatmul.mubr.bf16.gmra.mrb[68].mxu1 %v6290_v47  ;;  %3665 = vmatprep.mubr.bf16.mxu0 %v6291_v49  ;;  %v6370_v47 = vld [vmem:[%s6754_s29 + $0x110] ss:$108 sps:$4 sm:$0xff]   ;;  %v6400_v49 = vld [vmem:[%s7865_s1 + $0x488] sm:$0xff]  }
  0xb1   : > { %3762 = vmatprep.mubr.bf16.mxu1 %v6295_v50  ;;  %5583 = vmatpush3.bf16.msra.mxu0 %v6297_v51  ;;  %v6375_v50 = vld [vmem:[%s6754_s29 + $0x1ec] ss:$108 sps:$4 sm:$0xff]   ;;  %v6407_v51 = vld [vmem:[%s7865_s1 + $0x4d0] sm:$0xff]  }
  0xb2   : > { %5584 = vmatprep.subr.bf16.mxu0 %v6302_v52  ;;  %5647 = vmatpush3.bf16.msra.mxu1 %v6328_v54  ;;  %v6377_v52 = vld [vmem:[%s7865_s1 + $0x410] sm:$0xff]  }
  0xb3   : > { %5648 = vmatprep.subr.bf16.mxu1 %v6329_v55  ;;  %v6408_v54 = vld [vmem:[%s7865_s1 + $0x490] sm:$0xff]   ;;  %v6409_v55 = vld [vmem:[%s7865_s1 + $0x4d8] sm:$0xff]  }
  0xb5   : > { %5585 = vmatpush3.bf16.msra.mxu0 %v6305_v57  ;;  %v6373_v57 = vld [vmem:[%s6754_s29 + $0x1e0] ss:$108 sps:$4 sm:$0xff]  }
  0xb6   : > { %5586 = vmatprep.subr.bf16.mxu0 %v6310_v60  ;;  %5649 = vmatpush3.bf16.msra.mxu1 %v6332_v61  ;;  %v6379_v60 = vld [vmem:[%s6754_s29 + $0x2bc] ss:$108 sps:$4 sm:$0xff]  }
  0xb7   : > { %3666 = vmatmul.mubr.bf16.gmra.mrb[72].mxu0 %v6293_v56  ;;  %5650 = vmatprep.subr.bf16.mxu1 %v6339_v2  ;;  %v6385_v56 = vld [vmem:[%s7865_s1 + $0x418] sm:$0xff]   ;;  %v6420_v2 = vld [vmem:[%s7865_s1 + $0x4a0] sm:$0xff]  }
  0xb8   : > { %3763 = vmatmul.mubr.bf16.gmra.mrb[72].mxu1 %v6298_v58  ;;  %3673 = vmatprep.mubr.bf16.mxu0 %v6299_v59  ;;  %v6390_v58 = vld [vmem:[%s7865_s1 + $0x460] sm:$0xff]   ;;  %v6378_v59 = vld [vmem:[%s6754_s29 + $0x1e8] ss:$108 sps:$4 sm:$0xff]   ;;  %v6412_v61 = vld [vmem:[%s7865_s1 + $0x498] sm:$0xff]  }
  0xb9   : > { %3770 = vmatprep.mubr.bf16.mxu1 %v6303_v62  ;;  %5587 = vmatpush3.bf16.msra.mxu0 %v6314_v63  ;;  %v6383_v62 = vld [vmem:[%s6754_s29 + $0x2c4] ss:$108 sps:$4 sm:$0xff]  }
  0xba   : > { %5588 = vmatprep.subr.bf16.mxu0 %v6322_v0  ;;  %5651 = vmatpush3.bf16.msra.mxu1 %v6340_v3  ;;  %v6419_v63 = vld [vmem:[%s7865_s1 + $0x4e0] sm:$0xff]   ;;  %v6421_v3 = vld [vmem:[%s7865_s1 + $0x4e8] sm:$0xff]  }
  0xbb   : > { %5652 = vmatprep.subr.bf16.mxu1 %v6341_v5  ;;  %v6394_v0 = vld [vmem:[%s7865_s1 + $0x420] sm:$0xff]  }
  0xbc   : > { %v6381_v5 = vld [vmem:[%s6754_s29 + $0x2b8] ss:$108 sps:$4 sm:$0xff]  }
  0xbd   : > { %5589 = vmatpush3.bf16.msra.mxu0 %v6325_v1  ;;  %v6402_v1 = vld [vmem:[%s7865_s1 + $0x468] sm:$0xff]  }
  0xbe   : > { %5590 = vmatprep.subr.bf16.mxu0 %v6334_v7  ;;  %5653 = vmatpush3.bf16.msra.mxu1 %v6344_v9  ;;  %v6387_v9 = vld [vmem:[%s6754_s29 + $0x394] ss:$108 sps:$4 sm:$0xff]  }
  0xbf   : > { %3674 = vmatmul.mubr.bf16.gmra.mrb[76].mxu0 %v6301_v4  ;;  %5654 = vmatprep.subr.bf16.mxu1 %v6351_v14  ;;  %v6405_v4 = vld [vmem:[%s7865_s1 + $0x428] sm:$0xff]   ;;  %v6431_v14 = vld [vmem:[%s7865_s1 + $0x4f0] sm:$0xff]  }
  0xc0   : > { %3771 = vmatmul.mubr.bf16.gmra.mrb[76].mxu1 %v6306_v6  ;;  %3681 = vmatprep.mubr.bf16.mxu0 %v6307_v8  ;;  %v6414_v6 = vld [vmem:[%s7865_s1 + $0x470] sm:$0xff]   ;;  %v6386_v8 = vld [vmem:[%s6754_s29 + $0x2c0] ss:$108 sps:$4 sm:$0xff]  }
  0xc1   : > { %3778 = vmatprep.mubr.bf16.mxu1 %v6312_v10  ;;  %5591 = vmatpush3.bf16.msra.mxu0 %v6337_v11  ;;  %v6424_v10 = vld [vmem:[%s7865_s1 + $0x4a8] sm:$0xff]  }
  0xc2   : > { %5592 = vmatprep.subr.bf16.mxu0 %v6346_v12  ;;  %5655 = vmatpush3.bf16.msra.mxu1 %v6352_v15 }
  0xc3   : > { %5656 = vmatprep.subr.bf16.mxu1 %v6353_v17 }
  0xc5   : > { %5593 = vmatpush3.bf16.msra.mxu0 %v6349_v13  ;;  %v6392_v13 = vld [vmem:[%s6754_s29 + $0x39c] ss:$108 sps:$4 sm:$0xff]  }
  0xc6   : > { %5657 = vmatpush3.bf16.msra.mxu1 %v6357_v21  ;;  %5706 = vmatprep.subr.bf16.mxu0 %v6358_v22 }
  0xc7   : > { %3682 = vmatmul.mubr.bf16.gmra.mrb[80].mxu0 %v6309_v16  ;;  %5770 = vmatprep.subr.bf16.mxu1 %v6391_v31  ;;  %v6429_v31 = vld [vmem:[%s7865_s1 + $0x438] sm:$0xff]  }
  0xc8   : > { %3779 = vmatmul.mubr.bf16.gmra.mrb[80].mxu1 %v6316_v18  ;;  %3689 = vmatprep.mubr.bf16.mxu0 %v6318_v19  ;;  %v6417_v18 = vld [vmem:[%s7865_s1 + $0x430] sm:$0xff]  }
  0xc9   : > { %3786 = vmatprep.mubr.bf16.mxu1 %v6323_v20 }
  0xcf   : > { %3690 = vmatmul.mubr.bf16.gmra.mrb[84].mxu0 %v6321_v23 }
  0xd0   : > { %3787 = vmatmul.mubr.bf16.gmra.mrb[84].mxu1 %v6326_v24  ;;  %3697 = vmatprep.mubr.bf16.mxu0 %v6330_v25  ;;  %v6426_v24 = vld [vmem:[%s7865_s1 + $0x478] sm:$0xff]   ;;  %v6432_v25 = vld [vmem:[%s7865_s1 + $0x4b0] sm:$0xff]  }
  0xd1   : > { %3794 = vmatprep.mubr.bf16.mxu1 %v6335_v26  ;;  %v6433_v26 = vld [vmem:[%s7865_s1 + $0x4f8] sm:$0xff]  }
  0xd7   : > { %3698 = vmatmul.mubr.bf16.gmra.mrb[88].mxu0 %v6333_v27 }
  0xd8   : > { %3795 = vmatmul.mubr.bf16.gmra.mrb[88].mxu1 %v6338_v28  ;;  %3705 = vmatprep.mubr.bf16.mxu0 %v6342_v29 }
  0xd9   : > { %3802 = vmatprep.mubr.bf16.mxu1 %v6347_v30  ;;  %v6389_v30 = vld [vmem:[%s6754_s29 + $0x390] ss:$108 sps:$4 sm:$0xff]  }
  0xdf   : > { %3706 = vmatmul.mubr.bf16.gmra.mrb[92].mxu0 %v6345_v32  ;;  %v6437_v32 = vld [vmem:[%s7865_s1 + $0x4b8] sm:$0xff]  }
  0xe0   : > { %3803 = vmatmul.mubr.bf16.gmra.mrb[92].mxu1 %v6350_v33  ;;  %3843 = vmatprep.mubr.bf16.mxu0 %v6356_v34  ;;  %v6396_v34 = vld [vmem:[%s6754_s29 + $0x398] ss:$108 sps:$4 sm:$0xff]  }
  0xe1   : > { %3940 = vmatprep.mubr.bf16.mxu1 %v6361_v35  ;;  %v6438_v35 = vld [vmem:[%s7865_s1 + $0x540] sm:$0xff]  }
  0xe7   : > { %3844 = vmatmul.mubr.bf16.vlgmr.msra.gmra.mrb[96].mxu0 %v6354_v36 }
  0xe8   : > { %5707 = vmatpush3.bf16.msra.mxu0 %v6362_v38  ;;  %3941 = vmatmul.mubr.bf16.vlgmr.msra.gmra.mrb[96].mxu1 %v6359_v37  ;;  %v6398_v38 = vld [vmem:[%s6754_s29 + $0x46c] ss:$108 sps:$4 sm:$0xff]  }
  0xe9   : > { %3851 = vmatprep.mubr.bf16.mxu0 %v6363_v39  ;;  %5708 = vmatprep.subr.bf16.mxu0 %v6366_v40 }
  0xea   : > { %3948 = vmatprep.mubr.bf16.mxu1 %v6367_v41  ;;  %5771 = vmatpush3.bf16.msra.mxu1 %v6395_v42 }
  0xeb   : > { %5772 = vmatprep.subr.bf16.mxu1 %v6397_v43 }
  0xec   : > { %5709 = vmatpush3.bf16.msra.mxu0 %v6369_v44 }
  0xed   : > { %5710 = vmatprep.subr.bf16.mxu0 %v6374_v46 }
  0xee   : > { %5773 = vmatpush3.bf16.msra.mxu1 %v6400_v49 }
  0xef   : > { %3852 = vmatmul.mubr.bf16.gmra.mrb[100].mxu0 %v6365_v45  ;;  %5774 = vmatprep.subr.bf16.mxu1 %v6407_v51  ;;  %v6403_v45 = vld [vmem:[%s6754_s29 + $0x474] ss:$108 sps:$4 sm:$0xff]  }
  0xf0   : > { %3949 = vmatmul.mubr.bf16.gmra.mrb[100].mxu1 %v6370_v47  ;;  %3859 = vmatprep.mubr.bf16.mxu0 %v6371_v48 }
  0xf1   : > { %3956 = vmatprep.mubr.bf16.mxu1 %v6375_v50  ;;  %5711 = vmatpush3.bf16.msra.mxu0 %v6377_v52  ;;  %v6401_v52 = vld [vmem:[%s6754_s29 + $0x468] ss:$108 sps:$4 sm:$0xff]  }
  0xf2   : > { %5712 = vmatprep.subr.bf16.mxu0 %v6382_v53  ;;  %5775 = vmatpush3.bf16.msra.mxu1 %v6408_v54 }
  0xf3   : > { %5776 = vmatprep.subr.bf16.mxu1 %v6409_v55  ;;  %v6406_v55 = vld [vmem:[%s6754_s29 + $0x470] ss:$108 sps:$4 sm:$0xff]  }
  0xf5   : > { %5713 = vmatpush3.bf16.msra.mxu0 %v6385_v56 }
  0xf6   : > { %5714 = vmatprep.subr.bf16.mxu0 %v6390_v58  ;;  %5777 = vmatpush3.bf16.msra.mxu1 %v6412_v61 }
  0xf7   : > { %3860 = vmatmul.mubr.bf16.gmra.mrb[104].mxu0 %v6373_v57  ;;  %5778 = vmatprep.subr.bf16.mxu1 %v6419_v63  ;;  %v6415_v63 = vld [vmem:[%s6754_s29 + $0x54c] ss:$108 sps:$4 sm:$0xff]  }
  0xf8   : > { %3957 = vmatmul.mubr.bf16.gmra.mrb[104].mxu1 %v6378_v59  ;;  %3867 = vmatprep.mubr.bf16.mxu0 %v6379_v60  ;;  %v6410_v59 = vld [vmem:[%s6754_s29 + $0x544] ss:$108 sps:$4 sm:$0xff]  }
  0xf9   : > { %3964 = vmatprep.mubr.bf16.mxu1 %v6383_v62  ;;  %5715 = vmatpush3.bf16.msra.mxu0 %v6394_v0 }
  0xfa   : > { %v5210_v7 = vpop.f32.mrb[0].mxu0  ;;  %5716 = vmatprep.subr.bf16.mxu0 %v6402_v1  ;;  %5779 = vmatpush3.bf16.msra.mxu1 %v6420_v2 }
  0xfb   : > { %v5274_v11 = vpop.f32.mrb[0].mxu1  ;;  %v5211_v12 = vpop.f32.mrb[1].mxu0  ;;  %5780 = vmatprep.subr.bf16.mxu1 %v6421_v3 }
  0xfc   : > { %v5212_v15 = vadd.f32 %v5211_v12, %v5210_v7  ;;  %v5275_v16 = vpop.f32.mrb[1].mxu1  ;;  %v5213_v17 = vpop.f32.mrb[2].mxu0 }
  0xfd   : > { %v5276_v19 = vadd.f32 %v5275_v16, %v5274_v11  ;;  %v5277_v20 = vpop.f32.mrb[2].mxu1  ;;  %v5214_v21 = vpop.f32.mrb[3].mxu0  ;;  %5717 = vmatpush3.bf16.msra.mxu0 %v6405_v4  ;;  %v6471_v4 = vld [vmem:[%s7865_s1 + $0x5c0] sm:$0xff]  }
  0xfe   : > { %v5215_v22 = vadd.f32 %v5214_v21, %v5213_v17  ;;  %v5278_v23 = vpop.f32.mrb[3].mxu1  ;;  %5718 = vmatprep.subr.bf16.mxu0 %v6414_v6  ;;  %5781 = vmatpush3.bf16.msra.mxu1 %v6424_v10  ;;  %v6413_v6 = vld [vmem:[%s6754_s29 + $0x540] ss:$108 sps:$4 sm:$0xff]  }
  0xff   : > { %v7254_v27 = vadd.f32 %v5276_v19, %v5212_v15  ;;  %v5279_v28 = vadd.f32 %v5278_v23, %v5277_v20  ;;  %3868 = vmatmul.mubr.bf16.gmra.mrb[108].mxu0 %v6381_v5  ;;  %5782 = vmatprep.subr.bf16.mxu1 %v6431_v14  ;;  %v6422_v14 = vld [vmem:[%s6754_s29 + $0x61c] ss:$108 sps:$4 sm:$0xff]  }
 0x100   : > { %3965 = vmatmul.mubr.bf16.gmra.mrb[108].mxu1 %v6386_v8  ;;  %3875 = vmatprep.mubr.bf16.mxu0 %v6387_v9  ;;  %v6418_v8 = vld [vmem:[%s6754_s29 + $0x548] ss:$108 sps:$4 sm:$0xff]  }
 0x101   : > { %v7256_v29 = vadd.f32 %v5279_v28, %v5215_v22  ;;  %3972 = vmatprep.mubr.bf16.mxu1 %v6392_v13  ;;  %5719 = vmatpush3.bf16.msra.mxu0 %v6417_v18  ;;  %v6427_v18 = vld [vmem:[%s6754_s29 + $0x624] ss:$108 sps:$4 sm:$0xff]  }
 0x102   : > { %v5216_v33 = vpop.f32.mrb[4].mxu0  ;;  %5720 = vmatprep.subr.bf16.mxu0 %v6426_v24  ;;  %5783 = vmatpush3.bf16.msra.mxu1 %v6432_v25  ;;  %v6425_v24 = vld [vmem:[%s6754_s29 + $0x618] ss:$108 sps:$4 sm:$0xff]  }
 0x103   : > { %v5280_v36 = vpop.f32.mrb[4].mxu1  ;;  %v5217_v37 = vpop.f32.mrb[5].mxu0  ;;  %5784 = vmatprep.subr.bf16.mxu1 %v6433_v26  ;;  %v6430_v26 = vld [vmem:[%s6754_s29 + $0x620] ss:$108 sps:$4 sm:$0xff]   ;;  %v6436_v28 = vld [vmem:[%s6754_s29 + $0x44] ss:$108 sps:$4 sm:$0xff]  }
 0x104   : > { %v5218_v39 = vadd.f32 %v5217_v37, %v5216_v33  ;;  %v5281_v40 = vpop.f32.mrb[5].mxu1  ;;  %v5219_v41 = vpop.f32.mrb[6].mxu0 }
 0x105   : > { %v5282_v42 = vadd.f32 %v5281_v40, %v5280_v36  ;;  %v5283_v43 = vpop.f32.mrb[6].mxu1  ;;  %v5220_v44 = vpop.f32.mrb[7].mxu0  ;;  %5721 = vmatpush3.bf16.msra.mxu0 %v6429_v31 }
 0x106   : > { %v5221_v46 = vadd.f32 %v5220_v44, %v5219_v41  ;;  %v5284_v47 = vpop.f32.mrb[7].mxu1  ;;  %5785 = vmatpush3.bf16.msra.mxu1 %v6437_v32  ;;  %5834 = vmatprep.subr.bf16.mxu0 %v6438_v35  ;;  %v6441_v35 = vld [vmem:[%s6754_s29 + $0x4c] ss:$108 sps:$4 sm:$0xff]  }
 0x107   : > { %v7271_v48 = vadd.f32 %v5282_v42, %v5218_v39  ;;  %v5285_v49 = vadd.f32 %v5284_v47, %v5283_v43  ;;  %3876 = vmatmul.mubr.bf16.gmra.mrb[112].mxu0 %v6389_v30  ;;  %5898 = vmatprep.subr.bf16.mxu1 %v6471_v4  ;;  %v6434_v44 = vld [vmem:[%s6754_s29 + $0x40] ss:$108 sps:$4 sm:$0xff]  }
 0x108   : > { %3973 = vmatmul.mubr.bf16.gmra.mrb[112].mxu1 %v6396_v34  ;;  %3883 = vmatprep.mubr.bf16.mxu0 %v6398_v38  ;;  %v6442_v47 = vld [vmem:[%s7865_s1 + $0x500] sm:$0xff]   ;;  %v6449_v4 = vld [vmem:[%s7865_s1 + $0x508] sm:$0xff]  }
 0x109   : > { %v7273_v50 = vadd.f32 %v5285_v49, %v5221_v46  ;;  %3980 = vmatprep.mubr.bf16.mxu1 %v6403_v45  ;;  %v6439_v46 = vld [vmem:[%s6754_s29 + $0x48] ss:$108 sps:$4 sm:$0xff]  }
 0x10a   : > { %v5222_v51 = vpop.f32.mrb[8].mxu0 }
 0x10b   : > { %v5286_v53 = vpop.f32.mrb[8].mxu1  ;;  %v5223_v54 = vpop.f32.mrb[9].mxu0 }
 0x10c   : > { %v5224_v56 = vadd.f32 %v5223_v54, %v5222_v51  ;;  %v5287_v57 = vpop.f32.mrb[9].mxu1  ;;  %v5225_v58 = vpop.f32.mrb[10].mxu0 }
 0x10d   : > { %v5288_v60 = vadd.f32 %v5287_v57, %v5286_v53  ;;  %v5289_v61 = vpop.f32.mrb[10].mxu1  ;;  %v5226_v62 = vpop.f32.mrb[11].mxu0 }
 0x10e   : > { %v5227_v0 = vadd.f32 %v5226_v62, %v5225_v58  ;;  %v5290_v1 = vpop.f32.mrb[11].mxu1 }
 0x10f   : > { %v7279_v2 = vadd.f32 %v5288_v60, %v5224_v56  ;;  %v5291_v3 = vadd.f32 %v5290_v1, %v5289_v61  ;;  %3884 = vmatmul.mubr.bf16.gmra.mrb[116].mxu0 %v6401_v52  ;;  %v6443_v52 = vld [vmem:[%s6754_s29 + $0x11c] ss:$108 sps:$4 sm:$0xff]   ;;  %v6447_v56 = vld [vmem:[%s6754_s29 + $0x124] ss:$108 sps:$4 sm:$0xff]  }
 0x110   : > { %3981 = vmatmul.mubr.bf16.gmra.mrb[116].mxu1 %v6406_v55  ;;  %3891 = vmatprep.mubr.bf16.mxu0 %v6410_v59  ;;  %v6446_v60 = vld [vmem:[%s7865_s1 + $0x548] sm:$0xff]   ;;  %v6475_v61 = vld [vmem:[%s7865_s1 + $0x580] sm:$0xff]  }
 0x111   : > { %v7284_v5 = vadd.f32 %v5291_v3, %v5227_v0  ;;  %3988 = vmatprep.mubr.bf16.mxu1 %v6415_v63  ;;  %v6477_v0 = vld [vmem:[%s7865_s1 + $0x5c8] sm:$0xff]  }
 0x112   : > { %v5228_v7 = vpop.f32.mrb[12].mxu0 }
 0x113   : > { %v5292_v9 = vpop.f32.mrb[12].mxu1  ;;  %v5229_v10 = vpop.f32.mrb[13].mxu0 }
 0x114   : > { %v5230_v11 = vadd.f32 %v5229_v10, %v5228_v7  ;;  %v5293_v12 = vpop.f32.mrb[13].mxu1  ;;  %v5231_v13 = vpop.f32.mrb[14].mxu0  ;;  %v6445_v7 = vld [vmem:[%s6754_s29 + $0x118] ss:$108 sps:$4 sm:$0xff]   ;;  %v6450_v10 = vld [vmem:[%s6754_s29 + $0x120] ss:$108 sps:$4 sm:$0xff]  }
 0x115   : > { %v5294_v15 = vadd.f32 %v5293_v12, %v5292_v9  ;;  %v5295_v16 = vpop.f32.mrb[14].mxu1  ;;  %v5232_v17 = vpop.f32.mrb[15].mxu0  ;;  %v6480_v12 = vld [vmem:[%s7865_s1 + $0x588] sm:$0xff]  }
 0x116   : > { %v5233_v19 = vadd.f32 %v5232_v17, %v5231_v13  ;;  %v5296_v20 = vpop.f32.mrb[15].mxu1 }
 0x117   : > { %v7290_v21 = vadd.f32 %v5294_v15, %v5230_v11  ;;  %v5297_v22 = vadd.f32 %v5296_v20, %v5295_v16  ;;  %3892 = vmatmul.mubr.bf16.gmra.mrb[120].mxu0 %v6413_v6  ;;  %v6451_v11 = vld [vmem:[%s6754_s29 + $0x1f4] ss:$108 sps:$4 sm:$0xff]   ;;  %v6455_v15 = vld [vmem:[%s6754_s29 + $0x1fc] ss:$108 sps:$4 sm:$0xff]  }
 0x118   : > { %3989 = vmatmul.mubr.bf16.gmra.mrb[120].mxu1 %v6418_v8  ;;  %3899 = vmatprep.mubr.bf16.mxu0 %v6422_v14  ;;  %v6454_v8 = vld [vmem:[%s7865_s1 + $0x550] sm:$0xff]  }
 0x119   : > { %v7292_v23 = vadd.f32 %v5297_v22, %v5233_v19  ;;  %3996 = vmatprep.mubr.bf16.mxu1 %v6427_v18  ;;  %v6487_v16 = vld [vmem:[%s7865_s1 + $0x5d0] sm:$0xff]  }
 0x11a   : > { %v5234_v25 = vpop.f32.mrb[16].mxu0 }
 0x11b   : > { %v5298_v30 = vpop.f32.mrb[16].mxu1  ;;  %v5235_v31 = vpop.f32.mrb[17].mxu0 }
 0x11c   : > { %v5236_v32 = vadd.f32 %v5235_v31, %v5234_v25  ;;  %v5299_v33 = vpop.f32.mrb[17].mxu1  ;;  %v5237_v34 = vpop.f32.mrb[18].mxu0  ;;  %v6457_v25 = vld [vmem:[%s7865_s1 + $0x510] sm:$0xff]  }
 0x11d   : > { %v5300_v36 = vadd.f32 %v5299_v33, %v5298_v30  ;;  %v5301_v37 = vpop.f32.mrb[18].mxu1  ;;  %v5238_v38 = vpop.f32.mrb[19].mxu0  ;;  %v6488_v31 = vld [vmem:[%s7865_s1 + $0x590] sm:$0xff]  }
 0x11e   : > { %v5239_v39 = vadd.f32 %v5238_v38, %v5237_v34  ;;  %v5302_v40 = vpop.f32.mrb[19].mxu1  ;;  %v6489_v34 = vld [vmem:[%s7865_s1 + $0x5d8] sm:$0xff]   ;;  %v6470_v38 = vld [vmem:[%s7865_s1 + $0x560] sm:$0xff]  }
 0x11f   : > { %v7298_v41 = vadd.f32 %v5300_v36, %v5236_v32  ;;  %v5303_v42 = vadd.f32 %v5302_v40, %v5301_v37  ;;  %3900 = vmatmul.mubr.bf16.gmra.mrb[124].mxu0 %v6425_v24  ;;  %v6453_v37 = vld [vmem:[%s6754_s29 + $0x1f0] ss:$108 sps:$4 sm:$0xff]  }
 0x120   : > { %3997 = vmatmul.mubr.bf16.gmra.mrb[124].mxu1 %v6430_v26  ;;  %4037 = vmatprep.mubr.bf16.mxu0 %v6436_v28  ;;  %v6462_v26 = vld [vmem:[%s7865_s1 + $0x558] sm:$0xff]  }
 0x121   : > { %v7300_v43 = vadd.f32 %v5303_v42, %v5239_v39  ;;  %4134 = vmatprep.mubr.bf16.mxu1 %v6441_v35  ;;  %v6465_v35 = vld [vmem:[%s7865_s1 + $0x518] sm:$0xff]  }
 0x122   : > { %v5240_v45 = vpop.f32.mrb[20].mxu0  ;;  %v6492_v39 = vld [vmem:[%s7865_s1 + $0x598] sm:$0xff]  }
 0x123   : > { %v5304_v49 = vpop.f32.mrb[20].mxu1  ;;  %v5241_v51 = vpop.f32.mrb[21].mxu0  ;;  %v6458_v42 = vld [vmem:[%s6754_s29 + $0x1f8] ss:$108 sps:$4 sm:$0xff]  }
 0x124   : > { %v5242_v53 = vadd.f32 %v5241_v51, %v5240_v45  ;;  %v5305_v54 = vpop.f32.mrb[21].mxu1  ;;  %v5243_v55 = vpop.f32.mrb[22].mxu0 }
 0x125   : > { %v5306_v57 = vadd.f32 %v5305_v54, %v5304_v49  ;;  %v5307_v58 = vpop.f32.mrb[22].mxu1  ;;  %v5244_v59 = vpop.f32.mrb[23].mxu0 }
 0x126   : > { %v5245_v62 = vadd.f32 %v5244_v59, %v5243_v55  ;;  %v5308_v63 = vpop.f32.mrb[23].mxu1 }
 0x127   : > { %v7318_v1 = vadd.f32 %v5306_v57, %v5242_v53  ;;  %v5309_v3 = vadd.f32 %v5308_v63, %v5307_v58  ;;  %4038 = vmatmul.mubr.bf16.vlgmr.msra.gmra.mrb[128].mxu0 %v6434_v44  ;;  %v6499_v44 = vld [vmem:[%s7865_s1 + $0x5e0] sm:$0xff]   ;;  %v6482_v58 = vld [vmem:[%s7865_s1 + $0x568] sm:$0xff]  }
 0x128   : > { %5835 = vmatpush3.bf16.msra.mxu0 %v6442_v47  ;;  %4135 = vmatmul.mubr.bf16.vlgmr.msra.gmra.mrb[128].mxu1 %v6439_v46  ;;  %v6474_v57 = vld [vmem:[%s7865_s1 + $0x520] sm:$0xff]  }
 0x129   : > { %v7323_v6 = vadd.f32 %v5309_v3, %v5245_v62  ;;  %4045 = vmatprep.mubr.bf16.mxu0 %v6443_v52  ;;  %5836 = vmatprep.subr.bf16.mxu0 %v6446_v60  ;;  %v6459_v52 = vld [vmem:[%s6754_s29 + $0x2cc] ss:$108 sps:$4 sm:$0xff]  }
 0x12a   : > { %v5246_v9 = vpop.f32.mrb[24].mxu0  ;;  %4142 = vmatprep.mubr.bf16.mxu1 %v6447_v56  ;;  %5899 = vmatpush3.bf16.msra.mxu1 %v6475_v61  ;;  %v6463_v56 = vld [vmem:[%s6754_s29 + $0x2d4] ss:$108 sps:$4 sm:$0xff]  }
 0x12b   : > { %v5310_v13 = vpop.f32.mrb[24].mxu1  ;;  %v5247_v14 = vpop.f32.mrb[25].mxu0  ;;  %5900 = vmatprep.subr.bf16.mxu1 %v6477_v0  ;;  %v6500_v61 = vld [vmem:[%s7865_s1 + $0x5a0] sm:$0xff]   ;;  %v6501_v0 = vld [vmem:[%s7865_s1 + $0x5e8] sm:$0xff]  }
 0x12c   : > { %v5248_v17 = vadd.f32 %v5247_v14, %v5246_v9  ;;  %v5311_v18 = vpop.f32.mrb[25].mxu1  ;;  %v5249_v19 = vpop.f32.mrb[26].mxu0  ;;  %5837 = vmatpush3.bf16.msra.mxu0 %v6449_v4  ;;  %v6461_v4 = vld [vmem:[%s6754_s29 + $0x2c8] ss:$108 sps:$4 sm:$0xff]   ;;  %v6466_v9 = vld [vmem:[%s6754_s29 + $0x2d0] ss:$108 sps:$4 sm:$0xff]  }
 0x12d   : > { %v5312_v20 = vadd.f32 %v5311_v18, %v5310_v13  ;;  %v5313_v22 = vpop.f32.mrb[26].mxu1  ;;  %v5250_v24 = vpop.f32.mrb[27].mxu0  ;;  %5838 = vmatprep.subr.bf16.mxu0 %v6454_v8 }
 0x12e   : > { %v5251_v28 = vadd.f32 %v5250_v24, %v5249_v19  ;;  %v5314_v30 = vpop.f32.mrb[27].mxu1  ;;  %5901 = vmatpush3.bf16.msra.mxu1 %v6480_v12  ;;  %v6504_v12 = vld [vmem:[%s7865_s1 + $0x5a8] sm:$0xff]  }
 0x12f   : > { %v7347_v32 = vadd.f32 %v5312_v20, %v5248_v17  ;;  %v5315_v33 = vadd.f32 %v5314_v30, %v5313_v22  ;;  %4046 = vmatmul.mubr.bf16.gmra.mrb[132].mxu0 %v6445_v7  ;;  %5902 = vmatprep.subr.bf16.mxu1 %v6487_v16  ;;  %v6485_v7 = vld [vmem:[%s7865_s1 + $0x528] sm:$0xff]  }
 0x130   : > { %4143 = vmatmul.mubr.bf16.gmra.mrb[132].mxu1 %v6450_v10  ;;  %4053 = vmatprep.mubr.bf16.mxu0 %v6451_v11  ;;  %v6467_v10 = vld [vmem:[%s6754_s29 + $0x3a4] ss:$108 sps:$4 sm:$0xff]   ;;  %v6472_v19 = vld [vmem:[%s6754_s29 + $0x3ac] ss:$108 sps:$4 sm:$0xff]  }
 0x131   : > { %v7355_v36 = vadd.f32 %v5315_v33, %v5251_v28  ;;  %4150 = vmatprep.mubr.bf16.mxu1 %v6455_v15  ;;  %5839 = vmatpush3.bf16.msra.mxu0 %v6457_v25  ;;  %v6494_v11 = vld [vmem:[%s7865_s1 + $0x570] sm:$0xff]  }
 0x132   : > { %v5252_v40 = vpop.f32.mrb[28].mxu0  ;;  %5840 = vmatprep.subr.bf16.mxu0 %v6462_v26  ;;  %5903 = vmatpush3.bf16.msra.mxu1 %v6488_v31  ;;  %v6511_v15 = vld [vmem:[%s7865_s1 + $0x5f0] sm:$0xff]   ;;  %v6506_v26 = vld [vmem:[%s7865_s1 + $0x578] sm:$0xff]  }
 0x133   : > { %v5316_v45 = vpop.f32.mrb[28].mxu1  ;;  %v5253_v46 = vpop.f32.mrb[29].mxu0  ;;  %5904 = vmatprep.subr.bf16.mxu1 %v6489_v34  ;;  %v6497_v25 = vld [vmem:[%s7865_s1 + $0x530] sm:$0xff]  }
 0x134   : > { %v5254_v47 = vadd.f32 %v5253_v46, %v5252_v40  ;;  %v5317_v49 = vpop.f32.mrb[29].mxu1  ;;  %v5255_v51 = vpop.f32.mrb[30].mxu0  ;;  %v6512_v33 = vld [vmem:[%s7865_s1 + $0x5b0] sm:$0xff]   ;;  %v6518_v46 = vld [vmem:[%s7865_s1 + $0x640] sm:$0xff]  }
 0x135   : > { %v5318_v53 = vadd.f32 %v5317_v49, %v5316_v45  ;;  %v5319_v54 = vpop.f32.mrb[30].mxu1  ;;  %v5256_v55 = vpop.f32.mrb[31].mxu0  ;;  %5841 = vmatpush3.bf16.msra.mxu0 %v6465_v35  ;;  %v6513_v35 = vld [vmem:[%s7865_s1 + $0x5f8] sm:$0xff]  }
 0x136   : > { %v5257_v59 = vadd.f32 %v5256_v55, %v5255_v51  ;;  %v5320_v60 = vpop.f32.mrb[31].mxu1  ;;  %5842 = vmatprep.subr.bf16.mxu0 %v6470_v38  ;;  %5905 = vmatpush3.bf16.msra.mxu1 %v6492_v39  ;;  %v6469_v38 = vld [vmem:[%s6754_s29 + $0x3a0] ss:$108 sps:$4 sm:$0xff]   ;;  %v6509_v39 = vld [vmem:[%s7865_s1 + $0x538] sm:$0xff]  }
 0x137   : > { %v7379_v62 = vadd.f32 %v5318_v53, %v5254_v47  ;;  %v5321_v63 = vadd.f32 %v5320_v60, %v5319_v54  ;;  %4054 = vmatmul.mubr.bf16.gmra.mrb[136].mxu0 %v6453_v37  ;;  %5906 = vmatprep.subr.bf16.mxu1 %v6499_v44  ;;  %v6476_v44 = vld [vmem:[%s6754_s29 + $0x3a8] ss:$108 sps:$4 sm:$0xff]   ;;  %v6483_v54 = vld [vmem:[%s6754_s29 + $0x484] ss:$108 sps:$4 sm:$0xff]  }
 0x138   : > { %4151 = vmatmul.mubr.bf16.gmra.mrb[136].mxu1 %v6458_v42  ;;  %4061 = vmatprep.mubr.bf16.mxu0 %v6459_v52  ;;  %v6478_v45 = vld [vmem:[%s6754_s29 + $0x47c] ss:$108 sps:$4 sm:$0xff]  }
 0x139   : > { %v7384_v3 = vadd.f32 %v5321_v63, %v5257_v59  ;;  %4158 = vmatprep.mubr.bf16.mxu1 %v6463_v56  ;;  %5843 = vmatpush3.bf16.msra.mxu0 %v6474_v57 }
 0x13a   : > { %v5338_v8 = vpop.f32.mrb[32].mxu0  ;;  %5844 = vmatprep.subr.bf16.mxu0 %v6482_v58  ;;  %5907 = vmatpush3.bf16.msra.mxu1 %v6500_v61 }
 0x13b   : > { %v5339_v13 = vpop.f32.mrb[33].mxu0  ;;  %v5402_v14 = vpop.f32.mrb[32].mxu1  ;;  %5908 = vmatprep.subr.bf16.mxu1 %v6501_v0 }
 0x13c   : > { %v5340_v16 = vadd.f32 %v5339_v13, %v5338_v8  ;;  %v5341_v17 = vpop.f32.mrb[34].mxu0  ;;  %v5403_v18 = vpop.f32.mrb[33].mxu1  ;;  %v6481_v8 = vld [vmem:[%s6754_s29 + $0x478] ss:$108 sps:$4 sm:$0xff]  }
 0x13d   : > { %v5342_v20 = vpop.f32.mrb[35].mxu0  ;;  %v5404_v22 = vadd.f32 %v5403_v18, %v5402_v14  ;;  %v5405_v24 = vpop.f32.mrb[34].mxu1  ;;  %5845 = vmatpush3.bf16.msra.mxu0 %v6485_v7  ;;  %v6490_v14 = vld [vmem:[%s6754_s29 + $0x554] ss:$108 sps:$4 sm:$0xff]   ;;  %v6495_v18 = vld [vmem:[%s6754_s29 + $0x55c] ss:$108 sps:$4 sm:$0xff]  }
 0x13e   : > { %v3458_v28 = vadd.f32 %v5340_v16, %v7254_v27  ;;  %v5343_v30 = vadd.f32 %v5342_v20, %v5341_v17  ;;  %v5406_v31 = vpop.f32.mrb[35].mxu1  ;;  %5846 = vmatprep.subr.bf16.mxu0 %v6494_v11  ;;  %5909 = vmatpush3.bf16.msra.mxu1 %v6504_v12  ;;  %v6486_v11 = vld [vmem:[%s6754_s29 + $0x480] ss:$108 sps:$4 sm:$0xff]  }
 0x13f   : > { %v5407_v34 = vadd.f32 %v5406_v31, %v5405_v24  ;;  %4062 = vmatmul.mubr.bf16.gmra.mrb[140].mxu0 %v6461_v4  ;;  %5910 = vmatprep.subr.bf16.mxu1 %v6511_v15 }
 0x140   : > { %v3461_v37 = vadd.f32 %v5343_v30, %v7256_v29  ;;  %v7416_v27 = vadd.f32 %v5404_v22, %v3458_v28  ;;  %4159 = vmatmul.mubr.bf16.gmra.mrb[140].mxu1 %v6466_v9  ;;  %4069 = vmatprep.mubr.bf16.mxu0 %v6467_v10  ;;  %v6517_v29 = vld [vmem:[%s7865_s1 + $0x5b8] sm:$0xff]  }
 0x141   : > { %4166 = vmatprep.mubr.bf16.mxu1 %v6472_v19  ;;  %5847 = vmatpush3.bf16.msra.mxu0 %v6497_v25  ;;  %v6493_v28 = vld [vmem:[%s6754_s29 + $0x550] ss:$108 sps:$4 sm:$0xff]  }
 0x142   : > { %v7422_v40 = vadd.f32 %v5407_v34, %v3461_v37  ;;  %v5344_v42 = vpop.f32.mrb[36].mxu0  ;;  %5848 = vmatprep.subr.bf16.mxu0 %v6506_v26  ;;  %5911 = vmatpush3.bf16.msra.mxu1 %v6512_v33 }
 0x143   : > { %v5345_v47 = vpop.f32.mrb[37].mxu0  ;;  %v5408_v49 = vpop.f32.mrb[36].mxu1  ;;  %5912 = vmatprep.subr.bf16.mxu1 %v6513_v35 }
 0x144   : > { %v5346_v51 = vadd.f32 %v5345_v47, %v5344_v42  ;;  %v5347_v52 = vpop.f32.mrb[38].mxu0  ;;  %v5409_v53 = vpop.f32.mrb[37].mxu1 }
 0x145   : > { %v5348_v55 = vpop.f32.mrb[39].mxu0  ;;  %v5410_v56 = vadd.f32 %v5409_v53, %v5408_v49  ;;  %v5411_v57 = vpop.f32.mrb[38].mxu1  ;;  %5849 = vmatpush3.bf16.msra.mxu0 %v6509_v39  ;;  %v6502_v39 = vld [vmem:[%s6754_s29 + $0x62c] ss:$108 sps:$4 sm:$0xff]   ;;  %v6505_v53 = vld [vmem:[%s6754_s29 + $0x628] ss:$108 sps:$4 sm:$0xff]  }
 0x146   : > { %v3466_v58 = vadd.f32 %v5346_v51, %v7271_v48  ;;  %v5349_v59 = vadd.f32 %v5348_v55, %v5347_v52  ;;  %v5412_v60 = vpop.f32.mrb[39].mxu1  ;;  %5913 = vmatpush3.bf16.msra.mxu1 %v6517_v29  ;;  %5962 = vmatprep.subr.bf16.mxu0 %v6518_v46  ;;  %v7440_v48 = vld [vmem:[%s7865_s1 + $0x680] sm:$0xff]  }
 0x147   : > { %v5413_v61 = vadd.f32 %v5412_v60, %v5411_v57  ;;  %4070 = vmatmul.mubr.bf16.gmra.mrb[144].mxu0 %v6469_v38  ;;  %6042 = vmatprep.subr.bf16.mxu1 %v7440_v48 }
 0x148   : > { %v3469_v63 = vadd.f32 %v5349_v59, %v7273_v50  ;;  %v7435_v0 = vadd.f32 %v5410_v56, %v3466_v58  ;;  %4167 = vmatmul.mubr.bf16.gmra.mrb[144].mxu1 %v6476_v44  ;;  %4077 = vmatprep.mubr.bf16.mxu0 %v6478_v45  ;;  %v6507_v45 = vld [vmem:[%s6754_s29 + $0x634] ss:$108 sps:$4 sm:$0xff]   ;;  %v6510_v56 = vld [vmem:[%s6754_s29 + $0x630] ss:$108 sps:$4 sm:$0xff]  }
 0x149   : > { %4174 = vmatprep.mubr.bf16.mxu1 %v6483_v54  ;;  %v6516_v58 = vld [vmem:[%s6754_s29 + $0x54] ss:$108 sps:$4 sm:$0xff]  }
 0x14a   : > { %v7442_v4 = vadd.f32 %v5413_v61, %v3469_v63  ;;  %v5350_v7 = vpop.f32.mrb[40].mxu0  ;;  %v6521_v63 = vld [vmem:[%s6754_s29 + $0x5c] ss:$108 sps:$4 sm:$0xff]  }
 0x14b   : > { %v5351_v9 = vpop.f32.mrb[41].mxu0  ;;  %v5414_v10 = vpop.f32.mrb[40].mxu1 }
 0x14c   : > { %v5352_v50 = vadd.f32 %v5351_v9, %v5350_v7  ;;  %v5353_v12 = vpop.f32.mrb[42].mxu0  ;;  %v5415_v13 = vpop.f32.mrb[41].mxu1 }
 0x14d   : > { %v5354_v15 = vpop.f32.mrb[43].mxu0  ;;  %v5416_v16 = vadd.f32 %v5415_v13, %v5414_v10  ;;  %v5417_v17 = vpop.f32.mrb[42].mxu1 }
 0x14e   : > { %v3474_v19 = vadd.f32 %v5352_v50, %v7279_v2  ;;  %v5355_v20 = vadd.f32 %v5354_v15, %v5353_v12  ;;  %v5418_v22 = vpop.f32.mrb[43].mxu1  ;;  %v6498_v2 = vld [vmem:[%s6754_s29 + $0x558] ss:$108 sps:$4 sm:$0xff]  }
 0x14f   : > { %v5419_v24 = vadd.f32 %v5418_v22, %v5417_v17  ;;  %4078 = vmatmul.mubr.bf16.gmra.mrb[148].mxu0 %v6481_v8  ;;  %v6519_v17 = vld [vmem:[%s6754_s29 + $0x58] ss:$108 sps:$4 sm:$0xff]  }
 0x150   : > { %v3477_v25 = vadd.f32 %v5355_v20, %v7284_v5  ;;  %v7451_v26 = vadd.f32 %v5416_v16, %v3474_v19  ;;  %4175 = vmatmul.mubr.bf16.gmra.mrb[148].mxu1 %v6486_v11  ;;  %4085 = vmatprep.mubr.bf16.mxu0 %v6490_v14  ;;  %v6514_v16 = vld [vmem:[%s6754_s29 + $0x50] ss:$108 sps:$4 sm:$0xff]   ;;  %v6523_v20 = vld [vmem:[%s6754_s29 + $0x12c] ss:$108 sps:$4 sm:$0xff]  }
 0x151   : > { %4182 = vmatprep.mubr.bf16.mxu1 %v6495_v18 }
 0x152   : > { %v7454_v30 = vadd.f32 %v5419_v24, %v3477_v25  ;;  %v5356_v31 = vpop.f32.mrb[44].mxu0 }
 0x153   : > { %v5357_v33 = vpop.f32.mrb[45].mxu0  ;;  %v5420_v34 = vpop.f32.mrb[44].mxu1 }
 0x154   : > { %v5358_v35 = vadd.f32 %v5357_v33, %v5356_v31  ;;  %v5359_v37 = vpop.f32.mrb[46].mxu0  ;;  %v5421_v38 = vpop.f32.mrb[45].mxu1  ;;  %v6526_v33 = vld [vmem:[%s7865_s1 + $0x648] sm:$0xff]  }
 0x155   : > { %v5360_v42 = vpop.f32.mrb[47].mxu0  ;;  %v5422_v5 = vadd.f32 %v5421_v38, %v5420_v34  ;;  %v5423_v44 = vpop.f32.mrb[46].mxu1 }
 0x156   : > { %v3482_v29 = vadd.f32 %v5358_v35, %v7290_v21  ;;  %v5361_v46 = vadd.f32 %v5360_v42, %v5359_v37  ;;  %v5424_v47 = vpop.f32.mrb[47].mxu1  ;;  %v6527_v37 = vld [vmem:[%s6754_s29 + $0x134] ss:$108 sps:$4 sm:$0xff]  }
 0x157   : > { %v5425_v49 = vadd.f32 %v5424_v47, %v5423_v44  ;;  %4086 = vmatmul.mubr.bf16.gmra.mrb[152].mxu0 %v6493_v28  ;;  %v6525_v44 = vld [vmem:[%s6754_s29 + $0x128] ss:$108 sps:$4 sm:$0xff]   ;;  %v6531_v47 = vld [vmem:[%s6754_s29 + $0x204] ss:$108 sps:$4 sm:$0xff]  }
 0x158   : > { %v3485_v51 = vadd.f32 %v5361_v46, %v7292_v23  ;;  %v7461_v52 = vadd.f32 %v5422_v5, %v3482_v29  ;;  %4183 = vmatmul.mubr.bf16.gmra.mrb[152].mxu1 %v6498_v2  ;;  %4093 = vmatprep.mubr.bf16.mxu0 %v6502_v39  ;;  %v6560_v39 = vld [vmem:[%s7865_s1 + $0x688] sm:$0xff]  }
 0x159   : > { %4190 = vmatprep.mubr.bf16.mxu1 %v6507_v45  ;;  %v6534_v45 = vld [vmem:[%s7865_s1 + $0x650] sm:$0xff]  }
 0x15a   : > { %v7464_v54 = vadd.f32 %v5425_v49, %v3485_v51  ;;  %v5362_v55 = vpop.f32.mrb[48].mxu0 }
 0x15b   : > { %v5363_v57 = vpop.f32.mrb[49].mxu0  ;;  %v5426_v21 = vpop.f32.mrb[48].mxu1 }
 0x15c   : > { %v5364_v59 = vadd.f32 %v5363_v57, %v5362_v55  ;;  %v5365_v60 = vpop.f32.mrb[50].mxu0  ;;  %v5427_v61 = vpop.f32.mrb[49].mxu1 }
 0x15d   : > { %v5366_v7 = vpop.f32.mrb[51].mxu0  ;;  %v5428_v23 = vadd.f32 %v5427_v61, %v5426_v21  ;;  %v5429_v8 = vpop.f32.mrb[50].mxu1  ;;  %v6535_v21 = vld [vmem:[%s6754_s29 + $0x20c] ss:$108 sps:$4 sm:$0xff]  }
 0x15e   : > { %v3490_v9 = vadd.f32 %v5364_v59, %v7298_v41  ;;  %v5367_v10 = vadd.f32 %v5366_v7, %v5365_v60  ;;  %v5430_v11 = vpop.f32.mrb[51].mxu1  ;;  %v6522_v41 = vld [vmem:[%s7865_s1 + $0x600] sm:$0xff]  }
 0x15f   : > { %v5431_v50 = vadd.f32 %v5430_v11, %v5429_v8  ;;  %4094 = vmatmul.mubr.bf16.gmra.mrb[156].mxu0 %v6505_v53  ;;  %v6565_v53 = vld [vmem:[%s7865_s1 + $0x690] sm:$0xff]  }
 0x160   : > { %v3493_v12 = vadd.f32 %v5367_v10, %v7300_v43  ;;  %v7471_v13 = vadd.f32 %v5428_v23, %v3490_v9  ;;  %4191 = vmatmul.mubr.bf16.gmra.mrb[156].mxu1 %v6510_v56  ;;  %4231 = vmatprep.mubr.bf16.mxu0 %v6516_v58  ;;  %v6542_v23 = vld [vmem:[%s7865_s1 + $0x658] sm:$0xff]  }
 0x161   : > { %4328 = vmatprep.mubr.bf16.mxu1 %v6521_v63  ;;  %v6570_v9 = vld [vmem:[%s7865_s1 + $0x698] sm:$0xff]  }
 0x162   : > { %v7473_v14 = vadd.f32 %v5431_v50, %v3493_v12  ;;  %v5368_v15 = vpop.f32.mrb[52].mxu0  ;;  %v6545_v50 = vld [vmem:[%s7865_s1 + $0x618] sm:$0xff]  }
 0x163   : > { %v5369_v18 = vpop.f32.mrb[53].mxu0  ;;  %v5432_v19 = vpop.f32.mrb[52].mxu1 }
 0x164   : > { %v5370_v22 = vadd.f32 %v5369_v18, %v5368_v15  ;;  %v5371_v43 = vpop.f32.mrb[54].mxu0  ;;  %v5433_v24 = vpop.f32.mrb[53].mxu1 }
 0x165   : > { %v5372_v25 = vpop.f32.mrb[55].mxu0  ;;  %v5434_v28 = vadd.f32 %v5433_v24, %v5432_v19  ;;  %v5435_v31 = vpop.f32.mrb[54].mxu1  ;;  %v6543_v24 = vld [vmem:[%s6754_s29 + $0x2e4] ss:$108 sps:$4 sm:$0xff]  }
 0x166   : > { %v3498_v34 = vadd.f32 %v5370_v22, %v7318_v1  ;;  %v5373_v2 = vadd.f32 %v5372_v25, %v5371_v43  ;;  %v5436_v35 = vpop.f32.mrb[55].mxu1  ;;  %v6529_v1 = vld [vmem:[%s7865_s1 + $0x608] sm:$0xff]  }
 0x167   : > { %v5437_v38 = vadd.f32 %v5436_v35, %v5435_v31  ;;  %4232 = vmatmul.mubr.bf16.vlgmr.msra.gmra.mrb[160].mxu0 %v6514_v16  ;;  %v6538_v16 = vld [vmem:[%s6754_s29 + $0x208] ss:$108 sps:$4 sm:$0xff]  }
 0x168   : > { %v3501_v42 = vadd.f32 %v5373_v2, %v7323_v6  ;;  %v7490_v5 = vadd.f32 %v5434_v28, %v3498_v34  ;;  %5963 = vmatpush3.bf16.msra.mxu0 %v6522_v41  ;;  %4329 = vmatmul.mubr.bf16.vlgmr.msra.gmra.mrb[160].mxu1 %v6519_v17  ;;  %v6530_v6 = vld [vmem:[%s6754_s29 + $0x130] ss:$108 sps:$4 sm:$0xff]   ;;  %v6575_v41 = vld [vmem:[%s7865_s1 + $0x6a0] sm:$0xff]  }
 0x169   : > { %4239 = vmatprep.mubr.bf16.mxu0 %v6523_v20  ;;  %5964 = vmatprep.subr.bf16.mxu0 %v6526_v33  ;;  %v6539_v17 = vld [vmem:[%s6754_s29 + $0x2dc] ss:$108 sps:$4 sm:$0xff]   ;;  %v6554_v33 = vld [vmem:[%s7865_s1 + $0x620] sm:$0xff]  }
 0x16a   : > { %v7499_v29 = vadd.f32 %v5437_v38, %v3501_v42  ;;  %v5374_v46 = vpop.f32.mrb[56].mxu0  ;;  %4336 = vmatprep.mubr.bf16.mxu1 %v6527_v37  ;;  %6043 = vmatpush3.bf16.msra.mxu1 %v7440_v48  ;;  %v6537_v48 = vld [vmem:[%s7865_s1 + $0x610] sm:$0xff]   ;;  %v6559_v37 = vld [vmem:[%s7865_s1 + $0x668] sm:$0xff]  }
 0x16b   : > { %v5375_v49 = vpop.f32.mrb[57].mxu0  ;;  %v5438_v51 = vpop.f32.mrb[56].mxu1  ;;  %6044 = vmatprep.subr.bf16.mxu1 %v6560_v39 }
 0x16c   : > { %v5376_v55 = vadd.f32 %v5375_v49, %v5374_v46  ;;  %v5377_v56 = vpop.f32.mrb[58].mxu0  ;;  %v5439_v57 = vpop.f32.mrb[57].mxu1  ;;  %5965 = vmatpush3.bf16.msra.mxu0 %v6529_v1  ;;  %v6585_v49 = vld [vmem:[%s7865_s1 + $0x6b0] sm:$0xff]  }
 0x16d   : > { %v5378_v58 = vpop.f32.mrb[59].mxu0  ;;  %v5440_v59 = vadd.f32 %v5439_v57, %v5438_v51  ;;  %v5441_v60 = vpop.f32.mrb[58].mxu1  ;;  %5966 = vmatprep.subr.bf16.mxu0 %v6534_v45  ;;  %v6547_v57 = vld [vmem:[%s6754_s29 + $0x3b4] ss:$108 sps:$4 sm:$0xff]  }
 0x16e   : > { %v3506_v61 = vadd.f32 %v5376_v55, %v7347_v32  ;;  %v5379_v63 = vadd.f32 %v5378_v58, %v5377_v56  ;;  %v5442_v7 = vpop.f32.mrb[59].mxu1  ;;  %6045 = vmatpush3.bf16.msra.mxu1 %v6560_v39  ;;  %v6533_v32 = vld [vmem:[%s6754_s29 + $0x200] ss:$108 sps:$4 sm:$0xff]  }
 0x16f   : > { %v5443_v8 = vadd.f32 %v5442_v7, %v5441_v60  ;;  %4240 = vmatmul.mubr.bf16.gmra.mrb[164].mxu0 %v6525_v44  ;;  %6046 = vmatprep.subr.bf16.mxu1 %v6565_v53  ;;  %v6580_v39 = vld [vmem:[%s7865_s1 + $0x6a8] sm:$0xff]  }
 0x170   : > { %v3509_v10 = vadd.f32 %v5379_v63, %v7355_v36  ;;  %v7519_v11 = vadd.f32 %v5440_v59, %v3506_v61  ;;  %4337 = vmatmul.mubr.bf16.gmra.mrb[164].mxu1 %v6530_v6  ;;  %4247 = vmatprep.mubr.bf16.mxu0 %v6531_v47  ;;  %v6550_v36 = vld [vmem:[%s7865_s1 + $0x660] sm:$0xff]   ;;  %v6552_v60 = vld [vmem:[%s6754_s29 + $0x3bc] ss:$108 sps:$4 sm:$0xff]  }
 0x171   : > { %4344 = vmatprep.mubr.bf16.mxu1 %v6535_v21  ;;  %5967 = vmatpush3.bf16.msra.mxu0 %v6537_v48  ;;  %v6541_v47 = vld [vmem:[%s6754_s29 + $0x2d8] ss:$108 sps:$4 sm:$0xff]   ;;  %v6546_v56 = vld [vmem:[%s6754_s29 + $0x2e0] ss:$108 sps:$4 sm:$0xff]   ;;  %v6573_v48 = vld [vmem:[%s7865_s1 + $0x630] sm:$0xff]  }
 0x172   : > { %v7525_v12 = vadd.f32 %v5443_v8, %v3509_v10  ;;  %v5380_v15 = vpop.f32.mrb[60].mxu0  ;;  %5968 = vmatprep.subr.bf16.mxu0 %v6542_v23  ;;  %6047 = vmatpush3.bf16.msra.mxu1 %v6565_v53  ;;  %v6579_v23 = vld [vmem:[%s7865_s1 + $0x678] sm:$0xff]  }
 0x173   : > { %v5381_v18 = vpop.f32.mrb[61].mxu0  ;;  %v5444_v19 = vpop.f32.mrb[60].mxu1  ;;  %6048 = vmatprep.subr.bf16.mxu1 %v6570_v9 }
 0x174   : > { %v5382_v20 = vadd.f32 %v5381_v18, %v5380_v15  ;;  %v5383_v22 = vpop.f32.mrb[62].mxu0  ;;  %v5445_v43 = vpop.f32.mrb[61].mxu1 }
 0x175   : > { %v5384_v25 = vpop.f32.mrb[63].mxu0  ;;  %v5446_v28 = vadd.f32 %v5445_v43, %v5444_v19  ;;  %v5447_v31 = vpop.f32.mrb[62].mxu1  ;;  %5969 = vmatpush3.bf16.msra.mxu0 %v6545_v50  ;;  %v6555_v19 = vld [vmem:[%s6754_s29 + $0x3b8] ss:$108 sps:$4 sm:$0xff]  }
 0x176   : > { %v3514_v34 = vadd.f32 %v5382_v20, %v7379_v62  ;;  %v5385_v2 = vadd.f32 %v5384_v25, %v5383_v22  ;;  %v5448_v35 = vpop.f32.mrb[63].mxu1  ;;  %5970 = vmatprep.subr.bf16.mxu0 %v6550_v36  ;;  %6049 = vmatpush3.bf16.msra.mxu1 %v6570_v9  ;;  %v6563_v62 = vld [vmem:[%s7865_s1 + $0x628] sm:$0xff]   ;;  %v6589_v9 = vld [vmem:[%s7865_s1 + $0x6b8] sm:$0xff]   ;;  %v6561_v25 = vld [vmem:[%s6754_s29 + $0x494] ss:$108 sps:$4 sm:$0xff]  }
 0x177   : > { %v5449_v38 = vadd.f32 %v5448_v35, %v5447_v31  ;;  %4248 = vmatmul.mubr.bf16.gmra.mrb[168].mxu0 %v6533_v32  ;;  %6050 = vmatprep.subr.bf16.mxu1 %v6575_v41  ;;  %v6556_v20 = vld [vmem:[%s6754_s29 + $0x48c] ss:$108 sps:$4 sm:$0xff]  }
 0x178   : > { %v3517_v42 = vadd.f32 %v5385_v2, %v7384_v3  ;;  %v7547_v1 = vadd.f32 %v5446_v28, %v3514_v34  ;;  %4345 = vmatmul.mubr.bf16.gmra.mrb[168].mxu1 %v6538_v16  ;;  %4255 = vmatprep.mubr.bf16.mxu0 %v6539_v17  ;;  %v6569_v3 = vld [vmem:[%s7865_s1 + $0x670] sm:$0xff]  }
 0x179   : > { %4352 = vmatprep.mubr.bf16.mxu1 %v6543_v24  ;;  %5971 = vmatpush3.bf16.msra.mxu0 %v6554_v33  ;;  %v6549_v17 = vld [vmem:[%s6754_s29 + $0x3b0] ss:$108 sps:$4 sm:$0xff]  }
 0x17a   : > { %v7552_v44 = vadd.f32 %v5449_v38, %v3517_v42  ;;  %v5466_v45 = vpop.f32.mrb[64].mxu0  ;;  %5972 = vmatprep.subr.bf16.mxu0 %v6559_v37  ;;  %6051 = vmatpush3.bf16.msra.mxu1 %v6575_v41  ;;  %v6558_v42 = vld [vmem:[%s6754_s29 + $0x488] ss:$108 sps:$4 sm:$0xff]  }
 0x17b   : > { %v5467_v46 = vpop.f32.mrb[65].mxu0  ;;  %v5530_v6 = vpop.f32.mrb[64].mxu1  ;;  %6052 = vmatprep.subr.bf16.mxu1 %v6580_v39 }
 0x17c   : > { %v5468_v51 = vadd.f32 %v5467_v46, %v5466_v45  ;;  %v5469_v53 = vpop.f32.mrb[66].mxu0  ;;  %v5531_v55 = vpop.f32.mrb[65].mxu1  ;;  %v6564_v46 = vld [vmem:[%s6754_s29 + $0x490] ss:$108 sps:$4 sm:$0xff]  }
 0x17d   : > { %v5470_v21 = vpop.f32.mrb[67].mxu0  ;;  %v5532_v58 = vadd.f32 %v5531_v55, %v5530_v6  ;;  %v5533_v59 = vpop.f32.mrb[66].mxu1  ;;  %5973 = vmatpush3.bf16.msra.mxu0 %v6563_v62  ;;  %v6566_v6 = vld [vmem:[%s6754_s29 + $0x564] ss:$108 sps:$4 sm:$0xff]  }
 0x17e   : > { %v3652_v61 = vadd.f32 %v5468_v51, %v7416_v27  ;;  %v5471_v63 = vadd.f32 %v5470_v21, %v5469_v53  ;;  %v5534_v7 = vpop.f32.mrb[67].mxu1  ;;  %5974 = vmatprep.subr.bf16.mxu0 %v6569_v3  ;;  %6053 = vmatpush3.bf16.msra.mxu1 %v6580_v39  ;;  %v6583_v27 = vld [vmem:[%s7865_s1 + $0x638] sm:$0xff]  }
 0x17f   : > { %v5535_v8 = vadd.f32 %v5534_v7, %v5533_v59  ;;  %4256 = vmatmul.mubr.bf16.gmra.mrb[172].mxu0 %v6541_v47  ;;  %6054 = vmatprep.subr.bf16.mxu1 %v6585_v49  ;;  %v6571_v51 = vld [vmem:[%s6754_s29 + $0x56c] ss:$108 sps:$4 sm:$0xff]  }
 0x180   : > { %v3655_v10 = vadd.f32 %v5471_v63, %v7422_v40  ;;  %v7575_v32 = vadd.f32 %v5532_v58, %v3652_v61  ;;  %4353 = vmatmul.mubr.bf16.gmra.mrb[172].mxu1 %v6546_v56  ;;  %4263 = vmatprep.mubr.bf16.mxu0 %v6547_v57 }
 0x181   : > { %4360 = vmatprep.mubr.bf16.mxu1 %v6552_v60  ;;  %5975 = vmatpush3.bf16.msra.mxu0 %v6573_v48 }
 0x182   : > { %v7580_v50 = vadd.f32 %v5535_v8, %v3655_v10  ;;  %v5472_v15 = vpop.f32.mrb[68].mxu0  ;;  %5976 = vmatprep.subr.bf16.mxu0 %v6579_v23  ;;  %6055 = vmatpush3.bf16.msra.mxu1 %v6585_v49  ;;  %v6574_v8 = vld [vmem:[%s6754_s29 + $0x568] ss:$108 sps:$4 sm:$0xff]  }
 0x183   : > { %v5473_v16 = vpop.f32.mrb[69].mxu0  ;;  %v5536_v40 = vpop.f32.mrb[68].mxu1  ;;  %6056 = vmatprep.subr.bf16.mxu1 %v6589_v9 }
 0x184   : > { %v5474_v36 = vadd.f32 %v5473_v16, %v5472_v15  ;;  %v5475_v41 = vpop.f32.mrb[70].mxu0  ;;  %v5537_v18 = vpop.f32.mrb[69].mxu1  ;;  %v6581_v15 = vld [vmem:[%s6754_s29 + $0x644] ss:$108 sps:$4 sm:$0xff]  }
 0x185   : > { %v5476_v22 = vpop.f32.mrb[71].mxu0  ;;  %v5538_v43 = vadd.f32 %v5537_v18, %v5536_v40  ;;  %v5539_v24 = vpop.f32.mrb[70].mxu1  ;;  %5977 = vmatpush3.bf16.msra.mxu0 %v6583_v27 }
 0x186   : > { %v3660_v28 = vadd.f32 %v5474_v36, %v7435_v0  ;;  %v5477_v31 = vadd.f32 %v5476_v22, %v5475_v41  ;;  %v5540_v33 = vpop.f32.mrb[71].mxu1  ;;  %6057 = vmatpush3.bf16.msra.mxu1 %v6589_v9  ;;  %v6576_v9 = vld [vmem:[%s6754_s29 + $0x63c] ss:$108 sps:$4 sm:$0xff]  }
 0x187   : > { %v5541_v34 = vadd.f32 %v5540_v33, %v5539_v24  ;;  %4264 = vmatmul.mubr.bf16.gmra.mrb[176].mxu0 %v6549_v17  ;;  %v6588_v33 = vld [vmem:[%s6754_s29 + $0x64] ss:$108 sps:$4 sm:$0xff]  }
 0x188   : > { %v3663_v2 = vadd.f32 %v5477_v31, %v7442_v4  ;;  %v7588_v35 = vadd.f32 %v5538_v43, %v3660_v28  ;;  %4361 = vmatmul.mubr.bf16.gmra.mrb[176].mxu1 %v6555_v19  ;;  %4271 = vmatprep.mubr.bf16.mxu0 %v6556_v20  ;;  %v6584_v31 = vld [vmem:[%s6754_s29 + $0x640] ss:$108 sps:$4 sm:$0xff]  }
 0x189   : > { %4368 = vmatprep.mubr.bf16.mxu1 %v6561_v25 }
 0x18a   : > { %v7590_v37 = vadd.f32 %v5541_v34, %v3663_v2  ;;  %v5478_v38 = vpop.f32.mrb[72].mxu0 }
 0x18b   : > { %v5479_v39 = vpop.f32.mrb[73].mxu0  ;;  %v5542_v0 = vpop.f32.mrb[72].mxu1 }
 0x18c   : > { %v5480_v62 = vadd.f32 %v5479_v39, %v5478_v38  ;;  %v5481_v45 = vpop.f32.mrb[74].mxu0  ;;  %v5543_v3 = vpop.f32.mrb[73].mxu1  ;;  %v6590_v38 = vld [vmem:[%s6754_s29 + $0x68] ss:$108 sps:$4 sm:$0xff]  }
 0x18d   : > { %v5482_v47 = vpop.f32.mrb[75].mxu0  ;;  %v5544_v49 = vadd.f32 %v5543_v3, %v5542_v0  ;;  %v5545_v4 = vpop.f32.mrb[74].mxu1 }
 0x18e   : > { %v3668_v53 = vadd.f32 %v5480_v62, %v7451_v26  ;;  %v5483_v55 = vadd.f32 %v5482_v47, %v5481_v45  ;;  %v5546_v56 = vpop.f32.mrb[75].mxu1  ;;  %v6568_v26 = vld [vmem:[%s6754_s29 + $0x560] ss:$108 sps:$4 sm:$0xff]  }
 0x18f   : > { %v5547_v57 = vadd.f32 %v5546_v56, %v5545_v4  ;;  %4272 = vmatmul.mubr.bf16.gmra.mrb[180].mxu0 %v6558_v42  ;;  %v6592_v56 = vld [vmem:[%s6754_s29 + $0x13c] ss:$108 sps:$4 sm:$0xff]  }
 0x190   : > { %v3671_v21 = vadd.f32 %v5483_v55, %v7454_v30  ;;  %v7598_v58 = vadd.f32 %v5544_v49, %v3668_v53  ;;  %4369 = vmatmul.mubr.bf16.gmra.mrb[180].mxu1 %v6564_v46  ;;  %4279 = vmatprep.mubr.bf16.mxu0 %v6566_v6  ;;  %v6591_v55 = vld [vmem:[%s6754_s29 + $0x140] ss:$108 sps:$4 sm:$0xff]  }
 0x191   : > { %4376 = vmatprep.mubr.bf16.mxu1 %v6571_v51 }
 0x192   : > { %v7600_v59 = vadd.f32 %v5547_v57, %v3671_v21  ;;  %v5484_v60 = vpop.f32.mrb[76].mxu0 }
 0x193   : > { %v5485_v48 = vpop.f32.mrb[77].mxu0  ;;  %v5548_v61 = vpop.f32.mrb[76].mxu1 }
 0x194   : > { %v5486_v63 = vadd.f32 %v5485_v48, %v5484_v60  ;;  %v5487_v7 = vpop.f32.mrb[78].mxu0  ;;  %v5549_v23 = vpop.f32.mrb[77].mxu1  ;;  %v6598_v60 = vld [vmem:[%s6754_s29 + $0x218] ss:$108 sps:$4 sm:$0xff]  }
 0x195   : > { %v5488_v10 = vpop.f32.mrb[79].mxu0  ;;  %v5550_v27 = vadd.f32 %v5549_v23, %v5548_v61  ;;  %v5551_v30 = vpop.f32.mrb[78].mxu1 }
 0x196   : > { %v3676_v16 = vadd.f32 %v5486_v63, %v7461_v52  ;;  %v5489_v40 = vadd.f32 %v5488_v10, %v5487_v7  ;;  %v5552_v17 = vpop.f32.mrb[79].mxu1  ;;  %v6578_v52 = vld [vmem:[%s6754_s29 + $0x638] ss:$108 sps:$4 sm:$0xff]  }
 0x197   : > { %v5553_v36 = vadd.f32 %v5552_v17, %v5551_v30  ;;  %4280 = vmatmul.mubr.bf16.gmra.mrb[184].mxu0 %v6568_v26  ;;  %v6599_v17 = vld [vmem:[%s6754_s29 + $0x2f0] ss:$108 sps:$4 sm:$0xff]  }
 0x198   : > { %v3679_v41 = vadd.f32 %v5489_v40, %v7464_v54  ;;  %v7608_v18 = vadd.f32 %v5550_v27, %v3676_v16  ;;  %4377 = vmatmul.mubr.bf16.gmra.mrb[184].mxu1 %v6574_v8  ;;  %4287 = vmatprep.mubr.bf16.mxu0 %v6576_v9  ;;  %v6595_v40 = vld [vmem:[%s6754_s29 + $0x214] ss:$108 sps:$4 sm:$0xff]  }
 0x199   : > { %4384 = vmatprep.mubr.bf16.mxu1 %v6581_v15 }
 0x19a   : > { %v7610_v19 = vadd.f32 %v5553_v36, %v3679_v41  ;;  %v5490_v20 = vpop.f32.mrb[80].mxu0 }
 0x19b   : > { %v5491_v22 = vpop.f32.mrb[81].mxu0  ;;  %v5554_v43 = vpop.f32.mrb[80].mxu1 }
 0x19c   : > { %v5492_v24 = vadd.f32 %v5491_v22, %v5490_v20  ;;  %v5493_v25 = vpop.f32.mrb[82].mxu0  ;;  %v5555_v28 = vpop.f32.mrb[81].mxu1  ;;  %v6606_v20 = vld [vmem:[%s6754_s29 + $0x3c8] ss:$108 sps:$4 sm:$0xff]  }
 0x19d   : > { %v5494_v34 = vpop.f32.mrb[83].mxu0  ;;  %v5556_v2 = vadd.f32 %v5555_v28, %v5554_v43  ;;  %v5557_v54 = vpop.f32.mrb[82].mxu1 }
 0x19e   : > { %v3684_v39 = vadd.f32 %v5492_v24, %v7471_v13  ;;  %v5495_v0 = vadd.f32 %v5494_v34, %v5493_v25  ;;  %v5558_v42 = vpop.f32.mrb[83].mxu1  ;;  %v6586_v13 = vld [vmem:[%s6754_s29 + $0x60] ss:$108 sps:$4 sm:$0xff]  }
 0x19f   : > { %v5559_v62 = vadd.f32 %v5558_v42, %v5557_v54  ;;  %4288 = vmatmul.mubr.bf16.gmra.mrb[188].mxu0 %v6578_v52  ;;  %v6607_v42 = vld [vmem:[%s6754_s29 + $0x4a0] ss:$108 sps:$4 sm:$0xff]  }
 0x1a0   : > { %v3687_v45 = vadd.f32 %v5495_v0, %v7473_v14  ;;  %v7618_v3 = vadd.f32 %v5556_v2, %v3684_v39  ;;  %4385 = vmatmul.mubr.bf16.gmra.mrb[188].mxu1 %v6584_v31  ;;  %4425 = vmatprep.mubr.bf16.mxu0 %v6588_v33  ;;  %v6600_v0 = vld [vmem:[%s6754_s29 + $0x2ec] ss:$108 sps:$4 sm:$0xff]  }
 0x1a1   : > { %6058 = vmatprep.mubr.bf16.mxu1 %v6590_v38 }
 0x1a2   : > { %v7620_v46 = vadd.f32 %v5559_v62, %v3687_v45  ;;  %v5496_v6 = vpop.f32.mrb[84].mxu0 }
 0x1a3   : > { %v5497_v47 = vpop.f32.mrb[85].mxu0  ;;  %v5560_v49 = vpop.f32.mrb[84].mxu1 }
 0x1a4   : > { %v5498_v4 = vadd.f32 %v5497_v47, %v5496_v6  ;;  %v5499_v51 = vpop.f32.mrb[86].mxu0  ;;  %v5561_v53 = vpop.f32.mrb[85].mxu1  ;;  %v6614_v6 = vld [vmem:[%s6754_s29 + $0x578] ss:$108 sps:$4 sm:$0xff]  }
 0x1a5   : > { %v5500_v57 = vpop.f32.mrb[87].mxu0  ;;  %v5562_v21 = vadd.f32 %v5561_v53, %v5560_v49  ;;  %v5563_v14 = vpop.f32.mrb[86].mxu1 }
 0x1a6   : > { %v3692_v48 = vadd.f32 %v5498_v4, %v7490_v5  ;;  %v5501_v61 = vadd.f32 %v5500_v57, %v5499_v51  ;;  %v5564_v26 = vpop.f32.mrb[87].mxu1  ;;  %v6594_v5 = vld [vmem:[%s6754_s29 + $0x138] ss:$108 sps:$4 sm:$0xff]  }
 0x1a7   : > { %v5565_v63 = vadd.f32 %v5564_v26, %v5563_v14  ;;  %4426 = vmatmul.mubr.bf16.vlgmr.msra.gmra.mrb[192].mxu0 %v6586_v13  ;;  %v6602_v14 = vld [vmem:[%s6754_s29 + $0x2e8] ss:$108 sps:$4 sm:$0xff]   ;;  %v6615_v26 = vld [vmem:[%s6754_s29 + $0x650] ss:$108 sps:$4 sm:$0xff]  }
 0x1a8   : > { %v3695_v7 = vadd.f32 %v5501_v61, %v7499_v29  ;;  %v7628_v23 = vadd.f32 %v5562_v21, %v3692_v48  ;;  %6059 = vmatmul.mubr.bf16.vlgmr.msra.gmra.mrb[192].mxu1 %v6591_v55  ;;  %4433 = vmatprep.mubr.bf16.mxu0 %v6592_v56  ;;  %v6603_v61 = vld [vmem:[%s6754_s29 + $0x3c4] ss:$108 sps:$4 sm:$0xff]  }
 0x1a9   : > { %6062 = vmatprep.mubr.bf16.mxu1 %v6598_v60 }
 0x1aa   : > { %v7630_v8 = vadd.f32 %v5565_v63, %v3695_v7  ;;  %v5502_v9 = vpop.f32.mrb[88].mxu0 }
 0x1ab   : > { %v5503_v10 = vpop.f32.mrb[89].mxu0  ;;  %v5566_v27 = vpop.f32.mrb[88].mxu1 }
 0x1ac   : > { %v5504_v30 = vadd.f32 %v5503_v10, %v5502_v9  ;;  %v5505_v15 = vpop.f32.mrb[90].mxu0  ;;  %v5567_v16 = vpop.f32.mrb[89].mxu1 }
 0x1ad   : > { %v5506_v36 = vpop.f32.mrb[91].mxu0  ;;  %v5568_v41 = vadd.f32 %v5567_v16, %v5566_v27  ;;  %v5569_v29 = vpop.f32.mrb[90].mxu1 }
 0x1ae   : > { %v3700_v22 = vadd.f32 %v5504_v30, %v7519_v11  ;;  %v5507_v43 = vadd.f32 %v5506_v36, %v5505_v15  ;;  %v5570_v52 = vpop.f32.mrb[91].mxu1  ;;  %v6597_v11 = vld [vmem:[%s6754_s29 + $0x210] ss:$108 sps:$4 sm:$0xff]  }
 0x1af   : > { %v5571_v24 = vadd.f32 %v5570_v52, %v5569_v29  ;;  %4434 = vmatmul.mubr.bf16.gmra.mrb[196].mxu0 %v6594_v5 }
 0x1b0   : > { %v3703_v25 = vadd.f32 %v5507_v43, %v7525_v12  ;;  %v7638_v28 = vadd.f32 %v5568_v41, %v3700_v22  ;;  %4441 = vmatprep.mubr.bf16.mxu0 %v6595_v40  ;;  %6063 = vmatmul.mubr.bf16.gmra.mrb[196].mxu1 %v6599_v17  ;;  %v6605_v41 = vld [vmem:[%s6754_s29 + $0x3c0] ss:$108 sps:$4 sm:$0xff]   ;;  %v6608_v22 = vld [vmem:[%s6754_s29 + $0x49c] ss:$108 sps:$4 sm:$0xff]  }
 0x1b1   : > { %6066 = vmatprep.mubr.bf16.mxu1 %v6606_v20 }
 0x1b2   : > { %v7640_v31 = vadd.f32 %v5571_v24, %v3703_v25  ;;  %v5508_v33 = vpop.f32.mrb[92].mxu0 }
 0x1b3   : > { %v5509_v34 = vpop.f32.mrb[93].mxu0  ;;  %v5572_v2 = vpop.f32.mrb[92].mxu1 }
 0x1b4   : > { %v5510_v54 = vadd.f32 %v5509_v34, %v5508_v33  ;;  %v5511_v38 = vpop.f32.mrb[94].mxu0  ;;  %v5573_v39 = vpop.f32.mrb[93].mxu1 }
 0x1b5   : > { %v5512_v62 = vpop.f32.mrb[95].mxu0  ;;  %v5574_v45 = vadd.f32 %v5573_v39, %v5572_v2  ;;  %v5575_v12 = vpop.f32.mrb[94].mxu1 }
 0x1b6   : > { %v3708_v47 = vadd.f32 %v5510_v54, %v7547_v1  ;;  %v5513_v49 = vadd.f32 %v5512_v62, %v5511_v38  ;;  %v5576_v13 = vpop.f32.mrb[95].mxu1 }
 0x1b7   : > { %v5577_v4 = vadd.f32 %v5576_v13, %v5575_v12  ;;  %4442 = vmatmul.mubr.bf16.gmra.mrb[200].mxu0 %v6597_v11 }
 0x1b8   : > { %v3711_v51 = vadd.f32 %v5513_v49, %v7552_v44  ;;  %v7648_v53 = vadd.f32 %v5574_v45, %v3708_v47  ;;  %4449 = vmatprep.mubr.bf16.mxu0 %v6600_v0  ;;  %6067 = vmatmul.mubr.bf16.gmra.mrb[200].mxu1 %v6607_v42  ;;  %v6610_v42 = vld [vmem:[%s6754_s29 + $0x498] ss:$108 sps:$4 sm:$0xff]  }
 0x1b9   : > { %6070 = vmatprep.mubr.bf16.mxu1 %v6614_v6 }
 0x1ba   : > { %v7650_v55 = vadd.f32 %v5577_v4, %v3711_v51  ;;  %v5594_v56 = vpop.f32.mrb[96].mxu0 }
 0x1bb   : > { %v5595_v57 = vpop.f32.mrb[97].mxu0  ;;  %v5658_v21 = vpop.f32.mrb[96].mxu1 }
 0x1bc   : > { %v5596_v1 = vadd.f32 %v5595_v57, %v5594_v56  ;;  %v5597_v60 = vpop.f32.mrb[98].mxu0  ;;  %v5659_v48 = vpop.f32.mrb[97].mxu1 }
 0x1bd   : > { %v5598_v63 = vpop.f32.mrb[99].mxu0  ;;  %v5660_v7 = vadd.f32 %v5659_v48, %v5658_v21  ;;  %v5661_v44 = vpop.f32.mrb[98].mxu1  ;;  %v6613_v48 = vld [vmem:[%s6754_s29 + $0x570] ss:$108 sps:$4 sm:$0xff]  }
 0x1be   : > { %v3846_v9 = vadd.f32 %v5596_v1, %v7575_v32  ;;  %v5599_v10 = vadd.f32 %v5598_v63, %v5597_v60  ;;  %v5662_v27 = vpop.f32.mrb[99].mxu1 }
 0x1bf   : > { %v5663_v5 = vadd.f32 %v5662_v27, %v5661_v44  ;;  %4450 = vmatmul.mubr.bf16.gmra.mrb[204].mxu0 %v6602_v14 }
 0x1c0   : > { %v3849_v30 = vadd.f32 %v5599_v10, %v7580_v50  ;;  %v7657_v15 = vadd.f32 %v5660_v7, %v3846_v9  ;;  %4457 = vmatprep.mubr.bf16.mxu0 %v6603_v61  ;;  %6071 = vmatmul.mubr.bf16.gmra.mrb[204].mxu1 %v6615_v26 }
 0x1c2   : > { %v7659_v16 = vadd.f32 %v5663_v5, %v3849_v30  ;;  %v5600_v40 = vpop.f32.mrb[100].mxu0 }
 0x1c3   : > { %v5601_v17 = vpop.f32.mrb[101].mxu0  ;;  %v5664_v36 = vpop.f32.mrb[100].mxu1 }
 0x1c4   : > { %v5602_v29 = vadd.f32 %v5601_v17, %v5600_v40  ;;  %v5603_v20 = vpop.f32.mrb[102].mxu0  ;;  %v5665_v32 = vpop.f32.mrb[101].mxu1 }
 0x1c5   : > { %v5604_v43 = vpop.f32.mrb[103].mxu0  ;;  %v5666_v52 = vadd.f32 %v5665_v32, %v5664_v36  ;;  %v5667_v24 = vpop.f32.mrb[102].mxu1 }
 0x1c6   : > { %v3854_v50 = vadd.f32 %v5602_v29, %v7588_v35  ;;  %v5605_v25 = vadd.f32 %v5604_v43, %v5603_v20  ;;  %v5668_v33 = vpop.f32.mrb[103].mxu1  ;;  %v6611_v35 = vld [vmem:[%s6754_s29 + $0x574] ss:$108 sps:$4 sm:$0xff]  }
 0x1c7   : > { %v5669_v34 = vadd.f32 %v5668_v33, %v5667_v24  ;;  %4458 = vmatmul.mubr.bf16.gmra.mrb[208].mxu0 %v6605_v41  ;;  %v6618_v20 = vld [vmem:[%s6754_s29 + $0x648] ss:$108 sps:$4 sm:$0xff]  }
 0x1c8   : > { %v3857_v2 = vadd.f32 %v5605_v25, %v7590_v37  ;;  %v7665_v11 = vadd.f32 %v5666_v52, %v3854_v50  ;;  %4465 = vmatprep.mubr.bf16.mxu0 %v6608_v22 }
 0x1ca   : > { %v7667_v54 = vadd.f32 %v5669_v34, %v3857_v2  ;;  %v5606_v38 = vpop.f32.mrb[104].mxu0 }
 0x1cb   : > { %v5607_v39 = vpop.f32.mrb[105].mxu0  ;;  %v5670_v0 = vpop.f32.mrb[104].mxu1 }
 0x1cc   : > { %v5608_v62 = vadd.f32 %v5607_v39, %v5606_v38  ;;  %v5609_v45 = vpop.f32.mrb[106].mxu0  ;;  %v5671_v12 = vpop.f32.mrb[105].mxu1 }
 0x1cd   : > { %v5610_v6 = vpop.f32.mrb[107].mxu0  ;;  %v5672_v47 = vadd.f32 %v5671_v12, %v5670_v0  ;;  %v5673_v49 = vpop.f32.mrb[106].mxu1 }
 0x1ce   : > { %v3862_v13 = vadd.f32 %v5608_v62, %v7598_v58  ;;  %v5611_v37 = vadd.f32 %v5610_v6, %v5609_v45  ;;  %v5674_v4 = vpop.f32.mrb[107].mxu1  ;;  %v6616_v58 = vld [vmem:[%s6754_s29 + $0x64c] ss:$108 sps:$4 sm:$0xff]   ;;  %s4758_s29 = sshll.u32 %s7869_s19, 3  ;;  %s4759_s19 = sshll.u32 %s7871_s13, 1 }
 0x1cf   : > { %v5675_v51 = vadd.f32 %v5674_v4, %v5673_v49  ;;  %4466 = vmatmul.mubr.bf16.gmra.mrb[212].mxu0 %v6610_v42  ;;  %s7811_s9 = scalar_lea.vmem %s7866_s2, %s4758_s29  ;;  %s187_s14 = scalar_lea.vmem %s7867_s3, %s4759_s19 }
 0x1d0   : > { %v3865_v56 = vadd.f32 %v5611_v37, %v7600_v59  ;;  %v7673_v57 = vadd.f32 %v5672_v47, %v3862_v13  ;;  %4473 = vmatprep.mubr.bf16.mxu0 %v6611_v35 }
 0x1d2   : > { %v7675_v21 = vadd.f32 %v5675_v51, %v3865_v56  ;;  %v5612_v14 = vpop.f32.mrb[108].mxu0 }
 0x1d3   : > { %v5613_v1 = vpop.f32.mrb[109].mxu0  ;;  %v5676_v60 = vpop.f32.mrb[108].mxu1 }
 0x1d4   : > { %v5614_v61 = vadd.f32 %v5613_v1, %v5612_v14  ;;  %v5615_v26 = vpop.f32.mrb[110].mxu0  ;;  %v5677_v63 = vpop.f32.mrb[109].mxu1 }
 0x1d5   : > { %v5616_v7 = vpop.f32.mrb[111].mxu0  ;;  %v5678_v44 = vadd.f32 %v5677_v63, %v5676_v60  ;;  %v5679_v9 = vpop.f32.mrb[110].mxu1 }
 0x1d6   : > { %v3870_v10 = vadd.f32 %v5614_v61, %v7608_v18  ;;  %v5617_v59 = vadd.f32 %v5616_v7, %v5615_v26  ;;  %v5680_v27 = vpop.f32.mrb[111].mxu1 }
 0x1d7   : > { %v5681_v5 = vadd.f32 %v5680_v27, %v5679_v9  ;;  %4474 = vmatmul.mubr.bf16.gmra.mrb[216].mxu0 %v6613_v48 }
 0x1d8   : > { %v3873_v30 = vadd.f32 %v5617_v59, %v7610_v19  ;;  %v7681_v40 = vadd.f32 %v5678_v44, %v3870_v10  ;;  %4481 = vmatprep.mubr.bf16.mxu0 %v6616_v58 }
 0x1da   : > { %v7683_v17 = vadd.f32 %v5681_v5, %v3873_v30  ;;  %v5618_v36 = vpop.f32.mrb[112].mxu0 }
 0x1db   : > { %v5619_v41 = vpop.f32.mrb[113].mxu0  ;;  %v5682_v29 = vpop.f32.mrb[112].mxu1 }
 0x1dc   : > { %v5620_v32 = vadd.f32 %v5619_v41, %v5618_v36  ;;  %v5621_v22 = vpop.f32.mrb[114].mxu0  ;;  %v5683_v43 = vpop.f32.mrb[113].mxu1 }
 0x1dd   : > { %v5622_v52 = vpop.f32.mrb[115].mxu0  ;;  %v5684_v18 = vadd.f32 %v5683_v43, %v5682_v29  ;;  %v5685_v24 = vpop.f32.mrb[114].mxu1 }
 0x1de   : > { %v3878_v50 = vadd.f32 %v5620_v32, %v7618_v3  ;;  %v5623_v25 = vadd.f32 %v5622_v52, %v5621_v22  ;;  %v5686_v33 = vpop.f32.mrb[115].mxu1 }
 0x1df   : > { %v5687_v19 = vadd.f32 %v5686_v33, %v5685_v24  ;;  %4482 = vmatmul.mubr.bf16.gmra.mrb[220].mxu0 %v6618_v20 }
 0x1e0   : > { %v3881_v34 = vadd.f32 %v5623_v25, %v7620_v46  ;;  %v7688_v2 = vadd.f32 %v5684_v18, %v3878_v50 }
 0x1e2   : > { %v7690_v38 = vadd.f32 %v5687_v19, %v3881_v34  ;;  %v5624_v39 = vpop.f32.mrb[116].mxu0 }
 0x1e3   : > { %v5625_v0 = vpop.f32.mrb[117].mxu0  ;;  %v5688_v42 = vpop.f32.mrb[116].mxu1 }
 0x1e4   : > { %v5626_v62 = vadd.f32 %v5625_v0, %v5624_v39  ;;  %v5627_v45 = vpop.f32.mrb[118].mxu0  ;;  %v5689_v12 = vpop.f32.mrb[117].mxu1 }
 0x1e5   : > { %v5628_v35 = vpop.f32.mrb[119].mxu0  ;;  %v5690_v6 = vadd.f32 %v5689_v12, %v5688_v42  ;;  %v5691_v47 = vpop.f32.mrb[118].mxu1 }
 0x1e6   : > { %v3886_v3 = vadd.f32 %v5626_v62, %v7628_v23  ;;  %v5629_v49 = vadd.f32 %v5628_v35, %v5627_v45  ;;  %v5692_v13 = vpop.f32.mrb[119].mxu1 }
 0x1e7   : > { %v5693_v37 = vadd.f32 %v5692_v13, %v5691_v47 }
 0x1e8   : > { %v3889_v46 = vadd.f32 %v5629_v49, %v7630_v8  ;;  %v7694_v4 = vadd.f32 %v5690_v6, %v3886_v3 }
 0x1ea   : > { %v7696_v51 = vadd.f32 %v5693_v37, %v3889_v46  ;;  %v5630_v56 = vpop.f32.mrb[120].mxu0 }
 0x1eb   : > { %v5631_v14 = vpop.f32.mrb[121].mxu0  ;;  %v5694_v1 = vpop.f32.mrb[120].mxu1 }
 0x1ec   : > { %v5632_v60 = vadd.f32 %v5631_v14, %v5630_v56  ;;  %v5633_v48 = vpop.f32.mrb[122].mxu0  ;;  %v5695_v61 = vpop.f32.mrb[121].mxu1 }
 0x1ed   : > { %v5634_v26 = vpop.f32.mrb[123].mxu0  ;;  %v5696_v63 = vadd.f32 %v5695_v61, %v5694_v1  ;;  %v5697_v58 = vpop.f32.mrb[122].mxu1 }
 0x1ee   : > { %v3894_v23 = vadd.f32 %v5632_v60, %v7638_v28  ;;  %v5635_v7 = vadd.f32 %v5634_v26, %v5633_v48  ;;  %v5698_v44 = vpop.f32.mrb[123].mxu1 }
 0x1ef   : > { %v5699_v9 = vadd.f32 %v5698_v44, %v5697_v58 }
 0x1f0   : > { %v3897_v8 = vadd.f32 %v5635_v7, %v7640_v31  ;;  %v7700_v10 = vadd.f32 %v5696_v63, %v3894_v23 }
 0x1f2   : > { %v7702_v59 = vadd.f32 %v5699_v9, %v3897_v8  ;;  %v5636_v27 = vpop.f32.mrb[124].mxu0 }
 0x1f3   : > { %v5637_v5 = vpop.f32.mrb[125].mxu0  ;;  %v5700_v30 = vpop.f32.mrb[124].mxu1 }
 0x1f4   : > { %v5638_v36 = vadd.f32 %v5637_v5, %v5636_v27  ;;  %v5639_v41 = vpop.f32.mrb[126].mxu0  ;;  %v5701_v29 = vpop.f32.mrb[125].mxu1 }
 0x1f5   : > { %v5640_v20 = vpop.f32.mrb[127].mxu0  ;;  %v5702_v32 = vadd.f32 %v5701_v29, %v5700_v30  ;;  %v5703_v22 = vpop.f32.mrb[126].mxu1 }
 0x1f6   : > { %v3902_v28 = vadd.f32 %v5638_v36, %v7648_v53  ;;  %v5641_v43 = vadd.f32 %v5640_v20, %v5639_v41  ;;  %v5704_v52 = vpop.f32.mrb[127].mxu1 }
 0x1f7   : > { %v5705_v18 = vadd.f32 %v5704_v52, %v5703_v22 }
 0x1f8   : > { %v3905_v31 = vadd.f32 %v5641_v43, %v7650_v55  ;;  %v7706_v24 = vadd.f32 %v5702_v32, %v3902_v28 }
 0x1fa   : > { %v7708_v50 = vadd.f32 %v5705_v18, %v3905_v31  ;;  %v5722_v25 = vpop.f32.mrb[128].mxu0 }
 0x1fb   : > { %v5723_v33 = vpop.f32.mrb[129].mxu0  ;;  %v5786_v19 = vpop.f32.mrb[128].mxu1 }
 0x1fc   : > { %v5724_v34 = vadd.f32 %v5723_v33, %v5722_v25  ;;  %v5725_v39 = vpop.f32.mrb[130].mxu0  ;;  %v5787_v0 = vpop.f32.mrb[129].mxu1 }
 0x1fd   : > { %v5726_v42 = vpop.f32.mrb[131].mxu0  ;;  %v5788_v62 = vadd.f32 %v5787_v0, %v5786_v19  ;;  %v5789_v45 = vpop.f32.mrb[130].mxu1 }
 0x1fe   : > { %v4040_v53 = vadd.f32 %v5724_v34, %v7657_v15  ;;  %v5727_v12 = vadd.f32 %v5726_v42, %v5725_v39  ;;  %v5790_v35 = vpop.f32.mrb[131].mxu1 }
 0x1ff   : > { %v5791_v6 = vadd.f32 %v5790_v35, %v5789_v45 }
 0x200   : > { %v4043_v55 = vadd.f32 %v5727_v12, %v7659_v16  ;;  %v7712_v47 = vadd.f32 %v5788_v62, %v4040_v53 }
 0x202   : > { %v7714_v3 = vadd.f32 %v5791_v6, %v4043_v55  ;;  %v5728_v49 = vpop.f32.mrb[132].mxu0 }
 0x203   : > { %v5729_v13 = vpop.f32.mrb[133].mxu0  ;;  %v5792_v37 = vpop.f32.mrb[132].mxu1 }
 0x204   : > { %v5730_v46 = vadd.f32 %v5729_v13, %v5728_v49  ;;  %v5731_v56 = vpop.f32.mrb[134].mxu0  ;;  %v5793_v14 = vpop.f32.mrb[133].mxu1 }
 0x205   : > { %v5732_v1 = vpop.f32.mrb[135].mxu0  ;;  %v5794_v60 = vadd.f32 %v5793_v14, %v5792_v37  ;;  %v5795_v48 = vpop.f32.mrb[134].mxu1 }
 0x206   : > { %v4048_v15 = vadd.f32 %v5730_v46, %v7665_v11  ;;  %v5733_v61 = vadd.f32 %v5732_v1, %v5731_v56  ;;  %v5796_v26 = vpop.f32.mrb[135].mxu1 }
 0x207   : > { %v5797_v63 = vadd.f32 %v5796_v26, %v5795_v48 }
 0x208   : > { %v4051_v16 = vadd.f32 %v5733_v61, %v7667_v54  ;;  %v7718_v58 = vadd.f32 %v5794_v60, %v4048_v15 }
 0x20a   : > { %v7720_v23 = vadd.f32 %v5797_v63, %v4051_v16  ;;  %v5734_v7 = vpop.f32.mrb[136].mxu0 }
 0x20b   : > { %v5735_v44 = vpop.f32.mrb[137].mxu0  ;;  %v5798_v9 = vpop.f32.mrb[136].mxu1 }
 0x20c   : > { %v5736_v8 = vadd.f32 %v5735_v44, %v5734_v7  ;;  %v5737_v27 = vpop.f32.mrb[138].mxu0  ;;  %v5799_v5 = vpop.f32.mrb[137].mxu1 }
 0x20d   : > { %v5738_v30 = vpop.f32.mrb[139].mxu0  ;;  %v5800_v36 = vadd.f32 %v5799_v5, %v5798_v9  ;;  %v5801_v41 = vpop.f32.mrb[138].mxu1 }
 0x20e   : > { %v4056_v11 = vadd.f32 %v5736_v8, %v7673_v57  ;;  %v5739_v29 = vadd.f32 %v5738_v30, %v5737_v27  ;;  %v5802_v20 = vpop.f32.mrb[139].mxu1 }
 0x20f   : > { %v5803_v32 = vadd.f32 %v5802_v20, %v5801_v41 }
 0x210   : > { %v4059_v54 = vadd.f32 %v5739_v29, %v7675_v21  ;;  %v7724_v22 = vadd.f32 %v5800_v36, %v4056_v11 }
 0x212   : > { %v7726_v28 = vadd.f32 %v5803_v32, %v4059_v54  ;;  %v5740_v43 = vpop.f32.mrb[140].mxu0 }
 0x213   : > { %v5741_v52 = vpop.f32.mrb[141].mxu0  ;;  %v5804_v18 = vpop.f32.mrb[140].mxu1 }
 0x214   : > { %v5742_v31 = vadd.f32 %v5741_v52, %v5740_v43  ;;  %v5743_v25 = vpop.f32.mrb[142].mxu0  ;;  %v5805_v33 = vpop.f32.mrb[141].mxu1 }
 0x215   : > { %v5744_v19 = vpop.f32.mrb[143].mxu0  ;;  %v5806_v34 = vadd.f32 %v5805_v33, %v5804_v18  ;;  %v5807_v39 = vpop.f32.mrb[142].mxu1 }
 0x216   : > { %v4064_v57 = vadd.f32 %v5742_v31, %v7681_v40  ;;  %v5745_v0 = vadd.f32 %v5744_v19, %v5743_v25  ;;  %v5808_v42 = vpop.f32.mrb[143].mxu1 }
 0x217   : > { %v5809_v62 = vadd.f32 %v5808_v42, %v5807_v39 }
 0x218   : > { %v4067_v21 = vadd.f32 %v5745_v0, %v7683_v17  ;;  %v7730_v45 = vadd.f32 %v5806_v34, %v4064_v57 }
 0x21a   : > { %v7732_v53 = vadd.f32 %v5809_v62, %v4067_v21  ;;  %v5746_v12 = vpop.f32.mrb[144].mxu0 }
 0x21b   : > { %v5747_v35 = vpop.f32.mrb[145].mxu0  ;;  %v5810_v6 = vpop.f32.mrb[144].mxu1 }
 0x21c   : > { %v5748_v55 = vadd.f32 %v5747_v35, %v5746_v12  ;;  %v5749_v49 = vpop.f32.mrb[146].mxu0  ;;  %v5811_v13 = vpop.f32.mrb[145].mxu1 }
 0x21d   : > { %v5750_v37 = vpop.f32.mrb[147].mxu0  ;;  %v5812_v46 = vadd.f32 %v5811_v13, %v5810_v6  ;;  %v5813_v56 = vpop.f32.mrb[146].mxu1 }
 0x21e   : > { %v4072_v40 = vadd.f32 %v5748_v55, %v7688_v2  ;;  %v5751_v14 = vadd.f32 %v5750_v37, %v5749_v49  ;;  %v5814_v1 = vpop.f32.mrb[147].mxu1 }
 0x21f   : > { %v5815_v60 = vadd.f32 %v5814_v1, %v5813_v56 }
 0x220   : > { %v4075_v17 = vadd.f32 %v5751_v14, %v7690_v38  ;;  %v7736_v48 = vadd.f32 %v5812_v46, %v4072_v40 }
 0x222   : > { %v7738_v15 = vadd.f32 %v5815_v60, %v4075_v17  ;;  %v5752_v61 = vpop.f32.mrb[148].mxu0 }
 0x223   : > { %v5753_v26 = vpop.f32.mrb[149].mxu0  ;;  %v5816_v63 = vpop.f32.mrb[148].mxu1 }
 0x224   : > { %v5754_v16 = vadd.f32 %v5753_v26, %v5752_v61  ;;  %v5755_v7 = vpop.f32.mrb[150].mxu0  ;;  %v5817_v44 = vpop.f32.mrb[149].mxu1 }
 0x225   : > { %v5756_v9 = vpop.f32.mrb[151].mxu0  ;;  %v5818_v8 = vadd.f32 %v5817_v44, %v5816_v63  ;;  %v5819_v27 = vpop.f32.mrb[150].mxu1 }
 0x226   : > { %v4080_v2 = vadd.f32 %v5754_v16, %v7694_v4  ;;  %v5757_v5 = vadd.f32 %v5756_v9, %v5755_v7  ;;  %v5820_v30 = vpop.f32.mrb[151].mxu1 }
 0x227   : > { %v5821_v36 = vadd.f32 %v5820_v30, %v5819_v27 }
 0x228   : > { %v4083_v38 = vadd.f32 %v5757_v5, %v7696_v51  ;;  %v7742_v41 = vadd.f32 %v5818_v8, %v4080_v2 }
 0x22a   : > { %v7744_v11 = vadd.f32 %v5821_v36, %v4083_v38  ;;  %v5758_v29 = vpop.f32.mrb[152].mxu0 }
 0x22b   : > { %v5759_v20 = vpop.f32.mrb[153].mxu0  ;;  %v5822_v32 = vpop.f32.mrb[152].mxu1 }
 0x22c   : > { %v5760_v54 = vadd.f32 %v5759_v20, %v5758_v29  ;;  %v5761_v43 = vpop.f32.mrb[154].mxu0  ;;  %v5823_v52 = vpop.f32.mrb[153].mxu1 }
 0x22d   : > { %v5762_v18 = vpop.f32.mrb[155].mxu0  ;;  %v5824_v31 = vadd.f32 %v5823_v52, %v5822_v32  ;;  %v5825_v25 = vpop.f32.mrb[154].mxu1 }
 0x22e   : > { %v4088_v4 = vadd.f32 %v5760_v54, %v7700_v10  ;;  %v5763_v33 = vadd.f32 %v5762_v18, %v5761_v43  ;;  %v5826_v19 = vpop.f32.mrb[155].mxu1 }
 0x22f   : > { %v5827_v34 = vadd.f32 %v5826_v19, %v5825_v25 }
 0x230   : > { %v4091_v51 = vadd.f32 %v5763_v33, %v7702_v59  ;;  %v7748_v39 = vadd.f32 %v5824_v31, %v4088_v4 }
 0x232   : > { %v7750_v57 = vadd.f32 %v5827_v34, %v4091_v51  ;;  %v5764_v0 = vpop.f32.mrb[156].mxu0 }
 0x233   : > { %v5765_v42 = vpop.f32.mrb[157].mxu0  ;;  %v5828_v62 = vpop.f32.mrb[156].mxu1 }
 0x234   : > { %v5766_v21 = vadd.f32 %v5765_v42, %v5764_v0  ;;  %v5767_v12 = vpop.f32.mrb[158].mxu0  ;;  %v5829_v35 = vpop.f32.mrb[157].mxu1 }
 0x235   : > { %v5768_v6 = vpop.f32.mrb[159].mxu0  ;;  %v5830_v55 = vadd.f32 %v5829_v35, %v5828_v62  ;;  %v5831_v49 = vpop.f32.mrb[158].mxu1 }
 0x236   : > { %v4096_v10 = vadd.f32 %v5766_v21, %v7706_v24  ;;  %v5769_v13 = vadd.f32 %v5768_v6, %v5767_v12  ;;  %v5832_v37 = vpop.f32.mrb[159].mxu1 }
 0x237   : > { %v5833_v46 = vadd.f32 %v5832_v37, %v5831_v49 }
 0x238   : > { %v4099_v59 = vadd.f32 %v5769_v13, %v7708_v50  ;;  %v7754_v56 = vadd.f32 %v5830_v55, %v4096_v10 }
 0x23a   : > { %v7756_v40 = vadd.f32 %v5833_v46, %v4099_v59  ;;  %v5850_v14 = vpop.f32.mrb[160].mxu0 }
 0x23b   : > { %v5851_v1 = vpop.f32.mrb[161].mxu0  ;;  %v5914_v60 = vpop.f32.mrb[160].mxu1 }
 0x23c   : > { %v5852_v17 = vadd.f32 %v5851_v1, %v5850_v14  ;;  %v5853_v61 = vpop.f32.mrb[162].mxu0  ;;  %v5915_v26 = vpop.f32.mrb[161].mxu1 }
 0x23d   : > { %v5854_v63 = vpop.f32.mrb[163].mxu0  ;;  %v5916_v16 = vadd.f32 %v5915_v26, %v5914_v60  ;;  %v5917_v7 = vpop.f32.mrb[162].mxu1 }
 0x23e   : > { %v4234_v24 = vadd.f32 %v5852_v17, %v7712_v47  ;;  %v5855_v44 = vadd.f32 %v5854_v63, %v5853_v61  ;;  %v5918_v9 = vpop.f32.mrb[163].mxu1 }
 0x23f   : > { %v5919_v8 = vadd.f32 %v5918_v9, %v5917_v7 }
 0x240   : > { %v4237_v50 = vadd.f32 %v5855_v44, %v7714_v3  ;;  %v7760_v27 = vadd.f32 %v5916_v16, %v4234_v24 }
 0x242   : > { %v7762_v2 = vadd.f32 %v5919_v8, %v4237_v50  ;;  %v5856_v5 = vpop.f32.mrb[164].mxu0 }
 0x243   : > { %v5857_v30 = vpop.f32.mrb[165].mxu0  ;;  %v5920_v36 = vpop.f32.mrb[164].mxu1 }
 0x244   : > { %v5858_v38 = vadd.f32 %v5857_v30, %v5856_v5  ;;  %v5859_v29 = vpop.f32.mrb[166].mxu0  ;;  %v5921_v20 = vpop.f32.mrb[165].mxu1 }
 0x245   : > { %v5860_v32 = vpop.f32.mrb[167].mxu0  ;;  %v5922_v54 = vadd.f32 %v5921_v20, %v5920_v36  ;;  %v5923_v43 = vpop.f32.mrb[166].mxu1 }
 0x246   : > { %v4242_v47 = vadd.f32 %v5858_v38, %v7718_v58  ;;  %v5861_v52 = vadd.f32 %v5860_v32, %v5859_v29  ;;  %v5924_v18 = vpop.f32.mrb[167].mxu1 }
 0x247   : > { %v5925_v31 = vadd.f32 %v5924_v18, %v5923_v43 }
 0x248   : > { %v4245_v3 = vadd.f32 %v5861_v52, %v7720_v23  ;;  %v7766_v25 = vadd.f32 %v5922_v54, %v4242_v47 }
 0x24a   : > { %v7768_v4 = vadd.f32 %v5925_v31, %v4245_v3  ;;  %v5862_v33 = vpop.f32.mrb[168].mxu0 }
 0x24b   : > { %v5863_v19 = vpop.f32.mrb[169].mxu0  ;;  %v5926_v34 = vpop.f32.mrb[168].mxu1 }
 0x24c   : > { %v5864_v51 = vadd.f32 %v5863_v19, %v5862_v33  ;;  %v5865_v0 = vpop.f32.mrb[170].mxu0  ;;  %v5927_v42 = vpop.f32.mrb[169].mxu1 }
 0x24d   : > { %v5866_v62 = vpop.f32.mrb[171].mxu0  ;;  %v5928_v21 = vadd.f32 %v5927_v42, %v5926_v34  ;;  %v5929_v12 = vpop.f32.mrb[170].mxu1 }
 0x24e   : > { %v4250_v58 = vadd.f32 %v5864_v51, %v7724_v22  ;;  %v5867_v35 = vadd.f32 %v5866_v62, %v5865_v0  ;;  %v5930_v6 = vpop.f32.mrb[171].mxu1 }
 0x24f   : > { %v5931_v55 = vadd.f32 %v5930_v6, %v5929_v12 }
 0x250   : > { %v4253_v23 = vadd.f32 %v5867_v35, %v7726_v28  ;;  %v7772_v49 = vadd.f32 %v5928_v21, %v4250_v58 }
 0x252   : > { %v7774_v10 = vadd.f32 %v5931_v55, %v4253_v23  ;;  %v5868_v13 = vpop.f32.mrb[172].mxu0 }
 0x253   : > { %v5869_v37 = vpop.f32.mrb[173].mxu0  ;;  %v5932_v46 = vpop.f32.mrb[172].mxu1 }
 0x254   : > { %v5870_v59 = vadd.f32 %v5869_v37, %v5868_v13  ;;  %v5871_v14 = vpop.f32.mrb[174].mxu0  ;;  %v5933_v1 = vpop.f32.mrb[173].mxu1 }
 0x255   : > { %v5872_v60 = vpop.f32.mrb[175].mxu0  ;;  %v5934_v17 = vadd.f32 %v5933_v1, %v5932_v46  ;;  %v5935_v61 = vpop.f32.mrb[174].mxu1 }
 0x256   : > { %v4258_v22 = vadd.f32 %v5870_v59, %v7730_v45  ;;  %v5873_v26 = vadd.f32 %v5872_v60, %v5871_v14  ;;  %v5936_v63 = vpop.f32.mrb[175].mxu1 }
 0x257   : > { %v5937_v16 = vadd.f32 %v5936_v63, %v5935_v61 }
 0x258   : > { %v4261_v28 = vadd.f32 %v5873_v26, %v7732_v53  ;;  %v7778_v7 = vadd.f32 %v5934_v17, %v4258_v22 }
 0x25a   : > { %v7780_v24 = vadd.f32 %v5937_v16, %v4261_v28  ;;  %v5874_v44 = vpop.f32.mrb[176].mxu0 }
 0x25b   : > { %v5875_v9 = vpop.f32.mrb[177].mxu0  ;;  %v5938_v8 = vpop.f32.mrb[176].mxu1 }
 0x25c   : > { %v5876_v50 = vadd.f32 %v5875_v9, %v5874_v44  ;;  %v5877_v5 = vpop.f32.mrb[178].mxu0  ;;  %v5939_v30 = vpop.f32.mrb[177].mxu1 }
 0x25d   : > { %v5878_v36 = vpop.f32.mrb[179].mxu0  ;;  %v5940_v38 = vadd.f32 %v5939_v30, %v5938_v8  ;;  %v5941_v29 = vpop.f32.mrb[178].mxu1 }
 0x25e   : > { %v4266_v45 = vadd.f32 %v5876_v50, %v7736_v48  ;;  %v5879_v20 = vadd.f32 %v5878_v36, %v5877_v5  ;;  %v5942_v32 = vpop.f32.mrb[179].mxu1 }
 0x25f   : > { %v5943_v54 = vadd.f32 %v5942_v32, %v5941_v29 }
 0x260   : > { %v4269_v53 = vadd.f32 %v5879_v20, %v7738_v15  ;;  %v7784_v43 = vadd.f32 %v5940_v38, %v4266_v45 }
 0x262   : > { %v7786_v47 = vadd.f32 %v5943_v54, %v4269_v53  ;;  %v5880_v52 = vpop.f32.mrb[180].mxu0 }
 0x263   : > { %v5881_v18 = vpop.f32.mrb[181].mxu0  ;;  %v5944_v31 = vpop.f32.mrb[180].mxu1 }
 0x264   : > { %v5882_v3 = vadd.f32 %v5881_v18, %v5880_v52  ;;  %v5883_v33 = vpop.f32.mrb[182].mxu0  ;;  %v5945_v19 = vpop.f32.mrb[181].mxu1 }
 0x265   : > { %v5884_v34 = vpop.f32.mrb[183].mxu0  ;;  %v5946_v51 = vadd.f32 %v5945_v19, %v5944_v31  ;;  %v5947_v0 = vpop.f32.mrb[182].mxu1 }
 0x266   : > { %v4274_v48 = vadd.f32 %v5882_v3, %v7742_v41  ;;  %v5885_v42 = vadd.f32 %v5884_v34, %v5883_v33  ;;  %v5948_v62 = vpop.f32.mrb[183].mxu1 }
 0x267   : > { %v5949_v21 = vadd.f32 %v5948_v62, %v5947_v0 }
 0x268   : > { %v4277_v15 = vadd.f32 %v5885_v42, %v7744_v11  ;;  %v7790_v12 = vadd.f32 %v5946_v51, %v4274_v48 }
 0x26a   : > { %v7792_v58 = vadd.f32 %v5949_v21, %v4277_v15  ;;  %v5886_v35 = vpop.f32.mrb[184].mxu0 }
 0x26b   : > { %v5887_v6 = vpop.f32.mrb[185].mxu0  ;;  %v5950_v55 = vpop.f32.mrb[184].mxu1 }
 0x26c   : > { %v5888_v23 = vadd.f32 %v5887_v6, %v5886_v35  ;;  %v5889_v13 = vpop.f32.mrb[186].mxu0  ;;  %v5951_v37 = vpop.f32.mrb[185].mxu1 }
 0x26d   : > { %v5890_v46 = vpop.f32.mrb[187].mxu0  ;;  %v5952_v59 = vadd.f32 %v5951_v37, %v5950_v55  ;;  %v5953_v14 = vpop.f32.mrb[186].mxu1 }
 0x26e   : > { %v4282_v41 = vadd.f32 %v5888_v23, %v7748_v39  ;;  %v5891_v1 = vadd.f32 %v5890_v46, %v5889_v13  ;;  %v5954_v60 = vpop.f32.mrb[187].mxu1 }
 0x26f   : > { %v5955_v17 = vadd.f32 %v5954_v60, %v5953_v14 }
 0x270   : > { %v4285_v11 = vadd.f32 %v5891_v1, %v7750_v57  ;;  %v7796_v61 = vadd.f32 %v5952_v59, %v4282_v41 }
 0x272   : > { %v7798_v22 = vadd.f32 %v5955_v17, %v4285_v11  ;;  %v5892_v26 = vpop.f32.mrb[188].mxu0 }
 0x273   : > { %v5893_v63 = vpop.f32.mrb[189].mxu0  ;;  %v5956_v16 = vpop.f32.mrb[188].mxu1 }
 0x274   : > { %v5894_v28 = vadd.f32 %v5893_v63, %v5892_v26  ;;  %v5895_v44 = vpop.f32.mrb[190].mxu0  ;;  %v5957_v9 = vpop.f32.mrb[189].mxu1 }
 0x275   : > { %v5896_v8 = vpop.f32.mrb[191].mxu0  ;;  %v5958_v50 = vadd.f32 %v5957_v9, %v5956_v16  ;;  %v5959_v5 = vpop.f32.mrb[190].mxu1 }
 0x276   : > { %v4290_v39 = vadd.f32 %v5894_v28, %v7754_v56  ;;  %v5897_v30 = vadd.f32 %v5896_v8, %v5895_v44  ;;  %v5960_v36 = vpop.f32.mrb[191].mxu1 }
 0x277   : > { %v5961_v38 = vadd.f32 %v5960_v36, %v5959_v5 }
 0x278   : > { %v4293_v57 = vadd.f32 %v5897_v30, %v7756_v40  ;;  %v7802_v29 = vadd.f32 %v5958_v50, %v4290_v39 }
 0x27a   : > { %v7804_v45 = vadd.f32 %v5961_v38, %v4293_v57  ;;  %v5978_v20 = vpop.f32.mrb[192].mxu0 }
 0x27b   : > { %v5979_v32 = vpop.f32.mrb[193].mxu0  ;;  %v6060_v54 = vpop.f32.mrb[192].mxu1 }
 0x27c   : > { %v5980_v53 = vadd.f32 %v5979_v32, %v5978_v20  ;;  %v5981_v52 = vpop.f32.mrb[194].mxu0  ;;  %v4524_v18 = vpop.f32.mrb[193].mxu1 }
 0x27d   : > { %v5982_v31 = vpop.f32.mrb[195].mxu0  ;;  %v6061_v3 = vpop.f32.mrb[194].mxu1 }
 0x27e   : > { %v5983_v33 = vadd.f32 %v5982_v31, %v5981_v52  ;;  %v4428_v56 = vadd.f32 %v5980_v53, %v7760_v27  ;;  %v4527_v19 = vpop.f32.mrb[195].mxu1 }
 0x280   : > { %v4525_v40 = vadd.f32 %v4524_v18, %v4428_v56  ;;  %v4431_v34 = vadd.f32 %v5983_v33, %v7762_v2 }
 0x282   : > { %4587 = vst [vmem:[%s7811_s9] sm:$0xff] %v4525_v40  ;;  %v4528_v51 = vadd.f32 %v4527_v19, %v4431_v34  ;;  %v5984_v0 = vpop.f32.mrb[196].mxu0  ;;  %v4625_v62 = vmul.f32 %v4525_v40, %v4525_v40 }
 0x283   : > { %v5985_v48 = vpop.f32.mrb[197].mxu0  ;;  %v6064_v42 = vpop.f32.mrb[196].mxu1 }
 0x284   : > { %4588 = vst [vmem:[%s7811_s9 + $0x8] sm:$0xff] %v4528_v51  ;;  %v4603_v27 = vadd.f32 %v4528_v51, %v4525_v40  ;;  %v4626_v21 = vmul.f32 %v4528_v51, %v4528_v51  ;;  %v5986_v15 = vadd.f32 %v5985_v48, %v5984_v0  ;;  %v5987_v35 = vpop.f32.mrb[198].mxu0  ;;  %v4540_v6 = vpop.f32.mrb[197].mxu1 }
 0x285   : > { %v5988_v55 = vpop.f32.mrb[199].mxu0  ;;  %v6065_v23 = vpop.f32.mrb[198].mxu1 }
 0x286   : > { %v4641_v13 = vadd.f32 %v4626_v21, %v4625_v62  ;;  %v4436_v37 = vadd.f32 %v5986_v15, %v7766_v25  ;;  %v5989_v2 = vadd.f32 %v5988_v55, %v5987_v35  ;;  %v4543_v46 = vpop.f32.mrb[199].mxu1 }
 0x288   : > { %v4533_v59 = vadd.f32 %v6060_v54, %v4436_v37  ;;  %v4439_v14 = vadd.f32 %v5989_v2, %v7768_v4 }
 0x28a   : > { %4589 = vst [vmem:[%s7811_s9 + $0x10] sm:$0xff] %v4533_v59  ;;  %v4627_v41 = vmul.f32 %v4533_v59, %v4533_v59  ;;  %v4536_v1 = vadd.f32 %v6061_v3, %v4439_v14  ;;  %v5990_v60 = vpop.f32.mrb[200].mxu0  ;;  %v4604_v17 = vadd.f32 %v4603_v27, %v4533_v59 }
 0x28b   : > { %v5991_v11 = vpop.f32.mrb[201].mxu0  ;;  %v7819_v26 = vpop.f32.mrb[200].mxu1 }
 0x28c   : > { %4590 = vst [vmem:[%s7811_s9 + $0x18] sm:$0xff] %v4536_v1  ;;  %v4628_v63 = vmul.f32 %v4536_v1, %v4536_v1  ;;  %v5992_v16 = vadd.f32 %v5991_v11, %v5990_v60  ;;  %v5993_v28 = vpop.f32.mrb[202].mxu0  ;;  %v4605_v44 = vadd.f32 %v4604_v17, %v4536_v1  ;;  %v4642_v25 = vadd.f32 %v4641_v13, %v4627_v41  ;;  %v4556_v9 = vpop.f32.mrb[201].mxu1 }
 0x28d   : > { %v5994_v8 = vpop.f32.mrb[203].mxu0  ;;  %v7822_v50 = vpop.f32.mrb[202].mxu1 }
 0x28e   : > { %v5995_v4 = vadd.f32 %v5994_v8, %v5993_v28  ;;  %v4444_v5 = vadd.f32 %v5992_v16, %v7772_v49  ;;  %v4643_v39 = vadd.f32 %v4642_v25, %v4628_v63  ;;  %v4559_v30 = vpop.f32.mrb[203].mxu1 }
 0x290   : > { %v4541_v36 = vadd.f32 %v4540_v6, %v4444_v5  ;;  %v4447_v38 = vadd.f32 %v5995_v4, %v7774_v10 }
 0x292   : > { %4591 = vst [vmem:[%s7811_s9 + $0x20] sm:$0xff] %v4541_v36  ;;  %v4606_v57 = vadd.f32 %v4605_v44, %v4541_v36  ;;  %v4629_v20 = vmul.f32 %v4541_v36, %v4541_v36  ;;  %v4544_v32 = vadd.f32 %v4543_v46, %v4447_v38  ;;  %v5996_v54 = vpop.f32.mrb[204].mxu0 }
 0x293   : > { %v5997_v53 = vpop.f32.mrb[205].mxu0  ;;  %v7827_v52 = vpop.f32.mrb[204].mxu1 }
 0x294   : > { %v4644_v18 = vadd.f32 %v4643_v39, %v4629_v20  ;;  %4592 = vst [vmem:[%s7811_s9 + $0x28] sm:$0xff] %v4544_v32  ;;  %v4607_v31 = vadd.f32 %v4606_v57, %v4544_v32  ;;  %v4630_v3 = vmul.f32 %v4544_v32, %v4544_v32  ;;  %v5998_v33 = vadd.f32 %v5997_v53, %v5996_v54  ;;  %v5999_v49 = vpop.f32.mrb[206].mxu0  ;;  %v4572_v56 = vpop.f32.mrb[205].mxu1 }
 0x295   : > { %v6000_v19 = vpop.f32.mrb[207].mxu0  ;;  %v7830_v40 = vpop.f32.mrb[206].mxu1 }
 0x296   : > { %v4645_v10 = vadd.f32 %v4644_v18, %v4630_v3  ;;  %v4452_v34 = vadd.f32 %v5998_v33, %v7778_v7  ;;  %v6001_v51 = vadd.f32 %v6000_v19, %v5999_v49  ;;  %v4575_v0 = vpop.f32.mrb[207].mxu1 }
 0x298   : > { %v4549_v48 = vadd.f32 %v6064_v42, %v4452_v34  ;;  %v4455_v62 = vadd.f32 %v6001_v51, %v7780_v24 }
 0x29a   : > { %4593 = vst [vmem:[%s7811_s9 + $0x30] sm:$0xff] %v4549_v48  ;;  %v4631_v27 = vmul.f32 %v4549_v48, %v4549_v48  ;;  %v4552_v21 = vadd.f32 %v6065_v23, %v4455_v62  ;;  %v6002_v15 = vpop.f32.mrb[208].mxu0  ;;  %v4608_v35 = vadd.f32 %v4607_v31, %v4549_v48 }
 0x29b   : > { %v6003_v6 = vpop.f32.mrb[209].mxu0 }
 0x29c   : > { %4594 = vst [vmem:[%s7811_s9 + $0x38] sm:$0xff] %v4552_v21  ;;  %v4632_v55 = vmul.f32 %v4552_v21, %v4552_v21  ;;  %v6004_v13 = vadd.f32 %v6003_v6, %v6002_v15  ;;  %v6005_v37 = vpop.f32.mrb[210].mxu0  ;;  %v4609_v2 = vadd.f32 %v4608_v35, %v4552_v21  ;;  %v4646_v46 = vadd.f32 %v4645_v10, %v4631_v27 }
 0x29d   : > { %v6006_v7 = vpop.f32.mrb[211].mxu0 }
 0x29e   : > { %v6007_v59 = vadd.f32 %v6006_v7, %v6005_v37  ;;  %v4460_v42 = vadd.f32 %v6004_v13, %v7784_v43  ;;  %v4647_v14 = vadd.f32 %v4646_v46, %v4632_v55 }
 0x2a0   : > { %v4557_v24 = vadd.f32 %v4556_v9, %v4460_v42  ;;  %v4463_v41 = vadd.f32 %v6007_v59, %v7786_v47 }
 0x2a2   : > { %4595 = vst [vmem:[%s7811_s9 + $0x40] sm:$0xff] %v4557_v24  ;;  %v4610_v23 = vadd.f32 %v4609_v2, %v4557_v24  ;;  %v4633_v1 = vmul.f32 %v4557_v24, %v4557_v24  ;;  %v4560_v60 = vadd.f32 %v4559_v30, %v4463_v41  ;;  %v6008_v17 = vpop.f32.mrb[212].mxu0 }
 0x2a3   : > { %v6009_v11 = vpop.f32.mrb[213].mxu0 }
 0x2a4   : > { %v4648_v63 = vadd.f32 %v4647_v14, %v4633_v1  ;;  %4596 = vst [vmem:[%s7811_s9 + $0x48] sm:$0xff] %v4560_v60  ;;  %v4611_v16 = vadd.f32 %v4610_v23, %v4560_v60  ;;  %v4634_v28 = vmul.f32 %v4560_v60, %v4560_v60  ;;  %v6010_v44 = vadd.f32 %v6009_v11, %v6008_v17  ;;  %v6011_v25 = vpop.f32.mrb[214].mxu0 }
 0x2a5   : > { %v6012_v8 = vpop.f32.mrb[215].mxu0 }
 0x2a6   : > { %v4649_v43 = vadd.f32 %v4648_v63, %v4634_v28  ;;  %v4468_v9 = vadd.f32 %v6010_v44, %v7790_v12  ;;  %v6013_v4 = vadd.f32 %v6012_v8, %v6011_v25 }
 0x2a8   : > { %v4565_v47 = vadd.f32 %v7819_v26, %v4468_v9  ;;  %v4471_v5 = vadd.f32 %v6013_v4, %v7792_v58 }
 0x2aa   : > { %4597 = vst [vmem:[%s7811_s9 + $0x50] sm:$0xff] %v4565_v47  ;;  %v4635_v39 = vmul.f32 %v4565_v47, %v4565_v47  ;;  %v4568_v30 = vadd.f32 %v7822_v50, %v4471_v5  ;;  %v6014_v36 = vpop.f32.mrb[216].mxu0  ;;  %v4612_v38 = vadd.f32 %v4611_v16, %v4565_v47 }
 0x2ab   : > { %v6015_v57 = vpop.f32.mrb[217].mxu0 }
 0x2ac   : > { %4598 = vst [vmem:[%s7811_s9 + $0x58] sm:$0xff] %v4568_v30  ;;  %v4636_v20 = vmul.f32 %v4568_v30, %v4568_v30  ;;  %v6016_v32 = vadd.f32 %v6015_v57, %v6014_v36  ;;  %v6017_v54 = vpop.f32.mrb[218].mxu0  ;;  %v4613_v53 = vadd.f32 %v4612_v38, %v4568_v30  ;;  %v4650_v12 = vadd.f32 %v4649_v43, %v4635_v39 }
 0x2ad   : > { %v6018_v18 = vpop.f32.mrb[219].mxu0 }
 0x2ae   : > { %v6019_v31 = vadd.f32 %v6018_v18, %v6017_v54  ;;  %v4476_v26 = vadd.f32 %v6016_v32, %v7796_v61  ;;  %v4651_v58 = vadd.f32 %v4650_v12, %v4636_v20 }
 0x2b0   : > { %v4573_v3 = vadd.f32 %v4572_v56, %v4476_v26  ;;  %v4479_v33 = vadd.f32 %v6019_v31, %v7798_v22 }
 0x2b2   : > { %4599 = vst [vmem:[%s7811_s9 + $0x60] sm:$0xff] %v4573_v3  ;;  %v4614_v50 = vadd.f32 %v4613_v53, %v4573_v3  ;;  %v4637_v49 = vmul.f32 %v4573_v3, %v4573_v3  ;;  %v4576_v19 = vadd.f32 %v4575_v0, %v4479_v33  ;;  %v6020_v10 = vpop.f32.mrb[220].mxu0 }
 0x2b3   : > { %v6021_v34 = vpop.f32.mrb[221].mxu0 }
 0x2b4   : > { %v4652_v51 = vadd.f32 %v4651_v58, %v4637_v49  ;;  %4600 = vst [vmem:[%s7811_s9 + $0x68] sm:$0xff] %v4576_v19  ;;  %v4615_v48 = vadd.f32 %v4614_v50, %v4576_v19  ;;  %v4638_v62 = vmul.f32 %v4576_v19, %v4576_v19  ;;  %v6022_v27 = vadd.f32 %v6021_v34, %v6020_v10  ;;  %v6023_v21 = vpop.f32.mrb[222].mxu0 }
 0x2b5   : > { %v6024_v61 = vpop.f32.mrb[223].mxu0 }
 0x2b6   : > { %v4653_v15 = vadd.f32 %v4652_v51, %v4638_v62  ;;  %v4484_v22 = vadd.f32 %v6022_v27, %v7802_v29  ;;  %v6025_v56 = vadd.f32 %v6024_v61, %v6023_v21 }
 0x2b8   : > { %v4581_v35 = vadd.f32 %v7827_v52, %v4484_v22  ;;  %v4487_v0 = vadd.f32 %v6025_v56, %v7804_v45 }
 0x2ba   : > { %4601 = vst [vmem:[%s7811_s9 + $0x70] sm:$0xff] %v4581_v35  ;;  %v4616_v6 = vadd.f32 %v4615_v48, %v4581_v35  ;;  %v4639_v55 = vmul.f32 %v4581_v35, %v4581_v35  ;;  %v4584_v13 = vadd.f32 %v7830_v40, %v4487_v0 }
 0x2bc   : > { %v4654_v37 = vadd.f32 %v4653_v15, %v4639_v55  ;;  %4602 = vst [vmem:[%s7811_s9 + $0x78] sm:$0xff] %v4584_v13  ;;  %v4617_v2 = vadd.f32 %v4616_v6, %v4584_v13  ;;  %v4640_v46 = vmul.f32 %v4584_v13, %v4584_v13 }
 0x2be   : > { %v4618_v7 = vrot.slane %v4617_v2, 4  ;;  %v4655_v59 = vadd.f32 %v4654_v37, %v4640_v46 }
 0x2c0   : > { %v4619_v42 = vadd.f32 %v4618_v7, %v4617_v2  ;;  %v4656_v29 = vrot.slane %v4655_v59, 4 }
 0x2c2   : > { %v4620_v14 = vrot.slane %v4619_v42, 2  ;;  %v4657_v24 = vadd.f32 %v4656_v29, %v4655_v59 }
 0x2c4   : > { %v4621_v52 = vadd.f32 %v4620_v14, %v4619_v42  ;;  %v4658_v45 = vrot.slane %v4657_v24, 2 }
 0x2c6   : > { %v4622_v41 = vrot.slane %v4621_v52, 1  ;;  %v4659_v23 = vadd.f32 %v4658_v45, %v4657_v24 }
 0x2c8   : > { %v4623_v40 = vadd.f32 %v4622_v41, %v4621_v52  ;;  %v4660_v1 = vrot.slane %v4659_v23, 1 }
 0x2ca   : > { %4624 = vst [vmem:[%s187_s14] sm:$0x1] %v4623_v40  ;;  %v4661_v60 = vadd.f32 %v4660_v1, %v4659_v23 }
 0x2cc   : > { %4662 = vst [vmem:[%s187_s14 + $0x1] sm:$0x1] %v4661_v60 }
 0x2cd PF: > { %s14_s12 = sadd.s32 1, %s6625_s12  }
 0x2ce   : > { %p11_p5 = scmp.ge.s32.totalorder %s14_s12, 6  }
 0x2d0   :  { %13 = sbr.rel (!%p11_p5) target bundleno = 1 (0x1), region = 70 }

</bundles_post_ra>
